<compile_context>
chip_gen: v5e
topology: v5e:2x2
jax: 0.10.0
libtpu: 0.0.40
codegen_flags: <defaults>
</compile_context>

<pallas_src>
import functools

import jax
import jax.numpy as jnp
from jax.experimental import pallas as pl
from jax.experimental.pallas import tpu as pltpu


# ----------------------------------------------------------------------------
# Fused forward kernel (one grid step = B_blk batch elements, lane-folded)
# ----------------------------------------------------------------------------
def _fused_forward_kernel(img_ref, msk_ref, gt_ref, masks_ref,
                          w1_ref, b1_ref, w2_ref, b2_ref, we_ref, be_ref,
                          outA_ref, outB_ref, patch_ref,
                          *, H, W, C, F, B_blk, tap_rows):
    f32 = jnp.float32
    bf16 = jnp.bfloat16
    HW = H * W
    L = B_blk * HW            # lane width of one batch-folded operand
    LE = 3 * L                # lane width of the fused extractor matmul
    K = 9 * tap_rows          # padded im2col depth (each tap 8-sublane aligned)
    offsets = [(dh, dw) for dh in (-1, 0, 1) for dw in (-1, 0, 1)]

    # Lanes [L, 3L) of the scratch only get rows [8t, 8t+C) rewritten by the
    # extractor taps; zero them once so the zero-padded weight columns never
    # meet uninitialized VMEM (0 * NaN would poison the MXU accumulation).
    patch_ref[:, pl.ds(L, 2 * L)] = jnp.zeros((K, 2 * L), f32)

    def fold(ref):
        # (B_blk, c, HW) block -> lane-folded (c, B_blk*HW) f32 slab.
        if B_blk == 1:
            return ref[0].astype(f32)
        return jnp.concatenate([ref[b].astype(f32) for b in range(B_blk)],
                               axis=1)

    img = fold(img_ref)                                   # (C, L)
    msk = fold(msk_ref)
    gt = fold(gt_ref)

    def write_taps(x, row_off, lane_off):
        # Scatter the 9 shifted/masked taps of x (c, n) into im2col scratch
        # rows [t*tap_rows + row_off, +c), lanes [lane_off, +n).
        c, n = x.shape
        for t, (dh, dw) in enumerate(offsets):
            shift = dh * W + dw                           # static python int
            if shift == 0:
                tap = x                                   # centre tap: always valid
            else:
                # roll goes to the XLU slot; wrapped lanes (cross-row /
                # cross-image / cross-operand) are zeroed by the mask, which
                # reproduces SAME zero padding exactly (jnp.where, so even
                # non-finite inputs cannot leak through the padding).
                rolled = pltpu.roll(x, shift=(-shift) % n, axis=1)
                m = masks_ref[pl.ds(t * tap_rows, c), pl.ds(lane_off, n)]
                tap = jnp.where(m == 1.0, rolled, 0.0)
            patch_ref[pl.ds(t * tap_rows + row_off, c),
                      pl.ds(lane_off, n)] = tap

    def conv(w_ref, b_ref, lanes, act):
        # Single one-pass MXU matmul over the (K, lanes) im2col scratch:
        # bf16 x bf16 operands, f32 accumulation.
        patches = patch_ref[:, pl.ds(0, lanes)].astype(bf16)
        acc = jnp.dot(w_ref[...], patches, preferred_element_type=f32)
        acc = acc + b_ref[...]                            # (Cout, 1) broadcast
        if act == "tanh":
            return jnp.tanh(acc)
        return jnp.maximum(acc, 0.0)

    # --- model(image, mask): concat -> conv+tanh -> conv+tanh ---------------
    # Stage 1: image taps and mask taps are written straight into their K rows
    # (no x0 = concat([img, msk]) intermediate).
    write_taps(img, 0, 0)
    write_taps(msk, C, 0)
    out1 = conv(w1_ref, b1_ref, L, "tanh")                # (C, L)

    write_taps(out1, 0, 0)
    out2 = conv(w2_ref, b2_ref, L, "tanh")                # (C, L)

    # --- composite: mask * input + (1 - mask) * output (VPU elementwise) ----
    comp = msk * img + (1.0 - msk) * out2                 # (C, L)

    # --- extractor on [out2 | composite | gt], fused into ONE matmul --------
    write_taps(out2, 0, 0)
    write_taps(comp, 0, L)
    write_taps(gt, 0, 2 * L)
    fx = conv(we_ref, be_ref, LE, "relu")                 # (F, 3L)

    # --- merged, sublane-dense output slabs ----------------------------------
    for b in range(B_blk):
        lo = b * HW
        outA_ref[b, 0:C, :] = out1[:, lo:lo + HW].astype(outA_ref.dtype)
        outA_ref[b, C:2 * C, :] = out2[:, lo:lo + HW].astype(outA_ref.dtype)
        outB_ref[b, 0:F, :] = fx[:, lo:lo + HW].astype(outB_ref.dtype)
        outB_ref[b, F:2 * F, :] = \
            fx[:, L + lo:L + lo + HW].astype(outB_ref.dtype)
        outB_ref[b, 2 * F:3 * F, :] = \
            fx[:, 2 * L + lo:2 * L + lo + HW].astype(outB_ref.dtype)


# ----------------------------------------------------------------------------
# Wrapper helpers
# ----------------------------------------------------------------------------
def _prep_weight(w_hwio, tap_rows):
    # HWIO (3,3,Cin,Cout) -> (Cout, 9*tap_rows) bf16, each tap's Cin channels
    # zero-padded to tap_rows so every tap starts on an 8-sublane boundary of
    # the im2col scratch.
    kh, kw, cin, cout = w_hwio.shape
    w = jnp.transpose(w_hwio, (3, 0, 1, 2)).reshape(cout, kh * kw, cin)
    w = jnp.pad(w, ((0, 0), (0, 0), (0, tap_rows - cin)))
    return w.reshape(cout, kh * kw * tap_rows).astype(jnp.bfloat16)


def _tap_masks(H, W, tap_rows, reps):
    # Grid-invariant SAME-padding validity masks: row t*tap_rows + r (content
    # replicated over r) = tap t, lanes periodic with period H*W over reps
    # folded images.  Computed once (constant-folded under jit), resident.
    HW = H * W
    pos = jnp.arange(HW, dtype=jnp.int32)
    hpos = pos // W
    wpos = pos % W
    rows = []
    for dh in (-1, 0, 1):
        for dw in (-1, 0, 1):
            valid = ((hpos + dh >= 0) & (hpos + dh < H) &
                     (wpos + dw >= 0) & (wpos + dw < W))
            rows.append(jnp.tile(valid.astype(jnp.float32), reps))
    masks = jnp.stack(rows, axis=0)                       # (9, reps*HW)
    return jnp.repeat(masks, tap_rows, axis=0)            # (9*tap_rows, reps*HW)


def _pick_num_batch_blocks(N):
    # 2-TensorCore chips (megacore / v7x) shard "parallel" grid axes across
    # cores -> give them two fat steps; single-TC chips get one fat step so
    # the ~0.35us per-step overhead is paid once.
    kind = ""
    try:
        kind = jax.devices()[0].device_kind.lower()
    except Exception:
        pass
    two_tc = any(s in kind for s in ("v4", "v5p", "v7", "tpu7"))
    if two_tc and N >= 2 and N % 2 == 0:
        return 2
    return 1


def _vmem_budget_bytes(B_blk, C, F, HW, K, LE):
    blk_in = 3 * B_blk * C * HW * 4               # img/msk/gt blocks
    blk_out = B_blk * (2 * C + 3 * F) * HW * 4    # merged output blocks
    resident = K * LE * 4                         # mask slab
    scratch = K * LE * 4                          # im2col scratch
    weights = (K * (2 * C + F) + (2 * C + F)) * 4
    live = (2 * C + 3 * F + 2 * K) * LE * 4       # in-flight values (generous)
    total = 2 * (blk_in + blk_out + resident + weights) + scratch + live
    return int(total + (8 << 20))                 # + headroom


# ----------------------------------------------------------------------------
# Wrapper: FullModel.forward (NCHW in / NCHW out)
# ----------------------------------------------------------------------------
def full_model_forward(params, image, mask, gt, use_incremental_supervision=True,
                       num_batch_blocks=None):
    N, C, H, W = image.shape
    F = params["we"].shape[-1]
    HW = H * W
    assert HW % 128 == 0, "H*W must be a multiple of 128 for lane-dense slabs"

    if num_batch_blocks is None:
        num_batch_blocks = _pick_num_batch_blocks(N)
    if N % num_batch_blocks != 0:
        num_batch_blocks = 1
    B_blk = N // num_batch_blocks
    L = B_blk * HW
    LE = 3 * L

    tap_rows = ((2 * C + 7) // 8) * 8             # 8 for C=4: 8-sublane aligned taps
    K = 9 * tap_rows

    # NCHW -> (N, C, H*W): contiguous trailing dims, pure metadata reshape.
    img = image.reshape(N, C, HW)
    msk = mask.reshape(N, C, HW)
    g = gt.reshape(N, C, HW)

    w1 = _prep_weight(params["w1"], tap_rows)     # (C, K) bf16
    w2 = _prep_weight(params["w2"], tap_rows)     # (C, K) bf16
    we = _prep_weight(params["we"], tap_rows)     # (F, K) bf16
    b1 = params["b1"].reshape(C, 1).astype(jnp.float32)
    b2 = params["b2"].reshape(C, 1).astype(jnp.float32)
    be = params["be"].reshape(F, 1).astype(jnp.float32)
    masks = _tap_masks(H, W, tap_rows, 3 * B_blk)  # (K, LE) f32, grid-invariant

    vmem_bytes = _vmem_budget_bytes(B_blk, C, F, HW, K, LE)
    # TODO(synk): row-tile H with a 1-row halo for large images where the
    # whole-image im2col exceeds v7x's 64 MiB VMEM.
    assert vmem_bytes < (48 << 20), "whole-image block too large; needs row tiling"

    def batch_spec(c):
        return pl.BlockSpec((B_blk, c, HW), lambda n: (n, 0, 0))

    def resident(a):                              # weights/biases/masks stay resident
        return pl.BlockSpec(a.shape, lambda n: (0,) * a.ndim)

    kern = functools.partial(_fused_forward_kernel, H=H, W=W, C=C, F=F,
                             B_blk=B_blk, tap_rows=tap_rows)
    dt = image.dtype

    outA, outB = pl.pallas_call(
        kern,
        out_shape=(
            jax.ShapeDtypeStruct((N, 2 * C, HW), dt),   # [out1 | out2]
            jax.ShapeDtypeStruct((N, 3 * F, HW), dt),   # [feat | comp_feat | feat_gt]
        ),
        grid=(num_batch_blocks,),
        in_specs=[batch_spec(C), batch_spec(C), batch_spec(C),
                  resident(masks),
                  resident(w1), resident(b1),
                  resident(w2), resident(b2),
                  resident(we), resident(be)],
        out_specs=(batch_spec(2 * C), batch_spec(3 * F)),
        scratch_shapes=[pltpu.VMEM((K, LE), jnp.float32)],
        compiler_params=pltpu.CompilerParams(
            dimension_semantics=("parallel",),
            vmem_limit_bytes=vmem_bytes),
    )(img, msk, g, masks, w1, b1, w2, b2, we, be)

    out1 = outA[:, :C, :].reshape(N, C, H, W)
    out2 = outA[:, C:, :].reshape(N, C, H, W)
    feat = outB[:, :F, :].reshape(N, F, H, W)
    cfeat = outB[:, F:2 * F, :].reshape(N, F, H, W)
    fgt = outB[:, 2 * F:, :].reshape(N, F, H, W)

    outputs = [out1, out2]

    # start-index logic from the reference module; with the 2-stage synthetic
    # model both flag settings reduce to start == 1 (only the final output
    # gets feature supervision), which is exactly what the fused kernel does.
    n_out = len(outputs)
    start = (0 if n_out == 1 else 1) if use_incremental_supervision else n_out - 1
    assert start == 1

    return outputs, [feat], [cfeat], fgt


# ----------------------------------------------------------------------------
# Pure-JAX reference (XLA convs) for correctness checking.  Run at the same
# numerics as the kernel: bf16 operands, f32 accumulation (one MXU pass).
# ----------------------------------------------------------------------------
def _conv3x3_ref(x_nchw, w_hwio, b, act):
    out = jax.lax.conv_general_dilated(
        x_nchw.astype(jnp.bfloat16), w_hwio.astype(jnp.bfloat16),
        window_strides=(1, 1), padding="SAME",
        dimension_numbers=("NCHW", "HWIO", "NCHW"),
        preferred_element_type=jnp.float32)
    out = out + b[None, :, None, None]
    if act == "tanh":
        return jnp.tanh(out)
    if act == "relu":
        return jnp.maximum(out, 0.0)
    return out


def full_model_reference(params, image, mask, gt):
    x = jnp.concatenate([image, mask], axis=1)
    out1 = _conv3x3_ref(x, params["w1"], params["b1"], "tanh")
    out2 = _conv3x3_ref(out1, params["w2"], params["b2"], "tanh")
    comp = mask * image + (1.0 - mask) * out2
    f2 = _conv3x3_ref(out2, params["we"], params["be"], "relu")
    fc2 = _conv3x3_ref(comp, params["we"], params["be"], "relu")
    fgt = _conv3x3_ref(gt, params["we"], params["be"], "relu")
    return [out1, out2], [f2], [fc2], fgt


# ----------------------------------------------------------------------------
def make_params(key, c_img=4, c_feat=8):
    ks = jax.random.split(key, 6)
    scale = 0.1
    return {
        # stage 1: concat(image, mask) -> image channels
        "w1": scale * jax.random.normal(ks[0], (3, 3, 2 * c_img, c_img), jnp.float32),
        "b1": scale * jax.random.normal(ks[1], (c_img,), jnp.float32),
        # stage 2: image channels -> image channels
        "w2": scale * jax.random.normal(ks[2], (3, 3, c_img, c_img), jnp.float32),
        "b2": scale * jax.random.normal(ks[3], (c_img,), jnp.float32),
        # extractor: image channels -> feature channels
        "we": scale * jax.random.normal(ks[4], (3, 3, c_img, c_feat), jnp.float32),
        "be": scale * jax.random.normal(ks[5], (c_feat,), jnp.float32),
    }


if __name__ == "__main__":
    key = jax.random.PRNGKey(0)
    k_img, k_msk, k_gt, k_par = jax.random.split(key, 4)

    N, C, H, W = 2, 4, 16, 16
    F = 8
    image = jax.random.normal(k_img, (N, C, H, W), jnp.float32)
    mask = (jax.random.uniform(k_msk, (N, C, H, W)) > 0.5).astype(jnp.float32)
    gt = jax.random.normal(k_gt, (N, C, H, W), jnp.float32)
    params = make_params(k_par, c_img=C, c_feat=F)

    fwd = jax.jit(functools.partial(full_model_forward,
                                    use_incremental_supervision=True))
    outputs, feats, comp_feats, feat_gt = jax.block_until_ready(
        fwd(params, image, mask, gt))

    # structural checks (match the PyTorch FullModel return structure)
    assert len(outputs) == 2 and outputs[1].shape == (N, C, H, W)
    assert len(feats) == 1 and feats[0].shape == (N, F, H, W)
    assert len(comp_feats) == 1 and comp_feats[0].shape == (N, F, H, W)
    assert feat_gt.shape == (N, F, H, W)

    # numerical check against the XLA reference run at matching (one-pass
    # bf16 x bf16 -> f32) precision
    r_out, r_feats, r_comp, r_fgt = full_model_reference(params, image, mask, gt)

    def check(name, a, b):
        assert a.shape == b.shape, (name, a.shape, b.shape)
        ok = jnp.allclose(a, b, atol=1e-3, rtol=1e-3)
        assert ok, (name, float(jnp.max(jnp.abs(a - b))))

    check("out1", outputs[0], r_out[0])
    check("out2", outputs[1], r_out[1])
    check("feat", feats[0], r_feats[0])
    check("comp_feat", comp_feats[0], r_comp[0])
    check("feat_gt", feat_gt, r_fgt)

    print("KERNEL_OK")
</pallas_src>

<mosaic_0001>
module attributes {stable_mosaic.version = 11 : i64} {
  func.func @_fused_forward_kernel(%arg0: i32, %arg1: memref<2x4x256xf32, #tpu.memory_space<vmem>>, %arg2: memref<2x4x256xf32, #tpu.memory_space<vmem>>, %arg3: memref<2x4x256xf32, #tpu.memory_space<vmem>>, %arg4: memref<72x1536xf32, #tpu.memory_space<vmem>>, %arg5: memref<4x72xbf16, #tpu.memory_space<vmem>>, %arg6: memref<4x1xf32, #tpu.memory_space<vmem>>, %arg7: memref<4x72xbf16, #tpu.memory_space<vmem>>, %arg8: memref<4x1xf32, #tpu.memory_space<vmem>>, %arg9: memref<8x72xbf16, #tpu.memory_space<vmem>>, %arg10: memref<8x1xf32, #tpu.memory_space<vmem>>, %arg11: memref<2x8x256xf32, #tpu.memory_space<vmem>>, %arg12: memref<2x24x256xf32, #tpu.memory_space<vmem>>, %arg13: memref<72x1536xf32, #tpu.memory_space<vmem>>) attributes {dimension_semantics = [#tpu.dimension_semantics<parallel>], iteration_bounds = array<i64: 1>, scalar_prefetch = 0 : i64, scratch_operands = 1 : i64, tpu.core_type = #tpu.core_type<tc>, window_params = [{transform_indices = @transform_0, window_bounds = array<i64: 2, 4, 256>}, {transform_indices = @transform_1, window_bounds = array<i64: 2, 4, 256>}, {transform_indices = @transform_2, window_bounds = array<i64: 2, 4, 256>}, {pipeline_mode = #tpu.pipeline_mode<synchronous>, transform_indices = @transform_3, window_bounds = array<i64: 72, 1536>}, {pipeline_mode = #tpu.pipeline_mode<synchronous>, transform_indices = @transform_4, window_bounds = array<i64: 4, 72>}, {pipeline_mode = #tpu.pipeline_mode<synchronous>, transform_indices = @transform_5, window_bounds = array<i64: 4, 1>}, {pipeline_mode = #tpu.pipeline_mode<synchronous>, transform_indices = @transform_6, window_bounds = array<i64: 4, 72>}, {pipeline_mode = #tpu.pipeline_mode<synchronous>, transform_indices = @transform_7, window_bounds = array<i64: 4, 1>}, {pipeline_mode = #tpu.pipeline_mode<synchronous>, transform_indices = @transform_8, window_bounds = array<i64: 8, 72>}, {pipeline_mode = #tpu.pipeline_mode<synchronous>, transform_indices = @transform_9, window_bounds = array<i64: 8, 1>}, {transform_indices = @transform_10, window_bounds = array<i64: 2, 8, 256>}, {transform_indices = @transform_11, window_bounds = array<i64: 2, 24, 256>}]} {
    %cst = arith.constant 0.000000e+00 : f32
    %0 = vector.broadcast %cst : f32 to vector<72x1024xf32>
    %c0 = arith.constant 0 : index
    %c512 = arith.constant 512 : index
    %1 = vector.load %arg13[%c0, %c512] : memref<72x1536xf32, #tpu.memory_space<vmem>>, vector<72x1024xf32>
    tpu.vector_store %arg13[%c0, %c512], %0 {strides = array<i32>} : memref<72x1536xf32, #tpu.memory_space<vmem>>, vector<72x1024xf32>,
    %c0_0 = arith.constant 0 : index
    %c0_1 = arith.constant 0 : index
    %c0_2 = arith.constant 0 : index
    %2 = vector.load %arg1[%c0_0, %c0_1, %c0_2] : memref<2x4x256xf32, #tpu.memory_space<vmem>>, vector<1x4x256xf32>
    %3 = vector.shape_cast %2 : vector<1x4x256xf32> to vector<4x256xf32>
    %c1 = arith.constant 1 : index
    %c0_3 = arith.constant 0 : index
    %c0_4 = arith.constant 0 : index
    %4 = vector.load %arg1[%c1, %c0_3, %c0_4] : memref<2x4x256xf32, #tpu.memory_space<vmem>>, vector<1x4x256xf32>
    %5 = vector.shape_cast %4 : vector<1x4x256xf32> to vector<4x256xf32>
    %6 = tpu.concatenate %3, %5 in 1 : vector<4x256xf32>, vector<4x256xf32> -> vector<4x512xf32>
    %c0_5 = arith.constant 0 : index
    %c0_6 = arith.constant 0 : index
    %c0_7 = arith.constant 0 : index
    %7 = vector.load %arg2[%c0_5, %c0_6, %c0_7] : memref<2x4x256xf32, #tpu.memory_space<vmem>>, vector<1x4x256xf32>
    %8 = vector.shape_cast %7 : vector<1x4x256xf32> to vector<4x256xf32>
    %c1_8 = arith.constant 1 : index
    %c0_9 = arith.constant 0 : index
    %c0_10 = arith.constant 0 : index
    %9 = vector.load %arg2[%c1_8, %c0_9, %c0_10] : memref<2x4x256xf32, #tpu.memory_space<vmem>>, vector<1x4x256xf32>
    %10 = vector.shape_cast %9 : vector<1x4x256xf32> to vector<4x256xf32>
    %11 = tpu.concatenate %8, %10 in 1 : vector<4x256xf32>, vector<4x256xf32> -> vector<4x512xf32>
    %c0_11 = arith.constant 0 : index
    %c0_12 = arith.constant 0 : index
    %c0_13 = arith.constant 0 : index
    %12 = vector.load %arg3[%c0_11, %c0_12, %c0_13] : memref<2x4x256xf32, #tpu.memory_space<vmem>>, vector<1x4x256xf32>
    %13 = vector.shape_cast %12 : vector<1x4x256xf32> to vector<4x256xf32>
    %c1_14 = arith.constant 1 : index
    %c0_15 = arith.constant 0 : index
    %c0_16 = arith.constant 0 : index
    %14 = vector.load %arg3[%c1_14, %c0_15, %c0_16] : memref<2x4x256xf32, #tpu.memory_space<vmem>>, vector<1x4x256xf32>
    %15 = vector.shape_cast %14 : vector<1x4x256xf32> to vector<4x256xf32>
    %16 = tpu.concatenate %13, %15 in 1 : vector<4x256xf32>, vector<4x256xf32> -> vector<4x512xf32>
    %c17_i32 = arith.constant 17 : i32
    %17 = tpu.dynamic_rotate %6 by %c17_i32 dim 1 : vector<4x512xf32>, i32 -> vector<4x512xf32>
    %c0_17 = arith.constant 0 : index
    %c0_18 = arith.constant 0 : index
    %18 = vector.load %arg4[%c0_17, %c0_18] : memref<72x1536xf32, #tpu.memory_space<vmem>>, vector<4x512xf32>
    %cst_19 = arith.constant 1.000000e+00 : f32
    %19 = vector.broadcast %cst_19 : f32 to vector<4x512xf32>
    %20 = arith.cmpf oeq, %18, %19 : vector<4x512xf32>
    %cst_20 = arith.constant 0.000000e+00 : f32
    %21 = vector.broadcast %cst_20 : f32 to vector<4x512xf32>
    %22 = arith.select %20, %17, %21 : vector<4x512xi1>, vector<4x512xf32>
    %c0_21 = arith.constant 0 : index
    %c0_22 = arith.constant 0 : index
    %23 = vector.load %arg13[%c0_21, %c0_22] : memref<72x1536xf32, #tpu.memory_space<vmem>>, vector<4x512xf32>
    tpu.vector_store %arg13[%c0_21, %c0_22], %22 {strides = array<i32>} : memref<72x1536xf32, #tpu.memory_space<vmem>>, vector<4x512xf32>,
    %c16_i32 = arith.constant 16 : i32
    %24 = tpu.dynamic_rotate %6 by %c16_i32 dim 1 : vector<4x512xf32>, i32 -> vector<4x512xf32>
    %c8 = arith.constant 8 : index
    %c0_23 = arith.constant 0 : index
    %25 = vector.load %arg4[%c8, %c0_23] : memref<72x1536xf32, #tpu.memory_space<vmem>>, vector<4x512xf32>
    %cst_24 = arith.constant 1.000000e+00 : f32
    %26 = vector.broadcast %cst_24 : f32 to vector<4x512xf32>
    %27 = arith.cmpf oeq, %25, %26 : vector<4x512xf32>
    %cst_25 = arith.constant 0.000000e+00 : f32
    %28 = vector.broadcast %cst_25 : f32 to vector<4x512xf32>
    %29 = arith.select %27, %24, %28 : vector<4x512xi1>, vector<4x512xf32>
    %c8_26 = arith.constant 8 : index
    %c0_27 = arith.constant 0 : index
    %30 = vector.load %arg13[%c8_26, %c0_27] : memref<72x1536xf32, #tpu.memory_space<vmem>>, vector<4x512xf32>
    tpu.vector_store %arg13[%c8_26, %c0_27], %29 {strides = array<i32>} : memref<72x1536xf32, #tpu.memory_space<vmem>>, vector<4x512xf32>,
    %c15_i32 = arith.constant 15 : i32
    %31 = tpu.dynamic_rotate %6 by %c15_i32 dim 1 : vector<4x512xf32>, i32 -> vector<4x512xf32>
    %c16 = arith.constant 16 : index
    %c0_28 = arith.constant 0 : index
    %32 = vector.load %arg4[%c16, %c0_28] : memref<72x1536xf32, #tpu.memory_space<vmem>>, vector<4x512xf32>
    %cst_29 = arith.constant 1.000000e+00 : f32
    %33 = vector.broadcast %cst_29 : f32 to vector<4x512xf32>
    %34 = arith.cmpf oeq, %32, %33 : vector<4x512xf32>
    %cst_30 = arith.constant 0.000000e+00 : f32
    %35 = vector.broadcast %cst_30 : f32 to vector<4x512xf32>
    %36 = arith.select %34, %31, %35 : vector<4x512xi1>, vector<4x512xf32>
    %c16_31 = arith.constant 16 : index
    %c0_32 = arith.constant 0 : index
    %37 = vector.load %arg13[%c16_31, %c0_32] : memref<72x1536xf32, #tpu.memory_space<vmem>>, vector<4x512xf32>
    tpu.vector_store %arg13[%c16_31, %c0_32], %36 {strides = array<i32>} : memref<72x1536xf32, #tpu.memory_space<vmem>>, vector<4x512xf32>,
    %c1_i32 = arith.constant 1 : i32
    %38 = tpu.dynamic_rotate %6 by %c1_i32 dim 1 : vector<4x512xf32>, i32 -> vector<4x512xf32>
    %c24 = arith.constant 24 : index
    %c0_33 = arith.constant 0 : index
    %39 = vector.load %arg4[%c24, %c0_33] : memref<72x1536xf32, #tpu.memory_space<vmem>>, vector<4x512xf32>
    %cst_34 = arith.constant 1.000000e+00 : f32
    %40 = vector.broadcast %cst_34 : f32 to vector<4x512xf32>
    %41 = arith.cmpf oeq, %39, %40 : vector<4x512xf32>
    %cst_35 = arith.constant 0.000000e+00 : f32
    %42 = vector.broadcast %cst_35 : f32 to vector<4x512xf32>
    %43 = arith.select %41, %38, %42 : vector<4x512xi1>, vector<4x512xf32>
    %c24_36 = arith.constant 24 : index
    %c0_37 = arith.constant 0 : index
    %44 = vector.load %arg13[%c24_36, %c0_37] : memref<72x1536xf32, #tpu.memory_space<vmem>>, vector<4x512xf32>
    tpu.vector_store %arg13[%c24_36, %c0_37], %43 {strides = array<i32>} : memref<72x1536xf32, #tpu.memory_space<vmem>>, vector<4x512xf32>,
    %c32 = arith.constant 32 : index
    %c0_38 = arith.constant 0 : index
    %45 = vector.load %arg13[%c32, %c0_38] : memref<72x1536xf32, #tpu.memory_space<vmem>>, vector<4x512xf32>
    tpu.vector_store %arg13[%c32, %c0_38], %6 {strides = array<i32>} : memref<72x1536xf32, #tpu.memory_space<vmem>>, vector<4x512xf32>,
    %c511_i32 = arith.constant 511 : i32
    %46 = tpu.dynamic_rotate %6 by %c511_i32 dim 1 : vector<4x512xf32>, i32 -> vector<4x512xf32>
    %c40 = arith.constant 40 : index
    %c0_39 = arith.constant 0 : index
    %47 = vector.load %arg4[%c40, %c0_39] : memref<72x1536xf32, #tpu.memory_space<vmem>>, vector<4x512xf32>
    %cst_40 = arith.constant 1.000000e+00 : f32
    %48 = vector.broadcast %cst_40 : f32 to vector<4x512xf32>
    %49 = arith.cmpf oeq, %47, %48 : vector<4x512xf32>
    %cst_41 = arith.constant 0.000000e+00 : f32
    %50 = vector.broadcast %cst_41 : f32 to vector<4x512xf32>
    %51 = arith.select %49, %46, %50 : vector<4x512xi1>, vector<4x512xf32>
    %c40_42 = arith.constant 40 : index
    %c0_43 = arith.constant 0 : index
    %52 = vector.load %arg13[%c40_42, %c0_43] : memref<72x1536xf32, #tpu.memory_space<vmem>>, vector<4x512xf32>
    tpu.vector_store %arg13[%c40_42, %c0_43], %51 {strides = array<i32>} : memref<72x1536xf32, #tpu.memory_space<vmem>>, vector<4x512xf32>,
    %c497_i32 = arith.constant 497 : i32
    %53 = tpu.dynamic_rotate %6 by %c497_i32 dim 1 : vector<4x512xf32>, i32 -> vector<4x512xf32>
    %c48 = arith.constant 48 : index
    %c0_44 = arith.constant 0 : index
    %54 = vector.load %arg4[%c48, %c0_44] : memref<72x1536xf32, #tpu.memory_space<vmem>>, vector<4x512xf32>
    %cst_45 = arith.constant 1.000000e+00 : f32
    %55 = vector.broadcast %cst_45 : f32 to vector<4x512xf32>
    %56 = arith.cmpf oeq, %54, %55 : vector<4x512xf32>
    %cst_46 = arith.constant 0.000000e+00 : f32
    %57 = vector.broadcast %cst_46 : f32 to vector<4x512xf32>
    %58 = arith.select %56, %53, %57 : vector<4x512xi1>, vector<4x512xf32>
    %c48_47 = arith.constant 48 : index
    %c0_48 = arith.constant 0 : index
    %59 = vector.load %arg13[%c48_47, %c0_48] : memref<72x1536xf32, #tpu.memory_space<vmem>>, vector<4x512xf32>
    tpu.vector_store %arg13[%c48_47, %c0_48], %58 {strides = array<i32>} : memref<72x1536xf32, #tpu.memory_space<vmem>>, vector<4x512xf32>,
    %c496_i32 = arith.constant 496 : i32
    %60 = tpu.dynamic_rotate %6 by %c496_i32 dim 1 : vector<4x512xf32>, i32 -> vector<4x512xf32>
    %c56 = arith.constant 56 : index
    %c0_49 = arith.constant 0 : index
    %61 = vector.load %arg4[%c56, %c0_49] : memref<72x1536xf32, #tpu.memory_space<vmem>>, vector<4x512xf32>
    %cst_50 = arith.constant 1.000000e+00 : f32
    %62 = vector.broadcast %cst_50 : f32 to vector<4x512xf32>
    %63 = arith.cmpf oeq, %61, %62 : vector<4x512xf32>
    %cst_51 = arith.constant 0.000000e+00 : f32
    %64 = vector.broadcast %cst_51 : f32 to vector<4x512xf32>
    %65 = arith.select %63, %60, %64 : vector<4x512xi1>, vector<4x512xf32>
    %c56_52 = arith.constant 56 : index
    %c0_53 = arith.constant 0 : index
    %66 = vector.load %arg13[%c56_52, %c0_53] : memref<72x1536xf32, #tpu.memory_space<vmem>>, vector<4x512xf32>
    tpu.vector_store %arg13[%c56_52, %c0_53], %65 {strides = array<i32>} : memref<72x1536xf32, #tpu.memory_space<vmem>>, vector<4x512xf32>,
    %c495_i32 = arith.constant 495 : i32
    %67 = tpu.dynamic_rotate %6 by %c495_i32 dim 1 : vector<4x512xf32>, i32 -> vector<4x512xf32>
    %c64 = arith.constant 64 : index
    %c0_54 = arith.constant 0 : index
    %68 = vector.load %arg4[%c64, %c0_54] : memref<72x1536xf32, #tpu.memory_space<vmem>>, vector<4x512xf32>
    %cst_55 = arith.constant 1.000000e+00 : f32
    %69 = vector.broadcast %cst_55 : f32 to vector<4x512xf32>
    %70 = arith.cmpf oeq, %68, %69 : vector<4x512xf32>
    %cst_56 = arith.constant 0.000000e+00 : f32
    %71 = vector.broadcast %cst_56 : f32 to vector<4x512xf32>
    %72 = arith.select %70, %67, %71 : vector<4x512xi1>, vector<4x512xf32>
    %c64_57 = arith.constant 64 : index
    %c0_58 = arith.constant 0 : index
    %73 = vector.load %arg13[%c64_57, %c0_58] : memref<72x1536xf32, #tpu.memory_space<vmem>>, vector<4x512xf32>
    tpu.vector_store %arg13[%c64_57, %c0_58], %72 {strides = array<i32>} : memref<72x1536xf32, #tpu.memory_space<vmem>>, vector<4x512xf32>,
    %c17_i32_59 = arith.constant 17 : i32
    %74 = tpu.dynamic_rotate %11 by %c17_i32_59 dim 1 : vector<4x512xf32>, i32 -> vector<4x512xf32>
    %c0_60 = arith.constant 0 : index
    %c0_61 = arith.constant 0 : index
    %75 = vector.load %arg4[%c0_60, %c0_61] : memref<72x1536xf32, #tpu.memory_space<vmem>>, vector<4x512xf32>
    %cst_62 = arith.constant 1.000000e+00 : f32
    %76 = vector.broadcast %cst_62 : f32 to vector<4x512xf32>
    %77 = arith.cmpf oeq, %75, %76 : vector<4x512xf32>
    %cst_63 = arith.constant 0.000000e+00 : f32
    %78 = vector.broadcast %cst_63 : f32 to vector<4x512xf32>
    %79 = arith.select %77, %74, %78 : vector<4x512xi1>, vector<4x512xf32>
    %c4 = arith.constant 4 : index
    %c0_64 = arith.constant 0 : index
    %80 = vector.load %arg13[%c4, %c0_64] : memref<72x1536xf32, #tpu.memory_space<vmem>>, vector<4x512xf32>
    tpu.vector_store %arg13[%c4, %c0_64], %79 {strides = array<i32>} : memref<72x1536xf32, #tpu.memory_space<vmem>>, vector<4x512xf32>,
    %c16_i32_65 = arith.constant 16 : i32
    %81 = tpu.dynamic_rotate %11 by %c16_i32_65 dim 1 : vector<4x512xf32>, i32 -> vector<4x512xf32>
    %c8_66 = arith.constant 8 : index
    %c0_67 = arith.constant 0 : index
    %82 = vector.load %arg4[%c8_66, %c0_67] : memref<72x1536xf32, #tpu.memory_space<vmem>>, vector<4x512xf32>
    %cst_68 = arith.constant 1.000000e+00 : f32
    %83 = vector.broadcast %cst_68 : f32 to vector<4x512xf32>
    %84 = arith.cmpf oeq, %82, %83 : vector<4x512xf32>
    %cst_69 = arith.constant 0.000000e+00 : f32
    %85 = vector.broadcast %cst_69 : f32 to vector<4x512xf32>
    %86 = arith.select %84, %81, %85 : vector<4x512xi1>, vector<4x512xf32>
    %c12 = arith.constant 12 : index
    %c0_70 = arith.constant 0 : index
    %87 = vector.load %arg13[%c12, %c0_70] : memref<72x1536xf32, #tpu.memory_space<vmem>>, vector<4x512xf32>
    tpu.vector_store %arg13[%c12, %c0_70], %86 {strides = array<i32>} : memref<72x1536xf32, #tpu.memory_space<vmem>>, vector<4x512xf32>,
    %c15_i32_71 = arith.constant 15 : i32
    %88 = tpu.dynamic_rotate %11 by %c15_i32_71 dim 1 : vector<4x512xf32>, i32 -> vector<4x512xf32>
    %c16_72 = arith.constant 16 : index
    %c0_73 = arith.constant 0 : index
    %89 = vector.load %arg4[%c16_72, %c0_73] : memref<72x1536xf32, #tpu.memory_space<vmem>>, vector<4x512xf32>
    %cst_74 = arith.constant 1.000000e+00 : f32
    %90 = vector.broadcast %cst_74 : f32 to vector<4x512xf32>
    %91 = arith.cmpf oeq, %89, %90 : vector<4x512xf32>
    %cst_75 = arith.constant 0.000000e+00 : f32
    %92 = vector.broadcast %cst_75 : f32 to vector<4x512xf32>
    %93 = arith.select %91, %88, %92 : vector<4x512xi1>, vector<4x512xf32>
    %c20 = arith.constant 20 : index
    %c0_76 = arith.constant 0 : index
    %94 = vector.load %arg13[%c20, %c0_76] : memref<72x1536xf32, #tpu.memory_space<vmem>>, vector<4x512xf32>
    tpu.vector_store %arg13[%c20, %c0_76], %93 {strides = array<i32>} : memref<72x1536xf32, #tpu.memory_space<vmem>>, vector<4x512xf32>,
    %c1_i32_77 = arith.constant 1 : i32
    %95 = tpu.dynamic_rotate %11 by %c1_i32_77 dim 1 : vector<4x512xf32>, i32 -> vector<4x512xf32>
    %c24_78 = arith.constant 24 : index
    %c0_79 = arith.constant 0 : index
    %96 = vector.load %arg4[%c24_78, %c0_79] : memref<72x1536xf32, #tpu.memory_space<vmem>>, vector<4x512xf32>
    %cst_80 = arith.constant 1.000000e+00 : f32
    %97 = vector.broadcast %cst_80 : f32 to vector<4x512xf32>
    %98 = arith.cmpf oeq, %96, %97 : vector<4x512xf32>
    %cst_81 = arith.constant 0.000000e+00 : f32
    %99 = vector.broadcast %cst_81 : f32 to vector<4x512xf32>
    %100 = arith.select %98, %95, %99 : vector<4x512xi1>, vector<4x512xf32>
    %c28 = arith.constant 28 : index
    %c0_82 = arith.constant 0 : index
    %101 = vector.load %arg13[%c28, %c0_82] : memref<72x1536xf32, #tpu.memory_space<vmem>>, vector<4x512xf32>
    tpu.vector_store %arg13[%c28, %c0_82], %100 {strides = array<i32>} : memref<72x1536xf32, #tpu.memory_space<vmem>>, vector<4x512xf32>,
    %c36 = arith.constant 36 : index
    %c0_83 = arith.constant 0 : index
    %102 = vector.load %arg13[%c36, %c0_83] : memref<72x1536xf32, #tpu.memory_space<vmem>>, vector<4x512xf32>
    tpu.vector_store %arg13[%c36, %c0_83], %11 {strides = array<i32>} : memref<72x1536xf32, #tpu.memory_space<vmem>>, vector<4x512xf32>,
    %c511_i32_84 = arith.constant 511 : i32
    %103 = tpu.dynamic_rotate %11 by %c511_i32_84 dim 1 : vector<4x512xf32>, i32 -> vector<4x512xf32>
    %c40_85 = arith.constant 40 : index
    %c0_86 = arith.constant 0 : index
    %104 = vector.load %arg4[%c40_85, %c0_86] : memref<72x1536xf32, #tpu.memory_space<vmem>>, vector<4x512xf32>
    %cst_87 = arith.constant 1.000000e+00 : f32
    %105 = vector.broadcast %cst_87 : f32 to vector<4x512xf32>
    %106 = arith.cmpf oeq, %104, %105 : vector<4x512xf32>
    %cst_88 = arith.constant 0.000000e+00 : f32
    %107 = vector.broadcast %cst_88 : f32 to vector<4x512xf32>
    %108 = arith.select %106, %103, %107 : vector<4x512xi1>, vector<4x512xf32>
    %c44 = arith.constant 44 : index
    %c0_89 = arith.constant 0 : index
    %109 = vector.load %arg13[%c44, %c0_89] : memref<72x1536xf32, #tpu.memory_space<vmem>>, vector<4x512xf32>
    tpu.vector_store %arg13[%c44, %c0_89], %108 {strides = array<i32>} : memref<72x1536xf32, #tpu.memory_space<vmem>>, vector<4x512xf32>,
    %c497_i32_90 = arith.constant 497 : i32
    %110 = tpu.dynamic_rotate %11 by %c497_i32_90 dim 1 : vector<4x512xf32>, i32 -> vector<4x512xf32>
    %c48_91 = arith.constant 48 : index
    %c0_92 = arith.constant 0 : index
    %111 = vector.load %arg4[%c48_91, %c0_92] : memref<72x1536xf32, #tpu.memory_space<vmem>>, vector<4x512xf32>
    %cst_93 = arith.constant 1.000000e+00 : f32
    %112 = vector.broadcast %cst_93 : f32 to vector<4x512xf32>
    %113 = arith.cmpf oeq, %111, %112 : vector<4x512xf32>
    %cst_94 = arith.constant 0.000000e+00 : f32
    %114 = vector.broadcast %cst_94 : f32 to vector<4x512xf32>
    %115 = arith.select %113, %110, %114 : vector<4x512xi1>, vector<4x512xf32>
    %c52 = arith.constant 52 : index
    %c0_95 = arith.constant 0 : index
    %116 = vector.load %arg13[%c52, %c0_95] : memref<72x1536xf32, #tpu.memory_space<vmem>>, vector<4x512xf32>
    tpu.vector_store %arg13[%c52, %c0_95], %115 {strides = array<i32>} : memref<72x1536xf32, #tpu.memory_space<vmem>>, vector<4x512xf32>,
    %c496_i32_96 = arith.constant 496 : i32
    %117 = tpu.dynamic_rotate %11 by %c496_i32_96 dim 1 : vector<4x512xf32>, i32 -> vector<4x512xf32>
    %c56_97 = arith.constant 56 : index
    %c0_98 = arith.constant 0 : index
    %118 = vector.load %arg4[%c56_97, %c0_98] : memref<72x1536xf32, #tpu.memory_space<vmem>>, vector<4x512xf32>
    %cst_99 = arith.constant 1.000000e+00 : f32
    %119 = vector.broadcast %cst_99 : f32 to vector<4x512xf32>
    %120 = arith.cmpf oeq, %118, %119 : vector<4x512xf32>
    %cst_100 = arith.constant 0.000000e+00 : f32
    %121 = vector.broadcast %cst_100 : f32 to vector<4x512xf32>
    %122 = arith.select %120, %117, %121 : vector<4x512xi1>, vector<4x512xf32>
    %c60 = arith.constant 60 : index
    %c0_101 = arith.constant 0 : index
    %123 = vector.load %arg13[%c60, %c0_101] : memref<72x1536xf32, #tpu.memory_space<vmem>>, vector<4x512xf32>
    tpu.vector_store %arg13[%c60, %c0_101], %122 {strides = array<i32>} : memref<72x1536xf32, #tpu.memory_space<vmem>>, vector<4x512xf32>,
    %c495_i32_102 = arith.constant 495 : i32
    %124 = tpu.dynamic_rotate %11 by %c495_i32_102 dim 1 : vector<4x512xf32>, i32 -> vector<4x512xf32>
    %c64_103 = arith.constant 64 : index
    %c0_104 = arith.constant 0 : index
    %125 = vector.load %arg4[%c64_103, %c0_104] : memref<72x1536xf32, #tpu.memory_space<vmem>>, vector<4x512xf32>
    %cst_105 = arith.constant 1.000000e+00 : f32
    %126 = vector.broadcast %cst_105 : f32 to vector<4x512xf32>
    %127 = arith.cmpf oeq, %125, %126 : vector<4x512xf32>
    %cst_106 = arith.constant 0.000000e+00 : f32
    %128 = vector.broadcast %cst_106 : f32 to vector<4x512xf32>
    %129 = arith.select %127, %124, %128 : vector<4x512xi1>, vector<4x512xf32>
    %c68 = arith.constant 68 : index
    %c0_107 = arith.constant 0 : index
    %130 = vector.load %arg13[%c68, %c0_107] : memref<72x1536xf32, #tpu.memory_space<vmem>>, vector<4x512xf32>
    tpu.vector_store %arg13[%c68, %c0_107], %129 {strides = array<i32>} : memref<72x1536xf32, #tpu.memory_space<vmem>>, vector<4x512xf32>,
    %c0_108 = arith.constant 0 : index
    %c0_109 = arith.constant 0 : index
    %131 = vector.load %arg13[%c0_108, %c0_109] : memref<72x1536xf32, #tpu.memory_space<vmem>>, vector<72x512xf32>
    %132 = arith.truncf %131 : vector<72x512xf32> to vector<72x512xbf16>
    %c0_110 = arith.constant 0 : index
    %c0_111 = arith.constant 0 : index
    %133 = vector.load %arg5[%c0_110, %c0_111] : memref<4x72xbf16, #tpu.memory_space<vmem>>, vector<4x72xbf16>
    %cst_112 = arith.constant dense<0.000000e+00> : vector<4x512xf32>
    %134 = tpu.matmul %133, %132, %cst_112 {dimension_numbers = #tpu.dot_dimension_numbers<[1], [0], [0], [1], [0, 0, 1, 1], [], []>} : vector<4x72xbf16>, vector<72x512xbf16>, vector<4x512xf32> -> vector<4x512xf32>
    %c0_113 = arith.constant 0 : index
    %c0_114 = arith.constant 0 : index
    %135 = vector.load %arg6[%c0_113, %c0_114] : memref<4x1xf32, #tpu.memory_space<vmem>>, vector<4x1xf32>
    %136 = vector.broadcast %135 : vector<4x1xf32> to vector<4x512xf32>
    %137 = arith.addf %134, %136 : vector<4x512xf32>
    %138 = math.tanh %137 : vector<4x512xf32>
    %c17_i32_115 = arith.constant 17 : i32
    %139 = tpu.dynamic_rotate %138 by %c17_i32_115 dim 1 : vector<4x512xf32>, i32 -> vector<4x512xf32>
    %c0_116 = arith.constant 0 : index
    %c0_117 = arith.constant 0 : index
    %140 = vector.load %arg4[%c0_116, %c0_117] : memref<72x1536xf32, #tpu.memory_space<vmem>>, vector<4x512xf32>
    %cst_118 = arith.constant 1.000000e+00 : f32
    %141 = vector.broadcast %cst_118 : f32 to vector<4x512xf32>
    %142 = arith.cmpf oeq, %140, %141 : vector<4x512xf32>
    %cst_119 = arith.constant 0.000000e+00 : f32
    %143 = vector.broadcast %cst_119 : f32 to vector<4x512xf32>
    %144 = arith.select %142, %139, %143 : vector<4x512xi1>, vector<4x512xf32>
    %c0_120 = arith.constant 0 : index
    %c0_121 = arith.constant 0 : index
    %145 = vector.load %arg13[%c0_120, %c0_121] : memref<72x1536xf32, #tpu.memory_space<vmem>>, vector<4x512xf32>
    tpu.vector_store %arg13[%c0_120, %c0_121], %144 {strides = array<i32>} : memref<72x1536xf32, #tpu.memory_space<vmem>>, vector<4x512xf32>,
    %c16_i32_122 = arith.constant 16 : i32
    %146 = tpu.dynamic_rotate %138 by %c16_i32_122 dim 1 : vector<4x512xf32>, i32 -> vector<4x512xf32>
    %c8_123 = arith.constant 8 : index
    %c0_124 = arith.constant 0 : index
    %147 = vector.load %arg4[%c8_123, %c0_124] : memref<72x1536xf32, #tpu.memory_space<vmem>>, vector<4x512xf32>
    %cst_125 = arith.constant 1.000000e+00 : f32
    %148 = vector.broadcast %cst_125 : f32 to vector<4x512xf32>
    %149 = arith.cmpf oeq, %147, %148 : vector<4x512xf32>
    %cst_126 = arith.constant 0.000000e+00 : f32
    %150 = vector.broadcast %cst_126 : f32 to vector<4x512xf32>
    %151 = arith.select %149, %146, %150 : vector<4x512xi1>, vector<4x512xf32>
    %c8_127 = arith.constant 8 : index
    %c0_128 = arith.constant 0 : index
    %152 = vector.load %arg13[%c8_127, %c0_128] : memref<72x1536xf32, #tpu.memory_space<vmem>>, vector<4x512xf32>
    tpu.vector_store %arg13[%c8_127, %c0_128], %151 {strides = array<i32>} : memref<72x1536xf32, #tpu.memory_space<vmem>>, vector<4x512xf32>,
    %c15_i32_129 = arith.constant 15 : i32
    %153 = tpu.dynamic_rotate %138 by %c15_i32_129 dim 1 : vector<4x512xf32>, i32 -> vector<4x512xf32>
    %c16_130 = arith.constant 16 : index
    %c0_131 = arith.constant 0 : index
    %154 = vector.load %arg4[%c16_130, %c0_131] : memref<72x1536xf32, #tpu.memory_space<vmem>>, vector<4x512xf32>
    %cst_132 = arith.constant 1.000000e+00 : f32
    %155 = vector.broadcast %cst_132 : f32 to vector<4x512xf32>
    %156 = arith.cmpf oeq, %154, %155 : vector<4x512xf32>
    %cst_133 = arith.constant 0.000000e+00 : f32
    %157 = vector.broadcast %cst_133 : f32 to vector<4x512xf32>
    %158 = arith.select %156, %153, %157 : vector<4x512xi1>, vector<4x512xf32>
    %c16_134 = arith.constant 16 : index
    %c0_135 = arith.constant 0 : index
    %159 = vector.load %arg13[%c16_134, %c0_135] : memref<72x1536xf32, #tpu.memory_space<vmem>>, vector<4x512xf32>
    tpu.vector_store %arg13[%c16_134, %c0_135], %158 {strides = array<i32>} : memref<72x1536xf32, #tpu.memory_space<vmem>>, vector<4x512xf32>,
    %c1_i32_136 = arith.constant 1 : i32
    %160 = tpu.dynamic_rotate %138 by %c1_i32_136 dim 1 : vector<4x512xf32>, i32 -> vector<4x512xf32>
    %c24_137 = arith.constant 24 : index
    %c0_138 = arith.constant 0 : index
    %161 = vector.load %arg4[%c24_137, %c0_138] : memref<72x1536xf32, #tpu.memory_space<vmem>>, vector<4x512xf32>
    %cst_139 = arith.constant 1.000000e+00 : f32
    %162 = vector.broadcast %cst_139 : f32 to vector<4x512xf32>
    %163 = arith.cmpf oeq, %161, %162 : vector<4x512xf32>
    %cst_140 = arith.constant 0.000000e+00 : f32
    %164 = vector.broadcast %cst_140 : f32 to vector<4x512xf32>
    %165 = arith.select %163, %160, %164 : vector<4x512xi1>, vector<4x512xf32>
    %c24_141 = arith.constant 24 : index
    %c0_142 = arith.constant 0 : index
    %166 = vector.load %arg13[%c24_141, %c0_142] : memref<72x1536xf32, #tpu.memory_space<vmem>>, vector<4x512xf32>
    tpu.vector_store %arg13[%c24_141, %c0_142], %165 {strides = array<i32>} : memref<72x1536xf32, #tpu.memory_space<vmem>>, vector<4x512xf32>,
    %c32_143 = arith.constant 32 : index
    %c0_144 = arith.constant 0 : index
    %167 = vector.load %arg13[%c32_143, %c0_144] : memref<72x1536xf32, #tpu.memory_space<vmem>>, vector<4x512xf32>
    tpu.vector_store %arg13[%c32_143, %c0_144], %138 {strides = array<i32>} : memref<72x1536xf32, #tpu.memory_space<vmem>>, vector<4x512xf32>,
    %c511_i32_145 = arith.constant 511 : i32
    %168 = tpu.dynamic_rotate %138 by %c511_i32_145 dim 1 : vector<4x512xf32>, i32 -> vector<4x512xf32>
    %c40_146 = arith.constant 40 : index
    %c0_147 = arith.constant 0 : index
    %169 = vector.load %arg4[%c40_146, %c0_147] : memref<72x1536xf32, #tpu.memory_space<vmem>>, vector<4x512xf32>
    %cst_148 = arith.constant 1.000000e+00 : f32
    %170 = vector.broadcast %cst_148 : f32 to vector<4x512xf32>
    %171 = arith.cmpf oeq, %169, %170 : vector<4x512xf32>
    %cst_149 = arith.constant 0.000000e+00 : f32
    %172 = vector.broadcast %cst_149 : f32 to vector<4x512xf32>
    %173 = arith.select %171, %168, %172 : vector<4x512xi1>, vector<4x512xf32>
    %c40_150 = arith.constant 40 : index
    %c0_151 = arith.constant 0 : index
    %174 = vector.load %arg13[%c40_150, %c0_151] : memref<72x1536xf32, #tpu.memory_space<vmem>>, vector<4x512xf32>
    tpu.vector_store %arg13[%c40_150, %c0_151], %173 {strides = array<i32>} : memref<72x1536xf32, #tpu.memory_space<vmem>>, vector<4x512xf32>,
    %c497_i32_152 = arith.constant 497 : i32
    %175 = tpu.dynamic_rotate %138 by %c497_i32_152 dim 1 : vector<4x512xf32>, i32 -> vector<4x512xf32>
    %c48_153 = arith.constant 48 : index
    %c0_154 = arith.constant 0 : index
    %176 = vector.load %arg4[%c48_153, %c0_154] : memref<72x1536xf32, #tpu.memory_space<vmem>>, vector<4x512xf32>
    %cst_155 = arith.constant 1.000000e+00 : f32
    %177 = vector.broadcast %cst_155 : f32 to vector<4x512xf32>
    %178 = arith.cmpf oeq, %176, %177 : vector<4x512xf32>
    %cst_156 = arith.constant 0.000000e+00 : f32
    %179 = vector.broadcast %cst_156 : f32 to vector<4x512xf32>
    %180 = arith.select %178, %175, %179 : vector<4x512xi1>, vector<4x512xf32>
    %c48_157 = arith.constant 48 : index
    %c0_158 = arith.constant 0 : index
    %181 = vector.load %arg13[%c48_157, %c0_158] : memref<72x1536xf32, #tpu.memory_space<vmem>>, vector<4x512xf32>
    tpu.vector_store %arg13[%c48_157, %c0_158], %180 {strides = array<i32>} : memref<72x1536xf32, #tpu.memory_space<vmem>>, vector<4x512xf32>,
    %c496_i32_159 = arith.constant 496 : i32
    %182 = tpu.dynamic_rotate %138 by %c496_i32_159 dim 1 : vector<4x512xf32>, i32 -> vector<4x512xf32>
    %c56_160 = arith.constant 56 : index
    %c0_161 = arith.constant 0 : index
    %183 = vector.load %arg4[%c56_160, %c0_161] : memref<72x1536xf32, #tpu.memory_space<vmem>>, vector<4x512xf32>
    %cst_162 = arith.constant 1.000000e+00 : f32
    %184 = vector.broadcast %cst_162 : f32 to vector<4x512xf32>
    %185 = arith.cmpf oeq, %183, %184 : vector<4x512xf32>
    %cst_163 = arith.constant 0.000000e+00 : f32
    %186 = vector.broadcast %cst_163 : f32 to vector<4x512xf32>
    %187 = arith.select %185, %182, %186 : vector<4x512xi1>, vector<4x512xf32>
    %c56_164 = arith.constant 56 : index
    %c0_165 = arith.constant 0 : index
    %188 = vector.load %arg13[%c56_164, %c0_165] : memref<72x1536xf32, #tpu.memory_space<vmem>>, vector<4x512xf32>
    tpu.vector_store %arg13[%c56_164, %c0_165], %187 {strides = array<i32>} : memref<72x1536xf32, #tpu.memory_space<vmem>>, vector<4x512xf32>,
    %c495_i32_166 = arith.constant 495 : i32
    %189 = tpu.dynamic_rotate %138 by %c495_i32_166 dim 1 : vector<4x512xf32>, i32 -> vector<4x512xf32>
    %c64_167 = arith.constant 64 : index
    %c0_168 = arith.constant 0 : index
    %190 = vector.load %arg4[%c64_167, %c0_168] : memref<72x1536xf32, #tpu.memory_space<vmem>>, vector<4x512xf32>
    %cst_169 = arith.constant 1.000000e+00 : f32
    %191 = vector.broadcast %cst_169 : f32 to vector<4x512xf32>
    %192 = arith.cmpf oeq, %190, %191 : vector<4x512xf32>
    %cst_170 = arith.constant 0.000000e+00 : f32
    %193 = vector.broadcast %cst_170 : f32 to vector<4x512xf32>
    %194 = arith.select %192, %189, %193 : vector<4x512xi1>, vector<4x512xf32>
    %c64_171 = arith.constant 64 : index
    %c0_172 = arith.constant 0 : index
    %195 = vector.load %arg13[%c64_171, %c0_172] : memref<72x1536xf32, #tpu.memory_space<vmem>>, vector<4x512xf32>
    tpu.vector_store %arg13[%c64_171, %c0_172], %194 {strides = array<i32>} : memref<72x1536xf32, #tpu.memory_space<vmem>>, vector<4x512xf32>,
    %c0_173 = arith.constant 0 : index
    %c0_174 = arith.constant 0 : index
    %196 = vector.load %arg13[%c0_173, %c0_174] : memref<72x1536xf32, #tpu.memory_space<vmem>>, vector<72x512xf32>
    %197 = arith.truncf %196 : vector<72x512xf32> to vector<72x512xbf16>
    %c0_175 = arith.constant 0 : index
    %c0_176 = arith.constant 0 : index
    %198 = vector.load %arg7[%c0_175, %c0_176] : memref<4x72xbf16, #tpu.memory_space<vmem>>, vector<4x72xbf16>
    %cst_177 = arith.constant dense<0.000000e+00> : vector<4x512xf32>
    %199 = tpu.matmul %198, %197, %cst_177 {dimension_numbers = #tpu.dot_dimension_numbers<[1], [0], [0], [1], [0, 0, 1, 1], [], []>} : vector<4x72xbf16>, vector<72x512xbf16>, vector<4x512xf32> -> vector<4x512xf32>
    %c0_178 = arith.constant 0 : index
    %c0_179 = arith.constant 0 : index
    %200 = vector.load %arg8[%c0_178, %c0_179] : memref<4x1xf32, #tpu.memory_space<vmem>>, vector<4x1xf32>
    %201 = vector.broadcast %200 : vector<4x1xf32> to vector<4x512xf32>
    %202 = arith.addf %199, %201 : vector<4x512xf32>
    %203 = math.tanh %202 : vector<4x512xf32>
    %204 = arith.mulf %11, %6 : vector<4x512xf32>
    %cst_180 = arith.constant 1.000000e+00 : f32
    %205 = vector.broadcast %cst_180 : f32 to vector<4x512xf32>
    %206 = arith.subf %205, %11 : vector<4x512xf32>
    %207 = arith.mulf %206, %203 : vector<4x512xf32>
    %208 = arith.addf %204, %207 : vector<4x512xf32>
    %c17_i32_181 = arith.constant 17 : i32
    %209 = tpu.dynamic_rotate %203 by %c17_i32_181 dim 1 : vector<4x512xf32>, i32 -> vector<4x512xf32>
    %c0_182 = arith.constant 0 : index
    %c0_183 = arith.constant 0 : index
    %210 = vector.load %arg4[%c0_182, %c0_183] : memref<72x1536xf32, #tpu.memory_space<vmem>>, vector<4x512xf32>
    %cst_184 = arith.constant 1.000000e+00 : f32
    %211 = vector.broadcast %cst_184 : f32 to vector<4x512xf32>
    %212 = arith.cmpf oeq, %210, %211 : vector<4x512xf32>
    %cst_185 = arith.constant 0.000000e+00 : f32
    %213 = vector.broadcast %cst_185 : f32 to vector<4x512xf32>
    %214 = arith.select %212, %209, %213 : vector<4x512xi1>, vector<4x512xf32>
    %c0_186 = arith.constant 0 : index
    %c0_187 = arith.constant 0 : index
    %215 = vector.load %arg13[%c0_186, %c0_187] : memref<72x1536xf32, #tpu.memory_space<vmem>>, vector<4x512xf32>
    tpu.vector_store %arg13[%c0_186, %c0_187], %214 {strides = array<i32>} : memref<72x1536xf32, #tpu.memory_space<vmem>>, vector<4x512xf32>,
    %c16_i32_188 = arith.constant 16 : i32
    %216 = tpu.dynamic_rotate %203 by %c16_i32_188 dim 1 : vector<4x512xf32>, i32 -> vector<4x512xf32>
    %c8_189 = arith.constant 8 : index
    %c0_190 = arith.constant 0 : index
    %217 = vector.load %arg4[%c8_189, %c0_190] : memref<72x1536xf32, #tpu.memory_space<vmem>>, vector<4x512xf32>
    %cst_191 = arith.constant 1.000000e+00 : f32
    %218 = vector.broadcast %cst_191 : f32 to vector<4x512xf32>
    %219 = arith.cmpf oeq, %217, %218 : vector<4x512xf32>
    %cst_192 = arith.constant 0.000000e+00 : f32
    %220 = vector.broadcast %cst_192 : f32 to vector<4x512xf32>
    %221 = arith.select %219, %216, %220 : vector<4x512xi1>, vector<4x512xf32>
    %c8_193 = arith.constant 8 : index
    %c0_194 = arith.constant 0 : index
    %222 = vector.load %arg13[%c8_193, %c0_194] : memref<72x1536xf32, #tpu.memory_space<vmem>>, vector<4x512xf32>
    tpu.vector_store %arg13[%c8_193, %c0_194], %221 {strides = array<i32>} : memref<72x1536xf32, #tpu.memory_space<vmem>>, vector<4x512xf32>,
    %c15_i32_195 = arith.constant 15 : i32
    %223 = tpu.dynamic_rotate %203 by %c15_i32_195 dim 1 : vector<4x512xf32>, i32 -> vector<4x512xf32>
    %c16_196 = arith.constant 16 : index
    %c0_197 = arith.constant 0 : index
    %224 = vector.load %arg4[%c16_196, %c0_197] : memref<72x1536xf32, #tpu.memory_space<vmem>>, vector<4x512xf32>
    %cst_198 = arith.constant 1.000000e+00 : f32
    %225 = vector.broadcast %cst_198 : f32 to vector<4x512xf32>
    %226 = arith.cmpf oeq, %224, %225 : vector<4x512xf32>
    %cst_199 = arith.constant 0.000000e+00 : f32
    %227 = vector.broadcast %cst_199 : f32 to vector<4x512xf32>
    %228 = arith.select %226, %223, %227 : vector<4x512xi1>, vector<4x512xf32>
    %c16_200 = arith.constant 16 : index
    %c0_201 = arith.constant 0 : index
    %229 = vector.load %arg13[%c16_200, %c0_201] : memref<72x1536xf32, #tpu.memory_space<vmem>>, vector<4x512xf32>
    tpu.vector_store %arg13[%c16_200, %c0_201], %228 {strides = array<i32>} : memref<72x1536xf32, #tpu.memory_space<vmem>>, vector<4x512xf32>,
    %c1_i32_202 = arith.constant 1 : i32
    %230 = tpu.dynamic_rotate %203 by %c1_i32_202 dim 1 : vector<4x512xf32>, i32 -> vector<4x512xf32>
    %c24_203 = arith.constant 24 : index
    %c0_204 = arith.constant 0 : index
    %231 = vector.load %arg4[%c24_203, %c0_204] : memref<72x1536xf32, #tpu.memory_space<vmem>>, vector<4x512xf32>
    %cst_205 = arith.constant 1.000000e+00 : f32
    %232 = vector.broadcast %cst_205 : f32 to vector<4x512xf32>
    %233 = arith.cmpf oeq, %231, %232 : vector<4x512xf32>
    %cst_206 = arith.constant 0.000000e+00 : f32
    %234 = vector.broadcast %cst_206 : f32 to vector<4x512xf32>
    %235 = arith.select %233, %230, %234 : vector<4x512xi1>, vector<4x512xf32>
    %c24_207 = arith.constant 24 : index
    %c0_208 = arith.constant 0 : index
    %236 = vector.load %arg13[%c24_207, %c0_208] : memref<72x1536xf32, #tpu.memory_space<vmem>>, vector<4x512xf32>
    tpu.vector_store %arg13[%c24_207, %c0_208], %235 {strides = array<i32>} : memref<72x1536xf32, #tpu.memory_space<vmem>>, vector<4x512xf32>,
    %c32_209 = arith.constant 32 : index
    %c0_210 = arith.constant 0 : index
    %237 = vector.load %arg13[%c32_209, %c0_210] : memref<72x1536xf32, #tpu.memory_space<vmem>>, vector<4x512xf32>
    tpu.vector_store %arg13[%c32_209, %c0_210], %203 {strides = array<i32>} : memref<72x1536xf32, #tpu.memory_space<vmem>>, vector<4x512xf32>,
    %c511_i32_211 = arith.constant 511 : i32
    %238 = tpu.dynamic_rotate %203 by %c511_i32_211 dim 1 : vector<4x512xf32>, i32 -> vector<4x512xf32>
    %c40_212 = arith.constant 40 : index
    %c0_213 = arith.constant 0 : index
    %239 = vector.load %arg4[%c40_212, %c0_213] : memref<72x1536xf32, #tpu.memory_space<vmem>>, vector<4x512xf32>
    %cst_214 = arith.constant 1.000000e+00 : f32
    %240 = vector.broadcast %cst_214 : f32 to vector<4x512xf32>
    %241 = arith.cmpf oeq, %239, %240 : vector<4x512xf32>
    %cst_215 = arith.constant 0.000000e+00 : f32
    %242 = vector.broadcast %cst_215 : f32 to vector<4x512xf32>
    %243 = arith.select %241, %238, %242 : vector<4x512xi1>, vector<4x512xf32>
    %c40_216 = arith.constant 40 : index
    %c0_217 = arith.constant 0 : index
    %244 = vector.load %arg13[%c40_216, %c0_217] : memref<72x1536xf32, #tpu.memory_space<vmem>>, vector<4x512xf32>
    tpu.vector_store %arg13[%c40_216, %c0_217], %243 {strides = array<i32>} : memref<72x1536xf32, #tpu.memory_space<vmem>>, vector<4x512xf32>,
    %c497_i32_218 = arith.constant 497 : i32
    %245 = tpu.dynamic_rotate %203 by %c497_i32_218 dim 1 : vector<4x512xf32>, i32 -> vector<4x512xf32>
    %c48_219 = arith.constant 48 : index
    %c0_220 = arith.constant 0 : index
    %246 = vector.load %arg4[%c48_219, %c0_220] : memref<72x1536xf32, #tpu.memory_space<vmem>>, vector<4x512xf32>
    %cst_221 = arith.constant 1.000000e+00 : f32
    %247 = vector.broadcast %cst_221 : f32 to vector<4x512xf32>
    %248 = arith.cmpf oeq, %246, %247 : vector<4x512xf32>
    %cst_222 = arith.constant 0.000000e+00 : f32
    %249 = vector.broadcast %cst_222 : f32 to vector<4x512xf32>
    %250 = arith.select %248, %245, %249 : vector<4x512xi1>, vector<4x512xf32>
    %c48_223 = arith.constant 48 : index
    %c0_224 = arith.constant 0 : index
    %251 = vector.load %arg13[%c48_223, %c0_224] : memref<72x1536xf32, #tpu.memory_space<vmem>>, vector<4x512xf32>
    tpu.vector_store %arg13[%c48_223, %c0_224], %250 {strides = array<i32>} : memref<72x1536xf32, #tpu.memory_space<vmem>>, vector<4x512xf32>,
    %c496_i32_225 = arith.constant 496 : i32
    %252 = tpu.dynamic_rotate %203 by %c496_i32_225 dim 1 : vector<4x512xf32>, i32 -> vector<4x512xf32>
    %c56_226 = arith.constant 56 : index
    %c0_227 = arith.constant 0 : index
    %253 = vector.load %arg4[%c56_226, %c0_227] : memref<72x1536xf32, #tpu.memory_space<vmem>>, vector<4x512xf32>
    %cst_228 = arith.constant 1.000000e+00 : f32
    %254 = vector.broadcast %cst_228 : f32 to vector<4x512xf32>
    %255 = arith.cmpf oeq, %253, %254 : vector<4x512xf32>
    %cst_229 = arith.constant 0.000000e+00 : f32
    %256 = vector.broadcast %cst_229 : f32 to vector<4x512xf32>
    %257 = arith.select %255, %252, %256 : vector<4x512xi1>, vector<4x512xf32>
    %c56_230 = arith.constant 56 : index
    %c0_231 = arith.constant 0 : index
    %258 = vector.load %arg13[%c56_230, %c0_231] : memref<72x1536xf32, #tpu.memory_space<vmem>>, vector<4x512xf32>
    tpu.vector_store %arg13[%c56_230, %c0_231], %257 {strides = array<i32>} : memref<72x1536xf32, #tpu.memory_space<vmem>>, vector<4x512xf32>,
    %c495_i32_232 = arith.constant 495 : i32
    %259 = tpu.dynamic_rotate %203 by %c495_i32_232 dim 1 : vector<4x512xf32>, i32 -> vector<4x512xf32>
    %c64_233 = arith.constant 64 : index
    %c0_234 = arith.constant 0 : index
    %260 = vector.load %arg4[%c64_233, %c0_234] : memref<72x1536xf32, #tpu.memory_space<vmem>>, vector<4x512xf32>
    %cst_235 = arith.constant 1.000000e+00 : f32
    %261 = vector.broadcast %cst_235 : f32 to vector<4x512xf32>
    %262 = arith.cmpf oeq, %260, %261 : vector<4x512xf32>
    %cst_236 = arith.constant 0.000000e+00 : f32
    %263 = vector.broadcast %cst_236 : f32 to vector<4x512xf32>
    %264 = arith.select %262, %259, %263 : vector<4x512xi1>, vector<4x512xf32>
    %c64_237 = arith.constant 64 : index
    %c0_238 = arith.constant 0 : index
    %265 = vector.load %arg13[%c64_237, %c0_238] : memref<72x1536xf32, #tpu.memory_space<vmem>>, vector<4x512xf32>
    tpu.vector_store %arg13[%c64_237, %c0_238], %264 {strides = array<i32>} : memref<72x1536xf32, #tpu.memory_space<vmem>>, vector<4x512xf32>,
    %c17_i32_239 = arith.constant 17 : i32
    %266 = tpu.dynamic_rotate %208 by %c17_i32_239 dim 1 : vector<4x512xf32>, i32 -> vector<4x512xf32>
    %c0_240 = arith.constant 0 : index
    %c512_241 = arith.constant 512 : index
    %267 = vector.load %arg4[%c0_240, %c512_241] : memref<72x1536xf32, #tpu.memory_space<vmem>>, vector<4x512xf32>
    %cst_242 = arith.constant 1.000000e+00 : f32
    %268 = vector.broadcast %cst_242 : f32 to vector<4x512xf32>
    %269 = arith.cmpf oeq, %267, %268 : vector<4x512xf32>
    %cst_243 = arith.constant 0.000000e+00 : f32
    %270 = vector.broadcast %cst_243 : f32 to vector<4x512xf32>
    %271 = arith.select %269, %266, %270 : vector<4x512xi1>, vector<4x512xf32>
    %c0_244 = arith.constant 0 : index
    %c512_245 = arith.constant 512 : index
    %272 = vector.load %arg13[%c0_244, %c512_245] : memref<72x1536xf32, #tpu.memory_space<vmem>>, vector<4x512xf32>
    tpu.vector_store %arg13[%c0_244, %c512_245], %271 {strides = array<i32>} : memref<72x1536xf32, #tpu.memory_space<vmem>>, vector<4x512xf32>,
    %c16_i32_246 = arith.constant 16 : i32
    %273 = tpu.dynamic_rotate %208 by %c16_i32_246 dim 1 : vector<4x512xf32>, i32 -> vector<4x512xf32>
    %c8_247 = arith.constant 8 : index
    %c512_248 = arith.constant 512 : index
    %274 = vector.load %arg4[%c8_247, %c512_248] : memref<72x1536xf32, #tpu.memory_space<vmem>>, vector<4x512xf32>
    %cst_249 = arith.constant 1.000000e+00 : f32
    %275 = vector.broadcast %cst_249 : f32 to vector<4x512xf32>
    %276 = arith.cmpf oeq, %274, %275 : vector<4x512xf32>
    %cst_250 = arith.constant 0.000000e+00 : f32
    %277 = vector.broadcast %cst_250 : f32 to vector<4x512xf32>
    %278 = arith.select %276, %273, %277 : vector<4x512xi1>, vector<4x512xf32>
    %c8_251 = arith.constant 8 : index
    %c512_252 = arith.constant 512 : index
    %279 = vector.load %arg13[%c8_251, %c512_252] : memref<72x1536xf32, #tpu.memory_space<vmem>>, vector<4x512xf32>
    tpu.vector_store %arg13[%c8_251, %c512_252], %278 {strides = array<i32>} : memref<72x1536xf32, #tpu.memory_space<vmem>>, vector<4x512xf32>,
    %c15_i32_253 = arith.constant 15 : i32
    %280 = tpu.dynamic_rotate %208 by %c15_i32_253 dim 1 : vector<4x512xf32>, i32 -> vector<4x512xf32>
    %c16_254 = arith.constant 16 : index
    %c512_255 = arith.constant 512 : index
    %281 = vector.load %arg4[%c16_254, %c512_255] : memref<72x1536xf32, #tpu.memory_space<vmem>>, vector<4x512xf32>
    %cst_256 = arith.constant 1.000000e+00 : f32
    %282 = vector.broadcast %cst_256 : f32 to vector<4x512xf32>
    %283 = arith.cmpf oeq, %281, %282 : vector<4x512xf32>
    %cst_257 = arith.constant 0.000000e+00 : f32
    %284 = vector.broadcast %cst_257 : f32 to vector<4x512xf32>
    %285 = arith.select %283, %280, %284 : vector<4x512xi1>, vector<4x512xf32>
    %c16_258 = arith.constant 16 : index
    %c512_259 = arith.constant 512 : index
    %286 = vector.load %arg13[%c16_258, %c512_259] : memref<72x1536xf32, #tpu.memory_space<vmem>>, vector<4x512xf32>
    tpu.vector_store %arg13[%c16_258, %c512_259], %285 {strides = array<i32>} : memref<72x1536xf32, #tpu.memory_space<vmem>>, vector<4x512xf32>,
    %c1_i32_260 = arith.constant 1 : i32
    %287 = tpu.dynamic_rotate %208 by %c1_i32_260 dim 1 : vector<4x512xf32>, i32 -> vector<4x512xf32>
    %c24_261 = arith.constant 24 : index
    %c512_262 = arith.constant 512 : index
    %288 = vector.load %arg4[%c24_261, %c512_262] : memref<72x1536xf32, #tpu.memory_space<vmem>>, vector<4x512xf32>
    %cst_263 = arith.constant 1.000000e+00 : f32
    %289 = vector.broadcast %cst_263 : f32 to vector<4x512xf32>
    %290 = arith.cmpf oeq, %288, %289 : vector<4x512xf32>
    %cst_264 = arith.constant 0.000000e+00 : f32
    %291 = vector.broadcast %cst_264 : f32 to vector<4x512xf32>
    %292 = arith.select %290, %287, %291 : vector<4x512xi1>, vector<4x512xf32>
    %c24_265 = arith.constant 24 : index
    %c512_266 = arith.constant 512 : index
    %293 = vector.load %arg13[%c24_265, %c512_266] : memref<72x1536xf32, #tpu.memory_space<vmem>>, vector<4x512xf32>
    tpu.vector_store %arg13[%c24_265, %c512_266], %292 {strides = array<i32>} : memref<72x1536xf32, #tpu.memory_space<vmem>>, vector<4x512xf32>,
    %c32_267 = arith.constant 32 : index
    %c512_268 = arith.constant 512 : index
    %294 = vector.load %arg13[%c32_267, %c512_268] : memref<72x1536xf32, #tpu.memory_space<vmem>>, vector<4x512xf32>
    tpu.vector_store %arg13[%c32_267, %c512_268], %208 {strides = array<i32>} : memref<72x1536xf32, #tpu.memory_space<vmem>>, vector<4x512xf32>,
    %c511_i32_269 = arith.constant 511 : i32
    %295 = tpu.dynamic_rotate %208 by %c511_i32_269 dim 1 : vector<4x512xf32>, i32 -> vector<4x512xf32>
    %c40_270 = arith.constant 40 : index
    %c512_271 = arith.constant 512 : index
    %296 = vector.load %arg4[%c40_270, %c512_271] : memref<72x1536xf32, #tpu.memory_space<vmem>>, vector<4x512xf32>
    %cst_272 = arith.constant 1.000000e+00 : f32
    %297 = vector.broadcast %cst_272 : f32 to vector<4x512xf32>
    %298 = arith.cmpf oeq, %296, %297 : vector<4x512xf32>
    %cst_273 = arith.constant 0.000000e+00 : f32
    %299 = vector.broadcast %cst_273 : f32 to vector<4x512xf32>
    %300 = arith.select %298, %295, %299 : vector<4x512xi1>, vector<4x512xf32>
    %c40_274 = arith.constant 40 : index
    %c512_275 = arith.constant 512 : index
    %301 = vector.load %arg13[%c40_274, %c512_275] : memref<72x1536xf32, #tpu.memory_space<vmem>>, vector<4x512xf32>
    tpu.vector_store %arg13[%c40_274, %c512_275], %300 {strides = array<i32>} : memref<72x1536xf32, #tpu.memory_space<vmem>>, vector<4x512xf32>,
    %c497_i32_276 = arith.constant 497 : i32
    %302 = tpu.dynamic_rotate %208 by %c497_i32_276 dim 1 : vector<4x512xf32>, i32 -> vector<4x512xf32>
    %c48_277 = arith.constant 48 : index
    %c512_278 = arith.constant 512 : index
    %303 = vector.load %arg4[%c48_277, %c512_278] : memref<72x1536xf32, #tpu.memory_space<vmem>>, vector<4x512xf32>
    %cst_279 = arith.constant 1.000000e+00 : f32
    %304 = vector.broadcast %cst_279 : f32 to vector<4x512xf32>
    %305 = arith.cmpf oeq, %303, %304 : vector<4x512xf32>
    %cst_280 = arith.constant 0.000000e+00 : f32
    %306 = vector.broadcast %cst_280 : f32 to vector<4x512xf32>
    %307 = arith.select %305, %302, %306 : vector<4x512xi1>, vector<4x512xf32>
    %c48_281 = arith.constant 48 : index
    %c512_282 = arith.constant 512 : index
    %308 = vector.load %arg13[%c48_281, %c512_282] : memref<72x1536xf32, #tpu.memory_space<vmem>>, vector<4x512xf32>
    tpu.vector_store %arg13[%c48_281, %c512_282], %307 {strides = array<i32>} : memref<72x1536xf32, #tpu.memory_space<vmem>>, vector<4x512xf32>,
    %c496_i32_283 = arith.constant 496 : i32
    %309 = tpu.dynamic_rotate %208 by %c496_i32_283 dim 1 : vector<4x512xf32>, i32 -> vector<4x512xf32>
    %c56_284 = arith.constant 56 : index
    %c512_285 = arith.constant 512 : index
    %310 = vector.load %arg4[%c56_284, %c512_285] : memref<72x1536xf32, #tpu.memory_space<vmem>>, vector<4x512xf32>
    %cst_286 = arith.constant 1.000000e+00 : f32
    %311 = vector.broadcast %cst_286 : f32 to vector<4x512xf32>
    %312 = arith.cmpf oeq, %310, %311 : vector<4x512xf32>
    %cst_287 = arith.constant 0.000000e+00 : f32
    %313 = vector.broadcast %cst_287 : f32 to vector<4x512xf32>
    %314 = arith.select %312, %309, %313 : vector<4x512xi1>, vector<4x512xf32>
    %c56_288 = arith.constant 56 : index
    %c512_289 = arith.constant 512 : index
    %315 = vector.load %arg13[%c56_288, %c512_289] : memref<72x1536xf32, #tpu.memory_space<vmem>>, vector<4x512xf32>
    tpu.vector_store %arg13[%c56_288, %c512_289], %314 {strides = array<i32>} : memref<72x1536xf32, #tpu.memory_space<vmem>>, vector<4x512xf32>,
    %c495_i32_290 = arith.constant 495 : i32
    %316 = tpu.dynamic_rotate %208 by %c495_i32_290 dim 1 : vector<4x512xf32>, i32 -> vector<4x512xf32>
    %c64_291 = arith.constant 64 : index
    %c512_292 = arith.constant 512 : index
    %317 = vector.load %arg4[%c64_291, %c512_292] : memref<72x1536xf32, #tpu.memory_space<vmem>>, vector<4x512xf32>
    %cst_293 = arith.constant 1.000000e+00 : f32
    %318 = vector.broadcast %cst_293 : f32 to vector<4x512xf32>
    %319 = arith.cmpf oeq, %317, %318 : vector<4x512xf32>
    %cst_294 = arith.constant 0.000000e+00 : f32
    %320 = vector.broadcast %cst_294 : f32 to vector<4x512xf32>
    %321 = arith.select %319, %316, %320 : vector<4x512xi1>, vector<4x512xf32>
    %c64_295 = arith.constant 64 : index
    %c512_296 = arith.constant 512 : index
    %322 = vector.load %arg13[%c64_295, %c512_296] : memref<72x1536xf32, #tpu.memory_space<vmem>>, vector<4x512xf32>
    tpu.vector_store %arg13[%c64_295, %c512_296], %321 {strides = array<i32>} : memref<72x1536xf32, #tpu.memory_space<vmem>>, vector<4x512xf32>,
    %c17_i32_297 = arith.constant 17 : i32
    %323 = tpu.dynamic_rotate %16 by %c17_i32_297 dim 1 : vector<4x512xf32>, i32 -> vector<4x512xf32>
    %c0_298 = arith.constant 0 : index
    %c1024 = arith.constant 1024 : index
    %324 = vector.load %arg4[%c0_298, %c1024] : memref<72x1536xf32, #tpu.memory_space<vmem>>, vector<4x512xf32>
    %cst_299 = arith.constant 1.000000e+00 : f32
    %325 = vector.broadcast %cst_299 : f32 to vector<4x512xf32>
    %326 = arith.cmpf oeq, %324, %325 : vector<4x512xf32>
    %cst_300 = arith.constant 0.000000e+00 : f32
    %327 = vector.broadcast %cst_300 : f32 to vector<4x512xf32>
    %328 = arith.select %326, %323, %327 : vector<4x512xi1>, vector<4x512xf32>
    %c0_301 = arith.constant 0 : index
    %c1024_302 = arith.constant 1024 : index
    %329 = vector.load %arg13[%c0_301, %c1024_302] : memref<72x1536xf32, #tpu.memory_space<vmem>>, vector<4x512xf32>
    tpu.vector_store %arg13[%c0_301, %c1024_302], %328 {strides = array<i32>} : memref<72x1536xf32, #tpu.memory_space<vmem>>, vector<4x512xf32>,
    %c16_i32_303 = arith.constant 16 : i32
    %330 = tpu.dynamic_rotate %16 by %c16_i32_303 dim 1 : vector<4x512xf32>, i32 -> vector<4x512xf32>
    %c8_304 = arith.constant 8 : index
    %c1024_305 = arith.constant 1024 : index
    %331 = vector.load %arg4[%c8_304, %c1024_305] : memref<72x1536xf32, #tpu.memory_space<vmem>>, vector<4x512xf32>
    %cst_306 = arith.constant 1.000000e+00 : f32
    %332 = vector.broadcast %cst_306 : f32 to vector<4x512xf32>
    %333 = arith.cmpf oeq, %331, %332 : vector<4x512xf32>
    %cst_307 = arith.constant 0.000000e+00 : f32
    %334 = vector.broadcast %cst_307 : f32 to vector<4x512xf32>
    %335 = arith.select %333, %330, %334 : vector<4x512xi1>, vector<4x512xf32>
    %c8_308 = arith.constant 8 : index
    %c1024_309 = arith.constant 1024 : index
    %336 = vector.load %arg13[%c8_308, %c1024_309] : memref<72x1536xf32, #tpu.memory_space<vmem>>, vector<4x512xf32>
    tpu.vector_store %arg13[%c8_308, %c1024_309], %335 {strides = array<i32>} : memref<72x1536xf32, #tpu.memory_space<vmem>>, vector<4x512xf32>,
    %c15_i32_310 = arith.constant 15 : i32
    %337 = tpu.dynamic_rotate %16 by %c15_i32_310 dim 1 : vector<4x512xf32>, i32 -> vector<4x512xf32>
    %c16_311 = arith.constant 16 : index
    %c1024_312 = arith.constant 1024 : index
    %338 = vector.load %arg4[%c16_311, %c1024_312] : memref<72x1536xf32, #tpu.memory_space<vmem>>, vector<4x512xf32>
    %cst_313 = arith.constant 1.000000e+00 : f32
    %339 = vector.broadcast %cst_313 : f32 to vector<4x512xf32>
    %340 = arith.cmpf oeq, %338, %339 : vector<4x512xf32>
    %cst_314 = arith.constant 0.000000e+00 : f32
    %341 = vector.broadcast %cst_314 : f32 to vector<4x512xf32>
    %342 = arith.select %340, %337, %341 : vector<4x512xi1>, vector<4x512xf32>
    %c16_315 = arith.constant 16 : index
    %c1024_316 = arith.constant 1024 : index
    %343 = vector.load %arg13[%c16_315, %c1024_316] : memref<72x1536xf32, #tpu.memory_space<vmem>>, vector<4x512xf32>
    tpu.vector_store %arg13[%c16_315, %c1024_316], %342 {strides = array<i32>} : memref<72x1536xf32, #tpu.memory_space<vmem>>, vector<4x512xf32>,
    %c1_i32_317 = arith.constant 1 : i32
    %344 = tpu.dynamic_rotate %16 by %c1_i32_317 dim 1 : vector<4x512xf32>, i32 -> vector<4x512xf32>
    %c24_318 = arith.constant 24 : index
    %c1024_319 = arith.constant 1024 : index
    %345 = vector.load %arg4[%c24_318, %c1024_319] : memref<72x1536xf32, #tpu.memory_space<vmem>>, vector<4x512xf32>
    %cst_320 = arith.constant 1.000000e+00 : f32
    %346 = vector.broadcast %cst_320 : f32 to vector<4x512xf32>
    %347 = arith.cmpf oeq, %345, %346 : vector<4x512xf32>
    %cst_321 = arith.constant 0.000000e+00 : f32
    %348 = vector.broadcast %cst_321 : f32 to vector<4x512xf32>
    %349 = arith.select %347, %344, %348 : vector<4x512xi1>, vector<4x512xf32>
    %c24_322 = arith.constant 24 : index
    %c1024_323 = arith.constant 1024 : index
    %350 = vector.load %arg13[%c24_322, %c1024_323] : memref<72x1536xf32, #tpu.memory_space<vmem>>, vector<4x512xf32>
    tpu.vector_store %arg13[%c24_322, %c1024_323], %349 {strides = array<i32>} : memref<72x1536xf32, #tpu.memory_space<vmem>>, vector<4x512xf32>,
    %c32_324 = arith.constant 32 : index
    %c1024_325 = arith.constant 1024 : index
    %351 = vector.load %arg13[%c32_324, %c1024_325] : memref<72x1536xf32, #tpu.memory_space<vmem>>, vector<4x512xf32>
    tpu.vector_store %arg13[%c32_324, %c1024_325], %16 {strides = array<i32>} : memref<72x1536xf32, #tpu.memory_space<vmem>>, vector<4x512xf32>,
    %c511_i32_326 = arith.constant 511 : i32
    %352 = tpu.dynamic_rotate %16 by %c511_i32_326 dim 1 : vector<4x512xf32>, i32 -> vector<4x512xf32>
    %c40_327 = arith.constant 40 : index
    %c1024_328 = arith.constant 1024 : index
    %353 = vector.load %arg4[%c40_327, %c1024_328] : memref<72x1536xf32, #tpu.memory_space<vmem>>, vector<4x512xf32>
    %cst_329 = arith.constant 1.000000e+00 : f32
    %354 = vector.broadcast %cst_329 : f32 to vector<4x512xf32>
    %355 = arith.cmpf oeq, %353, %354 : vector<4x512xf32>
    %cst_330 = arith.constant 0.000000e+00 : f32
    %356 = vector.broadcast %cst_330 : f32 to vector<4x512xf32>
    %357 = arith.select %355, %352, %356 : vector<4x512xi1>, vector<4x512xf32>
    %c40_331 = arith.constant 40 : index
    %c1024_332 = arith.constant 1024 : index
    %358 = vector.load %arg13[%c40_331, %c1024_332] : memref<72x1536xf32, #tpu.memory_space<vmem>>, vector<4x512xf32>
    tpu.vector_store %arg13[%c40_331, %c1024_332], %357 {strides = array<i32>} : memref<72x1536xf32, #tpu.memory_space<vmem>>, vector<4x512xf32>,
    %c497_i32_333 = arith.constant 497 : i32
    %359 = tpu.dynamic_rotate %16 by %c497_i32_333 dim 1 : vector<4x512xf32>, i32 -> vector<4x512xf32>
    %c48_334 = arith.constant 48 : index
    %c1024_335 = arith.constant 1024 : index
    %360 = vector.load %arg4[%c48_334, %c1024_335] : memref<72x1536xf32, #tpu.memory_space<vmem>>, vector<4x512xf32>
    %cst_336 = arith.constant 1.000000e+00 : f32
    %361 = vector.broadcast %cst_336 : f32 to vector<4x512xf32>
    %362 = arith.cmpf oeq, %360, %361 : vector<4x512xf32>
    %cst_337 = arith.constant 0.000000e+00 : f32
    %363 = vector.broadcast %cst_337 : f32 to vector<4x512xf32>
    %364 = arith.select %362, %359, %363 : vector<4x512xi1>, vector<4x512xf32>
    %c48_338 = arith.constant 48 : index
    %c1024_339 = arith.constant 1024 : index
    %365 = vector.load %arg13[%c48_338, %c1024_339] : memref<72x1536xf32, #tpu.memory_space<vmem>>, vector<4x512xf32>
    tpu.vector_store %arg13[%c48_338, %c1024_339], %364 {strides = array<i32>} : memref<72x1536xf32, #tpu.memory_space<vmem>>, vector<4x512xf32>,
    %c496_i32_340 = arith.constant 496 : i32
    %366 = tpu.dynamic_rotate %16 by %c496_i32_340 dim 1 : vector<4x512xf32>, i32 -> vector<4x512xf32>
    %c56_341 = arith.constant 56 : index
    %c1024_342 = arith.constant 1024 : index
    %367 = vector.load %arg4[%c56_341, %c1024_342] : memref<72x1536xf32, #tpu.memory_space<vmem>>, vector<4x512xf32>
    %cst_343 = arith.constant 1.000000e+00 : f32
    %368 = vector.broadcast %cst_343 : f32 to vector<4x512xf32>
    %369 = arith.cmpf oeq, %367, %368 : vector<4x512xf32>
    %cst_344 = arith.constant 0.000000e+00 : f32
    %370 = vector.broadcast %cst_344 : f32 to vector<4x512xf32>
    %371 = arith.select %369, %366, %370 : vector<4x512xi1>, vector<4x512xf32>
    %c56_345 = arith.constant 56 : index
    %c1024_346 = arith.constant 1024 : index
    %372 = vector.load %arg13[%c56_345, %c1024_346] : memref<72x1536xf32, #tpu.memory_space<vmem>>, vector<4x512xf32>
    tpu.vector_store %arg13[%c56_345, %c1024_346], %371 {strides = array<i32>} : memref<72x1536xf32, #tpu.memory_space<vmem>>, vector<4x512xf32>,
    %c495_i32_347 = arith.constant 495 : i32
    %373 = tpu.dynamic_rotate %16 by %c495_i32_347 dim 1 : vector<4x512xf32>, i32 -> vector<4x512xf32>
    %c64_348 = arith.constant 64 : index
    %c1024_349 = arith.constant 1024 : index
    %374 = vector.load %arg4[%c64_348, %c1024_349] : memref<72x1536xf32, #tpu.memory_space<vmem>>, vector<4x512xf32>
    %cst_350 = arith.constant 1.000000e+00 : f32
    %375 = vector.broadcast %cst_350 : f32 to vector<4x512xf32>
    %376 = arith.cmpf oeq, %374, %375 : vector<4x512xf32>
    %cst_351 = arith.constant 0.000000e+00 : f32
    %377 = vector.broadcast %cst_351 : f32 to vector<4x512xf32>
    %378 = arith.select %376, %373, %377 : vector<4x512xi1>, vector<4x512xf32>
    %c64_352 = arith.constant 64 : index
    %c1024_353 = arith.constant 1024 : index
    %379 = vector.load %arg13[%c64_352, %c1024_353] : memref<72x1536xf32, #tpu.memory_space<vmem>>, vector<4x512xf32>
    tpu.vector_store %arg13[%c64_352, %c1024_353], %378 {strides = array<i32>} : memref<72x1536xf32, #tpu.memory_space<vmem>>, vector<4x512xf32>,
    %c0_354 = arith.constant 0 : index
    %c0_355 = arith.constant 0 : index
    %380 = vector.load %arg13[%c0_354, %c0_355] : memref<72x1536xf32, #tpu.memory_space<vmem>>, vector<72x1536xf32>
    %381 = arith.truncf %380 : vector<72x1536xf32> to vector<72x1536xbf16>
    %c0_356 = arith.constant 0 : index
    %c0_357 = arith.constant 0 : index
    %382 = vector.load %arg9[%c0_356, %c0_357] : memref<8x72xbf16, #tpu.memory_space<vmem>>, vector<8x72xbf16>
    %cst_358 = arith.constant dense<0.000000e+00> : vector<8x1536xf32>
    %383 = tpu.matmul %382, %381, %cst_358 {dimension_numbers = #tpu.dot_dimension_numbers<[1], [0], [0], [1], [0, 0, 1, 1], [], []>} : vector<8x72xbf16>, vector<72x1536xbf16>, vector<8x1536xf32> -> vector<8x1536xf32>
    %c0_359 = arith.constant 0 : index
    %c0_360 = arith.constant 0 : index
    %384 = vector.load %arg10[%c0_359, %c0_360] : memref<8x1xf32, #tpu.memory_space<vmem>>, vector<8x1xf32>
    %385 = vector.broadcast %384 : vector<8x1xf32> to vector<8x1536xf32>
    %386 = arith.addf %383, %385 : vector<8x1536xf32>
    %cst_361 = arith.constant 0.000000e+00 : f32
    %387 = vector.broadcast %cst_361 : f32 to vector<8x1536xf32>
    %388 = arith.maximumf %386, %387 : vector<8x1536xf32>
    %389 = vector.extract_strided_slice %138 {offsets = [0, 0], sizes = [4, 256], strides = [1, 1]} : vector<4x512xf32> to vector<4x256xf32>
    %c0_362 = arith.constant 0 : index
    %c0_363 = arith.constant 0 : index
    %c0_364 = arith.constant 0 : index
    %390 = vector.load %arg11[%c0_362, %c0_363, %c0_364] : memref<2x8x256xf32, #tpu.memory_space<vmem>>, vector<1x4x256xf32>
    %391 = vector.shape_cast %390 : vector<1x4x256xf32> to vector<4x256xf32>
    %392 = vector.shape_cast %389 : vector<4x256xf32> to vector<1x4x256xf32>
    tpu.vector_store %arg11[%c0_362, %c0_363, %c0_364], %392 {strides = array<i32>} : memref<2x8x256xf32, #tpu.memory_space<vmem>>, vector<1x4x256xf32>,
    %393 = vector.extract_strided_slice %203 {offsets = [0, 0], sizes = [4, 256], strides = [1, 1]} : vector<4x512xf32> to vector<4x256xf32>
    %c0_365 = arith.constant 0 : index
    %c4_366 = arith.constant 4 : index
    %c0_367 = arith.constant 0 : index
    %394 = vector.load %arg11[%c0_365, %c4_366, %c0_367] : memref<2x8x256xf32, #tpu.memory_space<vmem>>, vector<1x4x256xf32>
    %395 = vector.shape_cast %394 : vector<1x4x256xf32> to vector<4x256xf32>
    %396 = vector.shape_cast %393 : vector<4x256xf32> to vector<1x4x256xf32>
    tpu.vector_store %arg11[%c0_365, %c4_366, %c0_367], %396 {strides = array<i32>} : memref<2x8x256xf32, #tpu.memory_space<vmem>>, vector<1x4x256xf32>,
    %397 = vector.extract_strided_slice %388 {offsets = [0, 0], sizes = [8, 256], strides = [1, 1]} : vector<8x1536xf32> to vector<8x256xf32>
    %c0_368 = arith.constant 0 : index
    %c0_369 = arith.constant 0 : index
    %c0_370 = arith.constant 0 : index
    %398 = vector.load %arg12[%c0_368, %c0_369, %c0_370] : memref<2x24x256xf32, #tpu.memory_space<vmem>>, vector<1x8x256xf32>
    %399 = vector.shape_cast %398 : vector<1x8x256xf32> to vector<8x256xf32>
    %400 = vector.shape_cast %397 : vector<8x256xf32> to vector<1x8x256xf32>
    tpu.vector_store %arg12[%c0_368, %c0_369, %c0_370], %400 {strides = array<i32>} : memref<2x24x256xf32, #tpu.memory_space<vmem>>, vector<1x8x256xf32>,
    %401 = vector.extract_strided_slice %388 {offsets = [0, 512], sizes = [8, 256], strides = [1, 1]} : vector<8x1536xf32> to vector<8x256xf32>
    %c0_371 = arith.constant 0 : index
    %c8_372 = arith.constant 8 : index
    %c0_373 = arith.constant 0 : index
    %402 = vector.load %arg12[%c0_371, %c8_372, %c0_373] : memref<2x24x256xf32, #tpu.memory_space<vmem>>, vector<1x8x256xf32>
    %403 = vector.shape_cast %402 : vector<1x8x256xf32> to vector<8x256xf32>
    %404 = vector.shape_cast %401 : vector<8x256xf32> to vector<1x8x256xf32>
    tpu.vector_store %arg12[%c0_371, %c8_372, %c0_373], %404 {strides = array<i32>} : memref<2x24x256xf32, #tpu.memory_space<vmem>>, vector<1x8x256xf32>,
    %405 = vector.extract_strided_slice %388 {offsets = [0, 1024], sizes = [8, 256], strides = [1, 1]} : vector<8x1536xf32> to vector<8x256xf32>
    %c0_374 = arith.constant 0 : index
    %c16_375 = arith.constant 16 : index
    %c0_376 = arith.constant 0 : index
    %406 = vector.load %arg12[%c0_374, %c16_375, %c0_376] : memref<2x24x256xf32, #tpu.memory_space<vmem>>, vector<1x8x256xf32>
    %407 = vector.shape_cast %406 : vector<1x8x256xf32> to vector<8x256xf32>
    %408 = vector.shape_cast %405 : vector<8x256xf32> to vector<1x8x256xf32>
    tpu.vector_store %arg12[%c0_374, %c16_375, %c0_376], %408 {strides = array<i32>} : memref<2x24x256xf32, #tpu.memory_space<vmem>>, vector<1x8x256xf32>,
    %409 = vector.extract_strided_slice %138 {offsets = [0, 256], sizes = [4, 256], strides = [1, 1]} : vector<4x512xf32> to vector<4x256xf32>
    %c1_377 = arith.constant 1 : index
    %c0_378 = arith.constant 0 : index
    %c0_379 = arith.constant 0 : index
    %410 = vector.load %arg11[%c1_377, %c0_378, %c0_379] : memref<2x8x256xf32, #tpu.memory_space<vmem>>, vector<1x4x256xf32>
    %411 = vector.shape_cast %410 : vector<1x4x256xf32> to vector<4x256xf32>
    %412 = vector.shape_cast %409 : vector<4x256xf32> to vector<1x4x256xf32>
    tpu.vector_store %arg11[%c1_377, %c0_378, %c0_379], %412 {strides = array<i32>} : memref<2x8x256xf32, #tpu.memory_space<vmem>>, vector<1x4x256xf32>,
    %413 = vector.extract_strided_slice %203 {offsets = [0, 256], sizes = [4, 256], strides = [1, 1]} : vector<4x512xf32> to vector<4x256xf32>
    %c1_380 = arith.constant 1 : index
    %c4_381 = arith.constant 4 : index
    %c0_382 = arith.constant 0 : index
    %414 = vector.load %arg11[%c1_380, %c4_381, %c0_382] : memref<2x8x256xf32, #tpu.memory_space<vmem>>, vector<1x4x256xf32>
    %415 = vector.shape_cast %414 : vector<1x4x256xf32> to vector<4x256xf32>
    %416 = vector.shape_cast %413 : vector<4x256xf32> to vector<1x4x256xf32>
    tpu.vector_store %arg11[%c1_380, %c4_381, %c0_382], %416 {strides = array<i32>} : memref<2x8x256xf32, #tpu.memory_space<vmem>>, vector<1x4x256xf32>,
    %417 = vector.extract_strided_slice %388 {offsets = [0, 256], sizes = [8, 256], strides = [1, 1]} : vector<8x1536xf32> to vector<8x256xf32>
    %c1_383 = arith.constant 1 : index
    %c0_384 = arith.constant 0 : index
    %c0_385 = arith.constant 0 : index
    %418 = vector.load %arg12[%c1_383, %c0_384, %c0_385] : memref<2x24x256xf32, #tpu.memory_space<vmem>>, vector<1x8x256xf32>
    %419 = vector.shape_cast %418 : vector<1x8x256xf32> to vector<8x256xf32>
    %420 = vector.shape_cast %417 : vector<8x256xf32> to vector<1x8x256xf32>
    tpu.vector_store %arg12[%c1_383, %c0_384, %c0_385], %420 {strides = array<i32>} : memref<2x24x256xf32, #tpu.memory_space<vmem>>, vector<1x8x256xf32>,
    %421 = vector.extract_strided_slice %388 {offsets = [0, 768], sizes = [8, 256], strides = [1, 1]} : vector<8x1536xf32> to vector<8x256xf32>
    %c1_386 = arith.constant 1 : index
    %c8_387 = arith.constant 8 : index
    %c0_388 = arith.constant 0 : index
    %422 = vector.load %arg12[%c1_386, %c8_387, %c0_388] : memref<2x24x256xf32, #tpu.memory_space<vmem>>, vector<1x8x256xf32>
    %423 = vector.shape_cast %422 : vector<1x8x256xf32> to vector<8x256xf32>
    %424 = vector.shape_cast %421 : vector<8x256xf32> to vector<1x8x256xf32>
    tpu.vector_store %arg12[%c1_386, %c8_387, %c0_388], %424 {strides = array<i32>} : memref<2x24x256xf32, #tpu.memory_space<vmem>>, vector<1x8x256xf32>,
    %425 = vector.extract_strided_slice %388 {offsets = [0, 1280], sizes = [8, 256], strides = [1, 1]} : vector<8x1536xf32> to vector<8x256xf32>
    %c1_389 = arith.constant 1 : index
    %c16_390 = arith.constant 16 : index
    %c0_391 = arith.constant 0 : index
    %426 = vector.load %arg12[%c1_389, %c16_390, %c0_391] : memref<2x24x256xf32, #tpu.memory_space<vmem>>, vector<1x8x256xf32>
    %427 = vector.shape_cast %426 : vector<1x8x256xf32> to vector<8x256xf32>
    %428 = vector.shape_cast %425 : vector<8x256xf32> to vector<1x8x256xf32>
    tpu.vector_store %arg12[%c1_389, %c16_390, %c0_391], %428 {strides = array<i32>} : memref<2x24x256xf32, #tpu.memory_space<vmem>>, vector<1x8x256xf32>,
    return
  }
  func.func @transform_0(%arg0: i32) -> (i32, i32, i32) {
    %c0_i32 = arith.constant 0 : i32
    %c0_i32_0 = arith.constant 0 : i32
    %c0_i32_1 = arith.constant 0 : i32
    return %arg0, %c0_i32, %c0_i32_0 : i32, i32, i32
  }
  func.func @transform_1(%arg0: i32) -> (i32, i32, i32) {
    %c0_i32 = arith.constant 0 : i32
    %c0_i32_0 = arith.constant 0 : i32
    %c0_i32_1 = arith.constant 0 : i32
    return %arg0, %c0_i32, %c0_i32_0 : i32, i32, i32
  }
  func.func @transform_2(%arg0: i32) -> (i32, i32, i32) {
    %c0_i32 = arith.constant 0 : i32
    %c0_i32_0 = arith.constant 0 : i32
    %c0_i32_1 = arith.constant 0 : i32
    return %arg0, %c0_i32, %c0_i32_0 : i32, i32, i32
  }
  func.func @transform_3(%arg0: i32) -> (i32, i32) {
    %c0_i32 = arith.constant 0 : i32
    %c0_i32_0 = arith.constant 0 : i32
    %c0_i32_1 = arith.constant 0 : i32
    return %c0_i32, %c0_i32_0 : i32, i32
  }
  func.func @transform_4(%arg0: i32) -> (i32, i32) {
    %c0_i32 = arith.constant 0 : i32
    %c0_i32_0 = arith.constant 0 : i32
    %c0_i32_1 = arith.constant 0 : i32
    return %c0_i32, %c0_i32_0 : i32, i32
  }
  func.func @transform_5(%arg0: i32) -> (i32, i32) {
    %c0_i32 = arith.constant 0 : i32
    %c0_i32_0 = arith.constant 0 : i32
    %c0_i32_1 = arith.constant 0 : i32
    return %c0_i32, %c0_i32_0 : i32, i32
  }
  func.func @transform_6(%arg0: i32) -> (i32, i32) {
    %c0_i32 = arith.constant 0 : i32
    %c0_i32_0 = arith.constant 0 : i32
    %c0_i32_1 = arith.constant 0 : i32
    return %c0_i32, %c0_i32_0 : i32, i32
  }
  func.func @transform_7(%arg0: i32) -> (i32, i32) {
    %c0_i32 = arith.constant 0 : i32
    %c0_i32_0 = arith.constant 0 : i32
    %c0_i32_1 = arith.constant 0 : i32
    return %c0_i32, %c0_i32_0 : i32, i32
  }
  func.func @transform_8(%arg0: i32) -> (i32, i32) {
    %c0_i32 = arith.constant 0 : i32
    %c0_i32_0 = arith.constant 0 : i32
    %c0_i32_1 = arith.constant 0 : i32
    return %c0_i32, %c0_i32_0 : i32, i32
  }
  func.func @transform_9(%arg0: i32) -> (i32, i32) {
    %c0_i32 = arith.constant 0 : i32
    %c0_i32_0 = arith.constant 0 : i32
    %c0_i32_1 = arith.constant 0 : i32
    return %c0_i32, %c0_i32_0 : i32, i32
  }
  func.func @transform_10(%arg0: i32) -> (i32, i32, i32) {
    %c0_i32 = arith.constant 0 : i32
    %c0_i32_0 = arith.constant 0 : i32
    %c0_i32_1 = arith.constant 0 : i32
    return %arg0, %c0_i32, %c0_i32_0 : i32, i32, i32
  }
  func.func @transform_11(%arg0: i32) -> (i32, i32, i32) {
    %c0_i32 = arith.constant 0 : i32
    %c0_i32_0 = arith.constant 0 : i32
    %c0_i32_1 = arith.constant 0 : i32
    return %arg0, %c0_i32, %c0_i32_0 : i32, i32, i32
  }
}

</mosaic_0001>

<bundles_post_ra>
// kernel: full_model_forward.1
= control target key start
LH: loop header
LB: loop body
LE: loop exit
PB: predicated region body
PF: predicated region fallthrough
CT: control target
= control target key end

     0   :  { %s2409_s21 = smov 111   ;;  %s2410_s22 = smov 113   ;;  %v163_v13 = vlaneseq  ;;  %vm792_vm9 = vcmask 1043456   ;;  %s4566_s0 = inlined_call_operand.vmem [shape: f32[2,4,256], index: 0, kind: input, shape index: {}]   ;;  %s4567_s1 = inlined_call_operand.vmem [shape: f32[2,4,256], index: 1, kind: input, shape index: {}]   ;;  %s4568_s3 = inlined_call_operand.vmem [shape: f32[72,1536], index: 3, kind: input, shape index: {}]   ;;  %s4569_s5 = inlined_call_operand.vmem [shape: f32[4,1], index: 5, kind: input, shape index: {}]   ;;  %s4570_s4 = inlined_call_operand.vmem [shape: bf16[4,72], index: 4, kind: input, shape index: {}]   ;;  %s4571_s7 = inlined_call_operand.vmem [shape: f32[4,1], index: 7, kind: input, shape index: {}]   ;;  %s4572_s2 = inlined_call_operand.vmem [shape: f32[2,4,256], index: 2, kind: input, shape index: {}]   ;;  %s4573_s10 = inlined_call_operand.vmem [shape: f32[2,8,256], index: 10, kind: output, shape index: {0}]   ;;  %s4574_s6 = inlined_call_operand.vmem [shape: bf16[4,72], index: 6, kind: input, shape index: {}]   ;;  %s4575_s8 = inlined_call_operand.vmem [shape: bf16[8,72], index: 8, kind: input, shape index: {}]   ;;  %s4576_s9 = inlined_call_operand.vmem [shape: f32[8,1], index: 9, kind: input, shape index: {}]   ;;  %s4577_s11 = inlined_call_operand.vmem [shape: f32[2,24,256], index: 11, kind: output, shape index: {1}]  }
   0x1   :  { %v110_v0 = vld [vmem:[%s4566_s0] sm:$0xff]  ;;  %v2347_v1 = vld [vmem:[%s4566_s0 + $0x8] sm:$0xff]  ;;  %s2412_s26 = smov 127   ;;  %s2413_s27 = smov 15   ;;  %v379_v15 = vld [vmem:[%s4568_s3 + $0x310] sm:$0xf] }
   0x2   :  { %114 = vst [vmem:[#allocation1] ss:$2 sm:$0xff] %v110_v0  ;;  %v125_v4 = vld [vmem:[%s4567_s1] sm:$0xff]  ;;  %v2348_v7 = vld [vmem:[%s4567_s1 + $0x8] sm:$0xff]  ;;  %s2411_s1 = smov 112   ;;  %s2414_s28 = smov 1  }
   0x3   :  { %v2583_v14 = vand.u32 127, %v163_v13  ;;  %vm383_vm0 = vcmp.eq.f32.partialorder %v379_v15, 1.0  ;;  %v380_v19 = vld [vmem:[%s4568_s3 + $0x318] sm:$0xf]  ;;  %s2415_s14 = smov 17   ;;  %s2416_s15 = smov 16  }
   0x4   :  { %vm384_vm2 = vcmp.eq.f32.partialorder %v380_v19, 1.0  ;;  %v620_v28 = vld [vmem:[%s4568_s3 + $0x258] sm:$0xf]  ;;  %v619_v40 = vld [vmem:[%s4568_s3 + $0x250] sm:$0xf] }
   0x5   :  { %vm372_vm1 = vcmp.lt.s32.totalorder %v2583_v14, 111  ;;  %v700_v29 = vld [vmem:[%s4568_s3 + $0x318] sm:$0xf]  ;;  %vm314_vm3 = vcmp.lt.s32.totalorder %v2583_v14, 113  ;;  %vm624_vm4 = vcmp.eq.f32.partialorder %v620_v28, 1.0  ;;  %vm343_vm6 = vcmp.lt.s32.totalorder %v2583_v14, 112 }
   0x6   :  { %vm704_vm5 = vcmp.eq.f32.partialorder %v700_v29, 1.0  ;;  %v660_v39 = vld [vmem:[%s4568_s3 + $0x2b8] sm:$0xf]  ;;  %vm623_vm8 = vcmp.eq.f32.partialorder %v619_v40, 1.0  ;;  %v697_v50 = vld [vmem:[%s4568_s3 + $0x300] sm:$0xf] }
   0x7   :  { %vm664_vm7 = vcmp.eq.f32.partialorder %v660_v39, 1.0  ;;  %v659_v51 = vld [vmem:[%s4568_s3 + $0x2b0] sm:$0xf]  ;;  %vm701_vm10 = vcmp.eq.f32.partialorder %v697_v50, 1.0  ;;  %v617_v62 = vld [vmem:[%s4568_s3 + $0x240] sm:$0xf] }
   0x8   :  { %vm663_vm11 = vcmp.eq.f32.partialorder %v659_v51, 1.0  ;;  %v618_v63 = vld [vmem:[%s4568_s3 + $0x248] sm:$0xf]  ;;  %vm621_vm12 = vcmp.eq.f32.partialorder %v617_v62, 1.0  ;;  %v348_v29 = vld [vmem:[%s4568_s3 + $0x2a0] sm:$0xf] }
   0x9   :  { %v2485_v2 = vld.sshfl [vmem:[#allocation1] sm:$0xff pattern:$0x75316420]  ;;  %v2487_v3 = vld.sshfl [vmem:[#allocation1 + $0x8] sm:$0xff pattern:$0x75316420] }
   0xa   :  { %364 = vrot.lane.b32.xlu1 %v2485_v2, %s2409_s21  ;;  %273 = vst [vmem:[#allocation2 + $0x80] sm:$0xf] %v2485_v2  ;;  %vm622_vm13 = vcmp.eq.f32.partialorder %v618_v63, 1.0  ;;  %v322_v40 = vld [vmem:[%s4568_s3 + $0x258] sm:$0xf] }
   0xb   :  { %274 = vst [vmem:[#allocation2 + $0x298] sm:$0xf] %v2487_v3 }
   0xc   :  { %120 = vst [vmem:[#allocation1] ss:$2 sm:$0xff] %v2347_v1 }
  0x12   :  { %306 = vrot.lane.b32.xlu1 %v2485_v2, %s2410_s22 }
  0x13   :  { %v2498_v5 = vld.sshfl [vmem:[#allocation1] sm:$0xff pattern:$0x75316420]  ;;  %v2500_v6 = vld.sshfl [vmem:[#allocation1 + $0x8] sm:$0xff pattern:$0x75316420] }
  0x14   :  { %368 = vrot.lane.b32.xlu2 %v2498_v5, %s2409_s21  ;;  %275 = vst [vmem:[#allocation2 + $0x280] sm:$0xf] %v2498_v5 }
  0x15   :  { %276 = vst [vmem:[#allocation2 + $0x148] sm:$0xf] %v2500_v6 }
  0x16   :  { %129 = vst [vmem:[#allocation1] ss:$2 sm:$0xff] %v125_v4  ;;  %v698_v4 = vld [vmem:[%s4568_s3 + $0x308] sm:$0xf] }
  0x17   :  { %vm702_vm14 = vcmp.eq.f32.partialorder %v698_v4, 1.0 }
  0x1c   :  { %370 = vrot.lane.b32.xlu2 %v2500_v6, %s2409_s21 }
  0x1d   :  { %v2511_v8 = vld.sshfl [vmem:[#allocation1] sm:$0xff pattern:$0x75316420]  ;;  %v2513_v9 = vld.sshfl [vmem:[#allocation1 + $0x8] sm:$0xff pattern:$0x75316420] }
  0x1e   :  { %685 = vrot.lane.b32.xlu0 %v2511_v8, %s2409_s21  ;;  %135 = vst [vmem:[#allocation1] ss:$2 sm:$0xff] %v2348_v7  ;;  %v699_v7 = vld [vmem:[%s4568_s3 + $0x310] sm:$0xf] }
  0x1f   :  { %vm703_vm15 = vcmp.eq.f32.partialorder %v699_v7, 1.0 }
  0x24   :  { %310 = vrot.lane.b32.xlu2 %v2498_v5, %s2410_s22 }
  0x25   :  { %v2519_v10 = vld.sshfl [vmem:[#allocation1 + $0x8] sm:$0xff pattern:$0x75316420]  ;;  %v2525_v11 = vld.sshfl [vmem:[#allocation1] sm:$0xff pattern:$0x75316420] }
  0x26   :  { %605 = vrot.lane.b32.xlu0 %v2511_v8, %s2410_s22  ;;  %691 = vrot.lane.b32.xlu1 %v2519_v10, %s2409_s21  ;;  %v555_v39 = vrot.slane %v2525_v11, 4 }
  0x28   :  { %563 = vst [vmem:[#allocation2 + $0x280] sm:$0xf0] %v555_v39 }
  0x2c   :  { %611 = vrot.lane.b32.xlu2 %v2519_v10, %s2410_s22 }
  0x2e   :  { %645 = vrot.lane.b32.xlu0 %v2511_v8, %s2411_s1  ;;  %609 = vrot.lane.b32.xlu1 %v2525_v11, %s2410_s22 }
  0x34   :  { %651 = vrot.lane.b32.xlu2 %v2519_v10, %s2411_s1 }
  0x36   :  { %687 = vrot.lane.b32.xlu0 %v2513_v9, %s2409_s21  ;;  %649 = vrot.lane.b32.xlu1 %v2525_v11, %s2411_s1 }
  0x3c   :  { %339 = vrot.lane.b32.xlu2 %v2498_v5, %s2411_s1 }
  0x3e   :  { %335 = vrot.lane.b32.xlu1 %v2485_v2, %s2411_s1  ;;  %689 = vrot.lane.b32.xlu0 %v2525_v11, %s2409_s21 }
  0x44   :  { %565 = vrot.lane.b32.xlu2 %v2511_v8, %s2412_s26 }
  0x46   :  { %366 = vrot.lane.b32.xlu1 %v2487_v3, %s2409_s21  ;;  %312 = vrot.lane.b32.xlu0 %v2500_v6, %s2410_s22 }
  0x4c   :  { %277 = vrot.lane.b32.xlu2 %v2485_v2, %s2412_s26 }
  0x4e   :  { %571 = vrot.lane.b32.xlu1 %v2519_v10, %s2412_s26  ;;  %341 = vrot.lane.b32.xlu0 %v2500_v6, %s2411_s1 }
  0x54   :  { %607 = vrot.lane.b32.xlu2 %v2513_v9, %s2410_s22 }
  0x56   :  { %283 = vrot.lane.b32.xlu1 %v2500_v6, %s2412_s26  ;;  %569 = vrot.lane.b32.xlu0 %v2525_v11, %s2412_s26 }
  0x5c   :  { %337 = vrot.lane.b32.xlu2 %v2487_v3, %s2411_s1 }
  0x5e   :  { %308 = vrot.lane.b32.xlu1 %v2487_v3, %s2410_s22  ;;  %281 = vrot.lane.b32.xlu0 %v2498_v5, %s2412_s26 }
  0x64   :  { %479 = vrot.lane.b32.xlu2 %v2519_v10, %s2413_s27 }
  0x66   :  { %477 = vrot.lane.b32.xlu1 %v2525_v11, %s2413_s27  ;;  %647 = vrot.lane.b32.xlu0 %v2513_v9, %s2411_s1 }
  0x6c   :  { %519 = vrot.lane.b32.xlu2 %v2519_v10, %s2414_s28 }
  0x6e   :  { %517 = vrot.lane.b32.xlu1 %v2525_v11, %s2414_s28  ;;  %475 = vrot.lane.b32.xlu0 %v2513_v9, %s2413_s27  ;;  %v2581_v12 = vpop.permute.xlu2 %368 }
  0x74   :  { %221 = vrot.lane.b32.xlu2 %v2500_v6, %s2413_s27 }
  0x76   :  { %219 = vrot.lane.b32.xlu1 %v2498_v5, %s2413_s27  ;;  %515 = vrot.lane.b32.xlu0 %v2513_v9, %s2414_s28  ;;  %v371_v16 = vpop.permute.xlu2 %370 }
  0x77   :  { %v373_v17 = vsel %vm372_vm1, %v2581_v12, %v371_v16 }
  0x78   :  { %v387_v18 = vsel %vm383_vm0, %v373_v17, 0.0  ;;  %vm352_vm0 = vcmp.eq.f32.partialorder %v348_v29, 1.0 }
  0x79   :  { %391 = vst [vmem:[#allocation2 + $0x1d0] sm:$0xf] %v387_v18 }
  0x7c   :  { %250 = vrot.lane.b32.xlu2 %v2500_v6, %s2414_s28  ;;  %v2603_v20 = vpop.permute.xlu1 %364 }
  0x7d   :  { %v376_v21 = vsel %vm372_vm1, %v371_v16, %v2603_v20 }
  0x7e   :  { %248 = vrot.lane.b32.xlu1 %v2498_v5, %s2414_s28  ;;  %217 = vrot.lane.b32.xlu0 %v2487_v3, %s2413_s27  ;;  %v2612_v22 = vpop.permute.xlu2 %310  ;;  %v388_v23 = vsel %vm384_vm2, %v376_v21, 0.0 }
  0x7f   :  { %392 = vst [vmem:[#allocation2 + $0x330] sm:$0xf] %v388_v23  ;;  %v556_v23 = vrot.slane %v2519_v10, 4 }
  0x81   :  { %564 = vst [vmem:[#allocation2 + $0x148] sm:$0xf0] %v556_v23 }
  0x84   :  { %395 = vrot.lane.b32.xlu2 %v2513_v9, %s2415_s14  ;;  %v2626_v25 = vpop.permute.xlu1 %306 }
  0x86   :  { %279 = vrot.lane.b32.xlu1 %v2487_v3, %s2412_s26  ;;  %246 = vrot.lane.b32.xlu0 %v2487_v3, %s2414_s28  ;;  %v612_v24 = vpop.permute.xlu2 %611 }
  0x8c   :  { %435 = vrot.lane.b32.xlu2 %v2513_v9, %s2416_s15 }
  0x8e   :  { %399 = vrot.lane.b32.xlu1 %v2519_v10, %s2415_s14  ;;  %567 = vrot.lane.b32.xlu0 %v2513_v9, %s2412_s26  ;;  %v652_v26 = vpop.permute.xlu2 %651 }
  0x90   :  { %v686_v27 = vpop.permute.xlu0 %685 }
  0x94   :  { %157 = vrot.lane.b32.xlu2 %v2487_v3, %s2415_s14 }
  0x96   :  { %439 = vrot.lane.b32.xlu1 %v2519_v10, %s2416_s15  ;;  %397 = vrot.lane.b32.xlu0 %v2525_v11, %s2415_s14  ;;  %v2641_v30 = vpop.permute.xlu2 %339 }
  0x98   :  { %v2643_v31 = vpop.permute.xlu0 %605  ;;  %v2645_v32 = vpop.permute.xlu1 %691 }
  0x99   :  { %v616_v33 = vsel %vm314_vm3, %v612_v24, %v2643_v31  ;;  %v696_v34 = vsel %vm372_vm1, %v2645_v32, %v686_v27 }
  0x9a   :  { %v628_v35 = vsel %vm624_vm4, %v616_v33, 0.0  ;;  %v708_v36 = vsel %vm704_vm5, %v696_v34, 0.0 }
  0x9b   :  { %v636_v37 = vrot.slane %v628_v35, 4  ;;  %v716_v38 = vrot.slane %v708_v36, 4  ;;  %v377_v35 = vld [vmem:[%s4568_s3 + $0x300] sm:$0xf] }
  0x9c   :  { %188 = vrot.lane.b32.xlu2 %v2487_v3, %s2416_s15  ;;  %vm381_vm4 = vcmp.eq.f32.partialorder %v377_v35, 1.0 }
  0x9d   :  { %644 = vst [vmem:[#allocation2 + $0x230] sm:$0xf0] %v636_v37  ;;  %v378_v37 = vld [vmem:[%s4568_s3 + $0x308] sm:$0xf] }
  0x9e   :  { %724 = vst [vmem:[#allocation2 + $0x330] sm:$0xf0] %v716_v38  ;;  %161 = vrot.lane.b32.xlu1 %v2500_v6, %s2415_s14  ;;  %437 = vrot.lane.b32.xlu0 %v2525_v11, %s2416_s15  ;;  %v2666_v41 = vpop.permute.xlu2 %565  ;;  %v321_v38 = vld [vmem:[%s4568_s3 + $0x250] sm:$0xf]  ;;  %vm382_vm5 = vcmp.eq.f32.partialorder %v378_v37, 1.0 }
  0xa0   :  { %v2668_v42 = vpop.permute.xlu0 %645  ;;  %v610_v43 = vpop.permute.xlu1 %609 }
  0xa1   :  { %v656_v44 = vsel %vm343_vm6, %v652_v26, %v2668_v42  ;;  %v613_v45 = vsel %vm314_vm3, %v610_v43, %v612_v24 }
  0xa2   :  { %v668_v46 = vsel %vm664_vm7, %v656_v44, 0.0  ;;  %v627_v47 = vsel %vm623_vm8, %v613_v45, 0.0  ;;  %vm325_vm7 = vcmp.eq.f32.partialorder %v321_v38, 1.0  ;;  %vm326_vm8 = vcmp.eq.f32.partialorder %v322_v40, 1.0 }
  0xa3   :  { %v676_v48 = vrot.slane %v668_v46, 4  ;;  %v635_v49 = vrot.slane %v627_v47, 4 }
  0xa4   :  { %473 = vrot.lane.b32.xlu2 %v2511_v8, %s2413_s27 }
  0xa5   :  { %684 = vst [vmem:[#allocation2 + $0x228] sm:$0xf0] %v676_v48  ;;  %v760_v52 = vld [vmem:[#allocation2 + $0x330] sm:$0xff] }
  0xa6   :  { %643 = vst [vmem:[#allocation2 + $0x290] sm:$0xf0] %v635_v49  ;;  %192 = vrot.lane.b32.xlu1 %v2500_v6, %s2416_s15  ;;  %159 = vrot.lane.b32.xlu0 %v2498_v5, %s2415_s14  ;;  %v2687_v53 = vpop.permute.xlu2 %277  ;;  %v780_v54 = vpack.c.bf16 %v760_v52, %v760_v52 }
  0xa8   :  { %v688_v55 = vpop.permute.xlu0 %687  ;;  %v803_v56 = vsel %vm792_vm9, %v780_v54, 0  ;;  %v2690_v57 = vpop.permute.xlu1 %649 }
  0xa9   :  { %v695_v58 = vsel %vm372_vm1, %v686_v27, %v688_v55  ;;  %847 = vmatpush.bf16.msra.mxu3 %v803_v56  ;;  %v653_v59 = vsel %vm343_vm6, %v2690_v57, %v652_v26 }
  0xaa   :  { %v705_v60 = vsel %vm701_vm10, %v695_v58, 0.0  ;;  %v667_v61 = vsel %vm663_vm11, %v653_v59, 0.0  ;;  %vm285_vm10 = vcmp.lt.s32.totalorder %v2583_v14, 127 }
  0xab   :  { %v713_v0 = vrot.slane %v705_v60, 4  ;;  %v675_v1 = vrot.slane %v667_v61, 4  ;;  %v351_v60 = vld [vmem:[%s4568_s3 + $0x2b8] sm:$0xf] }
  0xac   :  { %244 = vrot.lane.b32.xlu2 %v2485_v2, %s2414_s28 }
  0xad   :  { %721 = vst [vmem:[#allocation2 + $0x2f0] sm:$0xf0] %v713_v0 }
  0xae   :  { %683 = vst [vmem:[#allocation2 + $0xc8] sm:$0xf0] %v675_v1  ;;  %215 = vrot.lane.b32.xlu1 %v2485_v2, %s2413_s27  ;;  %190 = vrot.lane.b32.xlu0 %v2498_v5, %s2416_s15  ;;  %v608_v13 = vpop.permute.xlu2 %607 }
  0xaf   :  { %v614_v15 = vsel %vm314_vm3, %v608_v13, %v610_v43  ;;  %v615_v16 = vsel %vm314_vm3, %v2643_v31, %v608_v13  ;;  %v349_v31 = vld [vmem:[%s4568_s3 + $0x2a8] sm:$0xf] }
  0xb0   :  { %v625_v17 = vsel %vm621_vm12, %v615_v16, 0.0  ;;  %v626_v18 = vsel %vm622_vm13, %v614_v15, 0.0  ;;  %v2720_v19 = vpop.permute.xlu1 %335  ;;  %v690_v21 = vpop.permute.xlu0 %689  ;;  %vm353_vm2 = vcmp.eq.f32.partialorder %v349_v31, 1.0  ;;  %vm355_vm13 = vcmp.eq.f32.partialorder %v351_v60, 1.0 }
  0xb1   :  { %v633_v24 = vrot.slane %v625_v17, 4  ;;  %v634_v26 = vrot.slane %v626_v18, 4  ;;  %v693_v27 = vsel %vm372_vm1, %v690_v21, %v2645_v32  ;;  %v694_v28 = vsel %vm372_vm1, %v688_v55, %v690_v21 }
  0xb2   :  { %v706_v33 = vsel %vm702_vm14, %v694_v28, 0.0  ;;  %v707_v34 = vsel %vm703_vm15, %v693_v27, 0.0  ;;  %v293_v28 = vld [vmem:[%s4568_s3 + $0x1f8] sm:$0xf] }
  0xb3   :  { %641 = vst [vmem:[#allocation2 + $0x168] sm:$0xf0] %v633_v24  ;;  %v714_v32 = vrot.slane %v706_v33, 4  ;;  %v715_v36 = vrot.slane %v707_v34, 4  ;;  %vm297_vm14 = vcmp.eq.f32.partialorder %v293_v28, 1.0 }
  0xb4   :  { %642 = vst [vmem:[#allocation2] sm:$0xf0] %v634_v26  ;;  %155 = vrot.lane.b32.xlu2 %v2485_v2, %s2415_s14  ;;  %v528_v28 = vld [vmem:[%s4568_s3 + $0x138] sm:$0xf] }
  0xb5   :  { %722 = vst [vmem:[#allocation2 + $0x358] sm:$0xf0] %v714_v32 }
  0xb6   :  { %723 = vst [vmem:[#allocation2 + $0x1d0] sm:$0xf0] %v715_v36  ;;  %433 = vrot.lane.b32.xlu1 %v2511_v8, %s2416_s15  ;;  %513 = vrot.lane.b32.xlu0 %v2511_v8, %s2414_s28  ;;  %v338_v43 = vpop.permute.xlu2 %337 }
  0xb7   :  { %v345_v44 = vsel %vm343_vm6, %v338_v43, %v2641_v30  ;;  %v346_v45 = vsel %vm343_vm6, %v2720_v19, %v338_v43 }
  0xb8   :  { %v356_v46 = vsel %vm352_vm0, %v346_v45, 0.0  ;;  %v357_v47 = vsel %vm353_vm2, %v345_v44, 0.0  ;;  %v367_v48 = vpop.permute.xlu1 %366  ;;  %v313_v49 = vpop.permute.xlu0 %312 }
  0xb9   :  { %360 = vst [vmem:[#allocation2 + $0x1f0] sm:$0xf] %v356_v46  ;;  %v374_v50 = vsel %vm372_vm1, %v367_v48, %v2581_v12  ;;  %v375_v51 = vsel %vm372_vm1, %v2603_v20, %v367_v48  ;;  %v315_v52 = vsel %vm314_vm3, %v2612_v22, %v313_v49  ;;  %v318_v54 = vsel %vm314_vm3, %v313_v49, %v2626_v25  ;;  %v580_v12 = vld [vmem:[%s4568_s3 + $0x1f8] sm:$0xf]  ;;  %v350_v20 = vld [vmem:[%s4568_s3 + $0x2b0] sm:$0xf] }
  0xba   :  { %361 = vst [vmem:[#allocation2 + $0xe8] sm:$0xf] %v357_v47  ;;  %v385_v55 = vsel %vm381_vm4, %v375_v51, 0.0  ;;  %v386_v56 = vsel %vm382_vm5, %v374_v50, 0.0  ;;  %v329_v58 = vsel %vm325_vm7, %v315_v52, 0.0  ;;  %v330_v59 = vsel %vm326_vm8, %v318_v54, 0.0 }
  0xbb   :  { %389 = vst [vmem:[#allocation2 + $0x2f0] sm:$0xf] %v385_v55  ;;  %vm584_vm11 = vcmp.eq.f32.partialorder %v580_v12, 1.0  ;;  %vm354_vm12 = vcmp.eq.f32.partialorder %v350_v20, 1.0  ;;  %v319_v47 = vld [vmem:[%s4568_s3 + $0x240] sm:$0xf] }
  0xbc   :  { %390 = vst [vmem:[#allocation2 + $0x358] sm:$0xf] %v386_v56  ;;  %v320_v48 = vld [vmem:[%s4568_s3 + $0x248] sm:$0xf]  ;;  %v292_v49 = vld [vmem:[%s4568_s3 + $0x1f0] sm:$0xf] }
  0xbd   :  { %333 = vst [vmem:[#allocation2 + $0x290] sm:$0xf] %v329_v58  ;;  %v759_v61 = vld [vmem:[#allocation2 + $0x1d0] sm:$0xff]  ;;  %vm323_vm0 = vcmp.eq.f32.partialorder %v319_v47, 1.0  ;;  %vm324_vm2 = vcmp.eq.f32.partialorder %v320_v48, 1.0  ;;  %vm296_vm4 = vcmp.eq.f32.partialorder %v292_v49, 1.0 }
  0xbe   :  { %334 = vst [vmem:[#allocation2 + $0x230] sm:$0xf] %v330_v59  ;;  %393 = vrot.lane.b32.xlu0 %v2511_v8, %s2415_s14  ;;  %v2783_v62 = vpop.permute.xlu2 %479  ;;  %v779_v63 = vpack.c.bf16 %v759_v61, %v759_v61  ;;  %v744_v54 = vld [vmem:[#allocation2 + $0x148] sm:$0xff]  ;;  %v553_v49 = vrot.slane %v2511_v8, 4 }
  0xc0   :  { %v572_v0 = vpop.permute.xlu1 %571  ;;  %v800_v1 = vsel %vm792_vm9, %v779_v63, 0  ;;  %v342_v4 = vpop.permute.xlu0 %341  ;;  %v488_v63 = vld [vmem:[%s4568_s3 + $0xd8] sm:$0xf]  ;;  %561 = vst [vmem:[#allocation2 + $0x80] sm:$0xf0] %v553_v49 }
  0xc1   :  { %v576_v7 = vsel %vm285_vm10, %v572_v0, %v2666_v41  ;;  %834 = vmatpush.bf16.msra.mxu2 %v800_v1  ;;  %v344_v13 = vsel %vm343_vm6, %v2641_v30, %v342_v4  ;;  %v347_v15 = vsel %vm343_vm6, %v342_v4, %v2720_v19  ;;  %v579_v30 = vld [vmem:[%s4568_s3 + $0x1f0] sm:$0xf]  ;;  %vm492_vm5 = vcmp.eq.f32.partialorder %v488_v63, 1.0 }
  0xc2   :  { %v588_v16 = vsel %vm584_vm11, %v576_v7, 0.0  ;;  %v358_v17 = vsel %vm354_vm12, %v344_v13, 0.0  ;;  %v359_v18 = vsel %vm355_vm13, %v347_v15, 0.0  ;;  %v757_v21 = vld [vmem:[#allocation2 + $0x2f0] sm:$0xff]  ;;  %vm583_vm15 = vcmp.eq.f32.partialorder %v579_v30, 1.0 }
  0xc3   :  { %v596_v23 = vrot.slane %v588_v16, 4  ;;  %362 = vst [vmem:[#allocation2 + $0xc8] sm:$0xf] %v358_v17  ;;  %v777_v24 = vpack.c.bf16 %v757_v21, %v757_v21  ;;  %v758_v26 = vld [vmem:[#allocation2 + $0x358] sm:$0xff]  ;;  %vm223_vm11 = vcmp.lt.s32.totalorder %v2583_v14, 15  ;;  %v743_v21 = vld [vmem:[#allocation2 + $0x280] sm:$0xff] }
  0xc4   :  { %363 = vst [vmem:[#allocation2 + $0x228] sm:$0xf] %v359_v18  ;;  %v778_v27 = vpack.c.bf16 %v758_v26, %v758_v26  ;;  %v751_v38 = vld [vmem:[#allocation2 + $0x290] sm:$0xff]  ;;  %vm532_vm12 = vcmp.eq.f32.partialorder %v528_v28, 1.0  ;;  %v230_v63 = vld [vmem:[%s4568_s3 + $0xd0] sm:$0xf] }
  0xc5   :  { %604 = vst [vmem:[#allocation2 + $0x78] sm:$0xf0] %v596_v23  ;;  %v794_v19 = vsel %vm792_vm9, %v777_v24, 0  ;;  %v752_v44 = vld [vmem:[#allocation2 + $0x230] sm:$0xff] }
  0xc6   :  { %808 = vmatpush.bf16.msra.mxu0 %v794_v19  ;;  %186 = vrot.lane.b32.xlu0 %v2485_v2, %s2416_s15  ;;  %v797_v29 = vsel %vm792_vm9, %v778_v27, 0  ;;  %v2806_v31 = vpop.permute.xlu2 %519 }
  0xc7   :  { %821 = vmatpush.bf16.msra.mxu1 %v797_v29 }
  0xc8   :  { %v284_v33 = vpop.permute.xlu1 %283  ;;  %v2808_v34 = vpop.permute.xlu0 %569 }
  0xc9   :  { %v289_v35 = vsel %vm285_vm10, %v284_v33, %v2687_v53  ;;  %v573_v32 = vsel %vm285_vm10, %v2808_v34, %v572_v0 }
  0xca   :  { %v301_v36 = vsel %vm297_vm14, %v289_v35, 0.0  ;;  %v587_v37 = vsel %vm583_vm15, %v573_v32, 0.0  ;;  %v755_v39 = vld [vmem:[#allocation2 + $0xc8] sm:$0xff]  ;;  %vm252_vm14 = vcmp.lt.s32.totalorder %v2583_v14, 1 }
  0xcb   :  { %305 = vst [vmem:[#allocation2 + $0x78] sm:$0xf] %v301_v36  ;;  %v595_v40 = vrot.slane %v587_v37, 4  ;;  %v775_v43 = vpack.c.bf16 %v755_v39, %v751_v38  ;;  %v756_v45 = vld [vmem:[#allocation2 + $0x228] sm:$0xff]  ;;  %v231_v39 = vld [vmem:[%s4568_s3 + $0xd8] sm:$0xf] }
  0xcc   :  { %v776_v46 = vpack.c.bf16 %v756_v45, %v752_v44  ;;  %vm235_vm15 = vcmp.eq.f32.partialorder %v231_v39, 1.0 }
  0xcd   :  { %603 = vst [vmem:[#allocation2 + $0x120] sm:$0xf0] %v595_v40  ;;  %835 = vmatpush.bf16.msra.mxu2 %v775_v43  ;;  %v527_v40 = vld [vmem:[%s4568_s3 + $0x130] sm:$0xf] }
  0xce   :  { %848 = vmatpush.bf16.msra.mxu3 %v776_v46  ;;  %v2825_v50 = vpop.permute.xlu2 %221 }
  0xd0   :  { %v309_v51 = vpop.permute.xlu1 %308  ;;  %v2827_v52 = vpop.permute.xlu0 %281 }
  0xd1   :  { %v316_v55 = vsel %vm314_vm3, %v309_v51, %v2612_v22  ;;  %v317_v56 = vsel %vm314_vm3, %v2626_v25, %v309_v51  ;;  %v286_v58 = vsel %vm285_vm10, %v2827_v52, %v284_v33  ;;  %v657_v22 = vld [vmem:[%s4568_s3 + $0x2a0] sm:$0xf]  ;;  %v658_v25 = vld [vmem:[%s4568_s3 + $0x2a8] sm:$0xf]  ;;  %v554_v51 = vrot.slane %v2513_v9, 4 }
  0xd2   :  { %v327_v59 = vsel %vm323_vm0, %v317_v56, 0.0  ;;  %v328_v12 = vsel %vm324_vm2, %v316_v55, 0.0  ;;  %v300_v20 = vsel %vm296_vm4, %v286_v58, 0.0  ;;  %v748_v60 = vld [vmem:[#allocation2 + $0x78] sm:$0xff]  ;;  %vm661_vm7 = vcmp.eq.f32.partialorder %v657_v22, 1.0 }
  0xd3   :  { %331 = vst [vmem:[#allocation2 + $0x168] sm:$0xf] %v327_v59  ;;  %v772_v61 = vpack.c.bf16 %v748_v60, %v744_v54  ;;  %vm662_vm8 = vcmp.eq.f32.partialorder %v658_v25, 1.0  ;;  %vm531_vm0 = vcmp.eq.f32.partialorder %v527_v40, 1.0  ;;  %vm234_vm4 = vcmp.eq.f32.partialorder %v230_v63, 1.0 }
  0xd4   :  { %332 = vst [vmem:[#allocation2] sm:$0xf] %v328_v12 }
  0xd5   :  { %304 = vst [vmem:[#allocation2 + $0x120] sm:$0xf] %v300_v20  ;;  %849 = vmatpush.bf16.msra.mxu3 %v772_v61  ;;  %v260_v61 = vld [vmem:[%s4568_s3 + $0x138] sm:$0xf] }
  0xd6   :  { %v2847_v0 = vpop.permute.xlu2 %250  ;;  %562 = vst [vmem:[#allocation2 + $0x298] sm:$0xf0] %v554_v51  ;;  %vm264_vm2 = vcmp.eq.f32.partialorder %v260_v61, 1.0 }
  0xd8   :  { %v478_v1 = vpop.permute.xlu1 %477  ;;  %v648_v4 = vpop.permute.xlu0 %647 }
  0xd9   :  { %v481_v7 = vsel %vm223_vm11, %v478_v1, %v2783_v62  ;;  %v654_v13 = vsel %vm343_vm6, %v648_v4, %v2690_v57  ;;  %v655_v15 = vsel %vm343_vm6, %v2668_v42, %v648_v4  ;;  %v487_v57 = vld [vmem:[%s4568_s3 + $0xd0] sm:$0xf] }
  0xda   :  { %v496_v16 = vsel %vm492_vm5, %v481_v7, 0.0  ;;  %v665_v17 = vsel %vm661_vm7, %v655_v15, 0.0  ;;  %v666_v18 = vsel %vm662_vm8, %v654_v13, 0.0  ;;  %vm491_vm13 = vcmp.eq.f32.partialorder %v487_v57, 1.0  ;;  %v749_v43 = vld [vmem:[#allocation2 + $0x168] sm:$0xff] }
  0xdb   :  { %v504_v23 = vrot.slane %v496_v16, 4  ;;  %v673_v24 = vrot.slane %v665_v17, 4  ;;  %v674_v26 = vrot.slane %v666_v18, 4  ;;  %v750_v46 = vld [vmem:[#allocation2] sm:$0xff]  ;;  %v290_v16 = vld [vmem:[%s4568_s3 + $0x1e0] sm:$0xf] }
  0xdc   :  { %v747_v27 = vld [vmem:[#allocation2 + $0x120] sm:$0xff]  ;;  %v259_v18 = vld [vmem:[%s4568_s3 + $0x130] sm:$0xf]  ;;  %vm294_vm5 = vcmp.eq.f32.partialorder %v290_v16, 1.0  ;;  %v485_v57 = vld [vmem:[%s4568_s3 + $0xc0] sm:$0xf] }
  0xdd   :  { %512 = vst [vmem:[#allocation2 + $0x50] sm:$0xf0] %v504_v23  ;;  %v771_v30 = vpack.c.bf16 %v747_v27, %v743_v21  ;;  %v291_v17 = vld [vmem:[%s4568_s3 + $0x1e8] sm:$0xf]  ;;  %vm263_vm8 = vcmp.eq.f32.partialorder %v259_v18, 1.0 }
  0xde   :  { %681 = vst [vmem:[#allocation2 + $0x1f0] sm:$0xf0] %v673_v24  ;;  %v2865_v42 = vpop.permute.xlu2 %395  ;;  %vm295_vm7 = vcmp.eq.f32.partialorder %v291_v17, 1.0 }
  0xdf   :  { %682 = vst [vmem:[#allocation2 + $0xe8] sm:$0xf0] %v674_v26  ;;  %836 = vmatpush.bf16.msra.mxu2 %v771_v30  ;;  %v486_v30 = vld [vmem:[%s4568_s3 + $0xc8] sm:$0xf] }
  0xe0   :  { %v518_v19 = vpop.permute.xlu1 %517  ;;  %v2868_v29 = vpop.permute.xlu0 %475 }
  0xe1   :  { %v521_v33 = vsel %vm252_vm14, %v518_v19, %v2806_v31  ;;  %v482_v35 = vsel %vm223_vm11, %v2868_v29, %v478_v1 }
  0xe2   :  { %v536_v32 = vsel %vm532_vm12, %v521_v33, 0.0  ;;  %v495_v36 = vsel %vm491_vm13, %v482_v35, 0.0  ;;  %vm489_vm12 = vcmp.eq.f32.partialorder %v485_v57, 1.0  ;;  %vm490_vm13 = vcmp.eq.f32.partialorder %v486_v30, 1.0  ;;  %v742_v57 = vld [vmem:[#allocation2 + $0x298] sm:$0xff] }
  0xe3   :  { %v544_v37 = vrot.slane %v536_v32, 4  ;;  %v503_v38 = vrot.slane %v495_v36, 4  ;;  %v447_v30 = vld [vmem:[%s4568_s3 + $0x70] sm:$0xf] }
  0xe5   :  { %552 = vst [vmem:[#allocation2 + $0x308] sm:$0xf0] %v544_v37  ;;  %v753_v44 = vld [vmem:[#allocation2 + $0x1f0] sm:$0xff]  ;;  %v578_v37 = vld [vmem:[%s4568_s3 + $0x1e8] sm:$0xf] }
  0xe6   :  { %511 = vst [vmem:[#allocation2 + $0x90] sm:$0xf0] %v503_v38  ;;  %v773_v45 = vpack.c.bf16 %v753_v44, %v749_v43  ;;  %v754_v47 = vld [vmem:[#allocation2 + $0xe8] sm:$0xff]  ;;  %v2882_v48 = vpop.permute.xlu2 %435 }
  0xe7   :  { %v774_v54 = vpack.c.bf16 %v754_v47, %v750_v46 }
  0xe8   :  { %809 = vmatpush.bf16.msra.mxu0 %v773_v45  ;;  %v220_v55 = vpop.permute.xlu1 %219  ;;  %v2886_v56 = vpop.permute.xlu0 %515 }
  0xe9   :  { %822 = vmatpush.bf16.msra.mxu1 %v774_v54  ;;  %v224_v58 = vsel %vm223_vm11, %v220_v55, %v2825_v50  ;;  %v522_v59 = vsel %vm252_vm14, %v2886_v56, %v518_v19 }
  0xea   :  { %v239_v12 = vsel %vm235_vm15, %v224_v58, 0.0  ;;  %v535_v20 = vsel %vm531_vm0, %v522_v59, 0.0  ;;  %vm582_vm0 = vcmp.eq.f32.partialorder %v578_v37, 1.0  ;;  %v258_v58 = vld [vmem:[%s4568_s3 + $0x128] sm:$0xf] }
  0xeb   :  { %243 = vst [vmem:[#allocation2 + $0x50] sm:$0xf] %v239_v12  ;;  %v543_v60 = vrot.slane %v535_v20, 4 }
  0xed   :  { %551 = vst [vmem:[#allocation2 + $0x210] sm:$0xf0] %v543_v60  ;;  %v408_v60 = vld [vmem:[%s4568_s3 + $0x18] sm:$0xf] }
  0xee   :  { %v2900_v22 = vpop.permute.xlu2 %157 }
  0xf0   :  { %v249_v25 = vpop.permute.xlu1 %248  ;;  %v2902_v1 = vpop.permute.xlu0 %217 }
  0xf1   :  { %v253_v4 = vsel %vm252_vm14, %v249_v25, %v2847_v0  ;;  %v225_v7 = vsel %vm223_vm11, %v2902_v1, %v220_v55 }
  0xf2   :  { %v268_v13 = vsel %vm264_vm2, %v253_v4, 0.0  ;;  %v238_v15 = vsel %vm234_vm4, %v225_v7, 0.0  ;;  %v736_v32 = vld [vmem:[#allocation2 + $0x50] sm:$0xff]  ;;  %vm262_vm4 = vcmp.eq.f32.partialorder %v258_v58, 1.0 }
  0xf3   :  { %272 = vst [vmem:[#allocation2 + $0x308] sm:$0xf] %v268_v13 }
  0xf4   :  { %242 = vst [vmem:[#allocation2 + $0x90] sm:$0xf] %v238_v15 }
  0xf6   :  { %v2919_v21 = vpop.permute.xlu2 %188 }
  0xf8   :  { %v280_v23 = vpop.permute.xlu1 %279  ;;  %v247_v24 = vpop.permute.xlu0 %246 }
  0xf9   :  { %v287_v26 = vsel %vm285_vm10, %v280_v23, %v2827_v52  ;;  %v288_v27 = vsel %vm285_vm10, %v2687_v53, %v280_v23  ;;  %v254_v28 = vsel %vm252_vm14, %v247_v24, %v249_v25  ;;  %v577_v53 = vld [vmem:[%s4568_s3 + $0x1e0] sm:$0xf]  ;;  %v741_v23 = vld [vmem:[#allocation2 + $0x80] sm:$0xff] }
  0xfa   :  { %v298_v19 = vsel %vm294_vm5, %v288_v27, 0.0  ;;  %v299_v33 = vsel %vm295_vm7, %v287_v26, 0.0  ;;  %v267_v35 = vsel %vm263_vm8, %v254_v28, 0.0  ;;  %v740_v52 = vld [vmem:[#allocation2 + $0x308] sm:$0xff]  ;;  %vm581_vm15 = vcmp.eq.f32.partialorder %v577_v53, 1.0 }
  0xfb   :  { %302 = vst [vmem:[#allocation2 + $0x340] sm:$0xf] %v298_v19  ;;  %v768_v36 = vpack.c.bf16 %v740_v52, %v736_v32  ;;  %v735_v20 = vld [vmem:[#allocation2 + $0x90] sm:$0xff]  ;;  %vm165_vm5 = vcmp.lt.s32.totalorder %v2583_v14, 17  ;;  %vm412_vm8 = vcmp.eq.f32.partialorder %v408_v60, 1.0 }
  0xfc   :  { %303 = vst [vmem:[#allocation2 + $0x48] sm:$0xf] %v299_v33  ;;  %v171_v26 = vld [vmem:[%s4568_s3 + $0x8] sm:$0xf]  ;;  %v448_v33 = vld [vmem:[%s4568_s3 + $0x78] sm:$0xf] }
  0xfd   :  { %271 = vst [vmem:[#allocation2 + $0x210] sm:$0xf] %v267_v35  ;;  %850 = vmatpush.bf16.msra.mxu3 %v768_v36  ;;  %v170_v35 = vld [vmem:[%s4568_s3] sm:$0xf] }
  0xfe   :  { %v474_v38 = vpop.permute.xlu2 %473  ;;  %v228_v60 = vld [vmem:[%s4568_s3 + $0xc0] sm:$0xf] }
  0xff   :  { %v483_v39 = vsel %vm223_vm11, %v474_v38, %v2868_v29  ;;  %v484_v40 = vsel %vm223_vm11, %v2783_v62, %v474_v38  ;;  %v257_v62 = vld [vmem:[%s4568_s3 + $0x120] sm:$0xf] }
 0x100   :  { %v493_v43 = vsel %vm489_vm12, %v484_v40, 0.0  ;;  %v494_v44 = vsel %vm490_vm13, %v483_v39, 0.0  ;;  %v2947_v45 = vpop.permute.xlu1 %399  ;;  %v568_v46 = vpop.permute.xlu0 %567  ;;  %vm261_vm2 = vcmp.eq.f32.partialorder %v257_v62, 1.0  ;;  %vm175_vm12 = vcmp.eq.f32.partialorder %v171_v26, 1.0  ;;  %v173_v62 = vld [vmem:[%s4568_s3 + $0x18] sm:$0xf] }
 0x101   :  { %v501_v47 = vrot.slane %v493_v43, 4  ;;  %v502_v49 = vrot.slane %v494_v44, 4  ;;  %v574_v51 = vsel %vm285_vm10, %v568_v46, %v2808_v34  ;;  %v575_v29 = vsel %vm285_vm10, %v2666_v41, %v568_v46  ;;  %v407_v34 = vld [vmem:[%s4568_s3 + $0x10] sm:$0xf]  ;;  %v525_v26 = vld [vmem:[%s4568_s3 + $0x120] sm:$0xf] }
 0x102   :  { %v585_v54 = vsel %vm581_vm15, %v575_v29, 0.0  ;;  %v586_v55 = vsel %vm582_vm0, %v574_v51, 0.0  ;;  %vm411_vm7 = vcmp.eq.f32.partialorder %v407_v34, 1.0  ;;  %vm194_vm13 = vcmp.lt.s32.totalorder %v2583_v14, 16 }
 0x103   :  { %509 = vst [vmem:[#allocation2 + $0xb0] sm:$0xf0] %v501_v47  ;;  %v593_v59 = vrot.slane %v585_v54, 4  ;;  %v594_v12 = vrot.slane %v586_v55, 4  ;;  %vm451_vm15 = vcmp.eq.f32.partialorder %v447_v30, 1.0  ;;  %vm452_vm0 = vcmp.eq.f32.partialorder %v448_v33, 1.0 }
 0x104   :  { %510 = vst [vmem:[#allocation2 + $0xa8] sm:$0xf0] %v502_v49  ;;  %v739_v41 = vld [vmem:[#allocation2 + $0x210] sm:$0xff]  ;;  %v172_v55 = vld [vmem:[%s4568_s3 + $0x10] sm:$0xf] }
 0x105   :  { %601 = vst [vmem:[#allocation2 + $0x340] sm:$0xf0] %v593_v59  ;;  %v767_v61 = vpack.c.bf16 %v739_v41, %v735_v20 }
 0x106   :  { %602 = vst [vmem:[#allocation2 + $0x48] sm:$0xf0] %v594_v12  ;;  %v245_v63 = vpop.permute.xlu2 %244 }
 0x107   :  { %837 = vmatpush.bf16.msra.mxu2 %v767_v61  ;;  %v255_v25 = vsel %vm252_vm14, %v245_v63, %v247_v24  ;;  %v256_v4 = vsel %vm252_vm14, %v2847_v0, %v245_v63  ;;  %v229_v61 = vld [vmem:[%s4568_s3 + $0xc8] sm:$0xf]  ;;  %v201_v63 = vld [vmem:[%s4568_s3 + $0x70] sm:$0xf] }
 0x108   :  { %v265_v7 = vsel %vm261_vm2, %v256_v4, 0.0  ;;  %v266_v13 = vsel %vm262_vm4, %v255_v25, 0.0  ;;  %v2973_v15 = vpop.permute.xlu1 %439  ;;  %v398_v16 = vpop.permute.xlu0 %397  ;;  %vm174_vm2 = vcmp.eq.f32.partialorder %v170_v35, 1.0  ;;  %vm176_vm4 = vcmp.eq.f32.partialorder %v172_v55, 1.0 }
 0x109   :  { %269 = vst [vmem:[#allocation2 + $0x240] sm:$0xf] %v265_v7  ;;  %v401_v17 = vsel %vm165_vm5, %v398_v16, %v2947_v45  ;;  %v402_v18 = vsel %vm165_vm5, %v2865_v42, %v398_v16 }
 0x10a   :  { %270 = vst [vmem:[#allocation2 + $0x2b0] sm:$0xf] %v266_v13  ;;  %v415_v24 = vsel %vm411_vm7, %v402_v18, 0.0  ;;  %v416_v0 = vsel %vm412_vm8, %v401_v17, 0.0  ;;  %vm177_vm7 = vcmp.eq.f32.partialorder %v173_v62, 1.0  ;;  %vm232_vm8 = vcmp.eq.f32.partialorder %v228_v60, 1.0 }
 0x10b   :  { %v423_v27 = vrot.slane %v415_v24, 4  ;;  %v424_v28 = vrot.slane %v416_v0, 4  ;;  %v445_v0 = vld [vmem:[%s4568_s3 + $0x60] sm:$0xf] }
 0x10c   :  { %v745_v19 = vld [vmem:[#allocation2 + $0x340] sm:$0xff] }
 0x10d   :  { %431 = vst [vmem:[#allocation2 + $0x1b8] sm:$0xf0] %v423_v27  ;;  %v769_v32 = vpack.c.bf16 %v745_v19, %v741_v23  ;;  %v746_v52 = vld [vmem:[#allocation2 + $0x48] sm:$0xff]  ;;  %v526_v27 = vld [vmem:[%s4568_s3 + $0x128] sm:$0xf] }
 0x10e   :  { %432 = vst [vmem:[#allocation2 + $0xf8] sm:$0xf0] %v424_v28  ;;  %v770_v36 = vpack.c.bf16 %v746_v52, %v742_v57  ;;  %v156_v53 = vpop.permute.xlu2 %155 }
 0x10f   :  { %810 = vmatpush.bf16.msra.mxu0 %v769_v32  ;;  %v168_v37 = vsel %vm165_vm5, %v156_v53, %v2900_v22 }
 0x110   :  { %823 = vmatpush.bf16.msra.mxu1 %v770_v36  ;;  %v162_v38 = vpop.permute.xlu1 %161  ;;  %v438_v39 = vpop.permute.xlu0 %437  ;;  %v179_v40 = vsel %vm175_vm12, %v168_v37, 0.0  ;;  %vm233_vm12 = vcmp.eq.f32.partialorder %v229_v61, 1.0 }
 0x111   :  { %v441_v43 = vsel %vm194_vm13, %v438_v39, %v2973_v15  ;;  %v442_v44 = vsel %vm194_vm13, %v2882_v48, %v438_v39  ;;  %v169_v46 = vsel %vm165_vm5, %v162_v38, %v156_v53  ;;  %183 = vst [vmem:[#allocation2 + $0x1c8] sm:$0xf] %v179_v40 }
 0x112   :  { %v455_v47 = vsel %vm451_vm15, %v442_v44, 0.0  ;;  %v456_v49 = vsel %vm452_vm0, %v441_v43, 0.0  ;;  %v178_v51 = vsel %vm174_vm2, %v169_v46, 0.0  ;;  %vm205_vm15 = vcmp.eq.f32.partialorder %v201_v63, 1.0 }
 0x113   :  { %v463_v29 = vrot.slane %v455_v47, 4  ;;  %v464_v54 = vrot.slane %v456_v49, 4  ;;  %182 = vst [vmem:[#allocation2 + $0x1a8] sm:$0xf] %v178_v51  ;;  %vm449_vm2 = vcmp.eq.f32.partialorder %v445_v0, 1.0  ;;  %v2417_v49 = vmov 0  }
 0x114   :  { %2390 = vset.pattern.permute.xlu1 %v2417_v49  ;;  %2391 = vset.pattern.permute.xlu2 %v2417_v49 }
 0x115   :  { %471 = vst [vmem:[#allocation2 + $0x2e8] sm:$0xf0] %v463_v29  ;;  %2392 = vset.pattern.permute.xlu0 %v2417_v49  ;;  %v781_v29 = vld [vmem:[%s4570_s4] sm:$0x3] }
 0x116   :  { %472 = vst [vmem:[#allocation2 + $0x310] sm:$0xf0] %v464_v54 }
 0x118   :  { %v3011_v58 = vpop.permute.xlu1 %192  ;;  %v160_v59 = vpop.permute.xlu0 %159 }
 0x119   :  { %v166_v12 = vsel %vm165_vm5, %v160_v59, %v162_v38  ;;  %v167_v34 = vsel %vm165_vm5, %v2900_v22, %v160_v59  ;;  %v202_v22 = vld [vmem:[%s4568_s3 + $0x78] sm:$0xf] }
 0x11a   :  { %v180_v20 = vsel %vm176_vm4, %v167_v34, 0.0  ;;  %v181_v41 = vsel %vm177_vm7, %v166_v12, 0.0  ;;  %vm206_vm0 = vcmp.eq.f32.partialorder %v202_v22, 1.0  ;;  %vm529_vm7 = vcmp.eq.f32.partialorder %v525_v26, 1.0 }
 0x11b   :  { %184 = vst [vmem:[#allocation2 + $0x1b8] sm:$0xf] %v180_v20 }
 0x11c   :  { %185 = vst [vmem:[#allocation2 + $0xf8] sm:$0xf] %v181_v41  ;;  %v1146_v41 = vld [vmem:[%s4571_s7] sm:$0xf] }
 0x120   :  { %v216_v25 = vpop.permute.xlu1 %215  ;;  %v191_v4 = vpop.permute.xlu0 %190 }
 0x121   :  { %v226_v7 = vsel %vm223_vm11, %v216_v25, %v2902_v1  ;;  %v227_v13 = vsel %vm223_vm11, %v2825_v50, %v216_v25  ;;  %v195_v16 = vsel %vm194_vm13, %v191_v4, %v3011_v58  ;;  %v196_v17 = vsel %vm194_vm13, %v2919_v21, %v191_v4  ;;  %v446_v50 = vld [vmem:[%s4568_s3 + $0x68] sm:$0xf] }
 0x122   :  { %v236_v18 = vsel %vm232_vm8, %v227_v13, 0.0  ;;  %v237_v23 = vsel %vm233_vm12, %v226_v7, 0.0  ;;  %v209_v24 = vsel %vm205_vm15, %v196_v17, 0.0  ;;  %v210_v1 = vsel %vm206_vm0, %v195_v16, 0.0  ;;  %v727_v40 = vld [vmem:[#allocation2 + $0x1b8] sm:$0xff] }
 0x123   :  { %240 = vst [vmem:[#allocation2 + $0xb0] sm:$0xf] %v236_v18  ;;  %vm450_vm4 = vcmp.eq.f32.partialorder %v446_v50, 1.0  ;;  %vm530_vm8 = vcmp.eq.f32.partialorder %v526_v27, 1.0  ;;  %v728_v46 = vld [vmem:[#allocation2 + $0xf8] sm:$0xff]  ;;  %vm788_vm0 = vcmask 588800  }
 0x124   :  { %241 = vst [vmem:[#allocation2 + $0xa8] sm:$0xf] %v237_v23 }
 0x125   :  { %213 = vst [vmem:[#allocation2 + $0x2e8] sm:$0xf] %v209_v24 }
 0x126   :  { %214 = vst [vmem:[#allocation2 + $0x310] sm:$0xf] %v210_v1 }
 0x128   :  { %v434_v28 = vpop.permute.xlu1 %433  ;;  %v514_v57 = vpop.permute.xlu0 %513 }
 0x129   :  { %v443_v30 = vsel %vm194_vm13, %v434_v28, %v2882_v48  ;;  %v444_v19 = vsel %vm194_vm13, %v2973_v15, %v434_v28  ;;  %v523_v33 = vsel %vm252_vm14, %v514_v57, %v2886_v56  ;;  %v524_v35 = vsel %vm252_vm14, %v2806_v31, %v514_v57  ;;  %v405_v48 = vld [vmem:[%s4568_s3] sm:$0xf]  ;;  %v406_v31 = vld [vmem:[%s4568_s3 + $0x8] sm:$0xf] }
 0x12a   :  { %v453_v32 = vsel %vm449_vm2, %v444_v19, 0.0  ;;  %v454_v52 = vsel %vm450_vm4, %v443_v30, 0.0  ;;  %v533_v36 = vsel %vm529_vm7, %v524_v35, 0.0  ;;  %v534_v53 = vsel %vm530_vm8, %v523_v33, 0.0  ;;  %v782_v15 = vld [vmem:[%s4569_s5] sm:$0xf] }
 0x12b   :  { %v461_v37 = vrot.slane %v453_v32, 4  ;;  %v462_v38 = vrot.slane %v454_v52, 4  ;;  %v541_v39 = vrot.slane %v533_v36, 4  ;;  %v542_v56 = vrot.slane %v534_v53, 4  ;;  %785 = vperm.xlu1 %2390, %v782_v15   ;;  %v733_v60 = vld [vmem:[#allocation2 + $0xb0] sm:$0xff]  ;;  %v734_v22 = vld [vmem:[#allocation2 + $0xa8] sm:$0xff] }
 0x12c   :  { %v731_v43 = vld [vmem:[#allocation2 + $0x2e8] sm:$0xff]  ;;  %vm409_vm12 = vcmp.eq.f32.partialorder %v405_v48, 1.0  ;;  %vm410_vm15 = vcmp.eq.f32.partialorder %v406_v31, 1.0 }
 0x12d   :  { %469 = vst [vmem:[#allocation2 + $0x158] sm:$0xf0] %v461_v37  ;;  %v763_v44 = vpack.c.bf16 %v731_v43, %v727_v40  ;;  %v732_v47 = vld [vmem:[#allocation2 + $0x310] sm:$0xff]  ;;  %v2349_v40 = vld [vmem:[%s4572_s2 + $0x8] sm:$0xff] }
 0x12e   :  { %470 = vst [vmem:[#allocation2 + $0x1e0] sm:$0xf0] %v462_v38  ;;  %v764_v51 = vpack.c.bf16 %v732_v47, %v728_v46 }
 0x12f   :  { %549 = vst [vmem:[#allocation2 + $0x240] sm:$0xf0] %v541_v39  ;;  %838 = vmatpush.bf16.msra.mxu2 %v763_v44 }
 0x130   :  { %550 = vst [vmem:[#allocation2 + $0x2b0] sm:$0xf0] %v542_v56  ;;  %851 = vmatpush.bf16.msra.mxu3 %v764_v51  ;;  %v394_v54 = vpop.permute.xlu0 %393 }
 0x131   :  { %v403_v55 = vsel %vm165_vm5, %v394_v54, %v2865_v42  ;;  %v404_v62 = vsel %vm165_vm5, %v2947_v45, %v394_v54  ;;  %v199_v42 = vld [vmem:[%s4568_s3 + $0x60] sm:$0xf]  ;;  %v200_v45 = vld [vmem:[%s4568_s3 + $0x68] sm:$0xf] }
 0x132   :  { %v413_v59 = vsel %vm409_vm12, %v404_v62, 0.0  ;;  %v414_v12 = vsel %vm410_vm15, %v403_v55, 0.0  ;;  %2352 = vmatmul.msk.bf16.vlgmr.msra.gmra.mxu2 %vm788_vm0, %v781_v29  ;;  %vm203_vm2 = vcmp.eq.f32.partialorder %v199_v42, 1.0  ;;  %vm204_vm4 = vcmp.eq.f32.partialorder %v200_v45, 1.0  ;;  %v1045_v62 = vld [vmem:[%s4568_s3 + $0x2a0] sm:$0xf] }
 0x133   :  { %v421_v34 = vrot.slane %v413_v59, 4  ;;  %v422_v20 = vrot.slane %v414_v12, 4  ;;  %2353 = vmatmul.msk.bf16.vlgmr.msra.gmra.mxu3 %vm788_vm0, %v781_v29  ;;  %1149 = vperm.xlu1 %2390, %v1146_v41   ;;  %v1073_v59 = vld [vmem:[%s4568_s3 + $0x300] sm:$0xf]  ;;  %vm1049_vm7 = vcmp.eq.f32.partialorder %v1045_v62, 1.0 }
 0x134   :  { %vm1077_vm8 = vcmp.eq.f32.partialorder %v1073_v59, 1.0 }
 0x135   :  { %429 = vst [vmem:[#allocation2 + $0x1a8] sm:$0xf0] %v421_v34 }
 0x136   :  { %430 = vst [vmem:[#allocation2 + $0x1c8] sm:$0xf0] %v422_v20  ;;  %v737_v61 = vld [vmem:[#allocation2 + $0x240] sm:$0xff] }
 0x137   :  { %v765_v63 = vpack.c.bf16 %v737_v61, %v733_v60  ;;  %v738_v25 = vld [vmem:[#allocation2 + $0x2b0] sm:$0xff] }
 0x138   :  { %v766_v4 = vpack.c.bf16 %v738_v25, %v734_v22  ;;  %v187_v7 = vpop.permute.xlu0 %186  ;;  %v1076_v61 = vld [vmem:[%s4568_s3 + $0x318] sm:$0xf] }
 0x139   :  { %811 = vmatpush.bf16.msra.mxu0 %v765_v63  ;;  %v197_v13 = vsel %vm194_vm13, %v187_v7, %v2919_v21  ;;  %v198_v16 = vsel %vm194_vm13, %v3011_v58, %v187_v7  ;;  %v140_v21 = vld [vmem:[%s4572_s2] sm:$0xff]  ;;  %v930_v63 = vld [vmem:[%s4568_s3 + $0xc8] sm:$0xf]  ;;  %vm1080_vm12 = vcmp.eq.f32.partialorder %v1076_v61, 1.0  ;;  %v991_v61 = vld [vmem:[%s4568_s3 + $0x1f0] sm:$0xf] }
 0x13a   :  { %824 = vmatpush.bf16.msra.mxu1 %v766_v4  ;;  %v207_v17 = vsel %vm203_vm2, %v198_v16, 0.0  ;;  %v208_v18 = vsel %vm204_vm4, %v197_v13, 0.0  ;;  %144 = vst [vmem:[#allocation1] ss:$2 sm:$0xff] %v140_v21  ;;  %vm934_vm15 = vcmp.eq.f32.partialorder %v930_v63, 1.0 }
 0x13b   :  { %211 = vst [vmem:[#allocation2 + $0x158] sm:$0xf] %v207_v17  ;;  %v992_v63 = vld [vmem:[%s4568_s3 + $0x1f8] sm:$0xf] }
 0x13c   :  { %212 = vst [vmem:[#allocation2 + $0x1e0] sm:$0xf] %v208_v18  ;;  %v725_v23 = vld [vmem:[#allocation2 + $0x1a8] sm:$0xff] }
 0x13d   :  { %v726_v1 = vld [vmem:[#allocation2 + $0x1c8] sm:$0xff] }
 0x141   :  { %v3106_v58 = vld.sshfl [vmem:[#allocation1] sm:$0xff pattern:$0x75316420]  ;;  %v3143_v43 = vld.sshfl [vmem:[#allocation1 + $0x8] sm:$0xff pattern:$0x75316420] }
 0x142   :  { %v729_v24 = vld [vmem:[#allocation2 + $0x158] sm:$0xff]  ;;  %1895 = vrot.lane.b32.xlu2 %v3106_v58, %s2409_s21  ;;  %150 = vst [vmem:[#allocation1] ss:$2 sm:$0xff] %v2349_v40 }
 0x143   :  { %v761_v0 = vpack.c.bf16 %v729_v24, %v725_v23  ;;  %v730_v50 = vld [vmem:[#allocation2 + $0x1e0] sm:$0xff]  ;;  %v1020_v24 = vld [vmem:[%s4568_s3 + $0x258] sm:$0xf] }
 0x144   :  { %v762_v26 = vpack.c.bf16 %v730_v50, %v726_v1  ;;  %v958_v1 = vld [vmem:[%s4568_s3 + $0x128] sm:$0xf]  ;;  %vm1024_vm2 = vcmp.eq.f32.partialorder %v1020_v24, 1.0 }
 0x145   :  { %812 = vmatpush.bf16.msra.mxu0 %v761_v0  ;;  %v1017_v0 = vld [vmem:[%s4568_s3 + $0x240] sm:$0xf] }
 0x146   :  { %825 = vmatpush.bf16.msra.mxu1 %v762_v26  ;;  %vm1021_vm4 = vcmp.eq.f32.partialorder %v1017_v0, 1.0 }
 0x148   :  { %2350 = vmatmul.msk.bf16.vlgmr.msra.gmra.mxu0 %vm788_vm0, %v781_v29 }
 0x149   :  { %2351 = vmatmul.msk.bf16.vlgmr.msra.gmra.mxu1 %vm788_vm0, %v781_v29  ;;  %v3157_v31 = vld.sshfl [vmem:[#allocation1 + $0x8] sm:$0xff pattern:$0x75316420] }
 0x19c   :  { %v3163_v44 = vpop.permute.xlu2 %1895 }
 0x19d   :  { %v786_v27 = vpop.permute.xlu1 %785 }
 0x1a5   :  { %v3171_v49 = vpop.permute.xlu1 %1149 }
 0x1b5   :  { %v840_v28 = vpop.f32.mrf.mxu2 }
 0x1b6   :  { %v841_v57 = vadd.f32 %v840_v28, %v786_v27  ;;  %v853_v30 = vpop.f32.mrf.mxu3 }
 0x1b7   :  { %v854_v19 = vadd.f32 %v853_v30, %v786_v27 }
 0x1b8   :  { %2393 = vtanh.f32 %v841_v57 }
 0x1b9   :  { %2395 = vtanh.f32 %v854_v19 }
 0x1bd   :  { %v842_v33 = vpop.f32.mrf.mxu2 }
 0x1be   :  { %v2394_v35 = vpop.eup %2393  ;;  %v855_v32 = vpop.f32.mrf.mxu3 }
 0x1bf   :  { %v2396_v52 = vpop.eup %2395  ;;  %2370 = vst [vmem:[%s4573_s10 + $0x10] sm:$0xf] %v2394_v35 }
 0x1c0   :  { %975 = vst [vmem:[#allocation2 + $0x280] sm:$0xf] %v2394_v35 }
 0x1c1   :  { %2371 = vst [vmem:[%s4573_s10 + $0x18] sm:$0xf] %v2396_v52 }
 0x1c2   :  { %976 = vst [vmem:[#allocation2 + $0x148] sm:$0xf] %v2396_v52 }
 0x1c5   :  { %v814_v36 = vpop.f32.mrf.mxu0 }
 0x1c6   :  { %v815_v53 = vadd.f32 %v814_v36, %v786_v27  ;;  %v827_v48 = vpop.f32.mrf.mxu1  ;;  %v1048_v36 = vld [vmem:[%s4568_s3 + $0x2b8] sm:$0xf] }
 0x1c7   :  { %v828_v37 = vadd.f32 %v827_v48, %v786_v27 }
 0x1c8   :  { %2397 = vtanh.f32 %v815_v53  ;;  %v874_v53 = vld [vmem:[%s4568_s3 + $0x8] sm:$0xf] }
 0x1c9   :  { %2399 = vtanh.f32 %v828_v37  ;;  %v989_v37 = vld [vmem:[%s4568_s3 + $0x1e0] sm:$0xf] }
 0x1cd   :  { %v816_v38 = vpop.f32.mrf.mxu0 }
 0x1ce   :  { %v2398_v39 = vpop.eup %2397  ;;  %v829_v15 = vpop.f32.mrf.mxu1 }
 0x1cf   :  { %v2400_v56 = vpop.eup %2399  ;;  %2305 = vst [vmem:[%s4573_s10] sm:$0xf] %v2398_v39  ;;  %945 = vrot.lane.b32.xlu1 %v2398_v39, %s2414_s28  ;;  %977 = vrot.lane.b32.xlu0 %v2398_v39, %s2412_s26 }
 0x1d0   :  { %973 = vst [vmem:[#allocation2 + $0x80] sm:$0xf] %v2398_v39  ;;  %1061 = vrot.lane.b32.xlu2 %v2398_v39, %s2409_s21 }
 0x1d1   :  { %2306 = vst [vmem:[%s4573_s10 + $0x8] sm:$0xf] %v2400_v56 }
 0x1d2   :  { %974 = vst [vmem:[#allocation2 + $0x298] sm:$0xf] %v2400_v56 }
 0x1d7   :  { %917 = vrot.lane.b32.xlu0 %v2398_v39, %s2413_s27  ;;  %1035 = vrot.lane.b32.xlu1 %v2400_v56, %s2411_s1 }
 0x1d8   :  { %1005 = vrot.lane.b32.xlu2 %v2398_v39, %s2410_s22 }
 0x1df   :  { %889 = vrot.lane.b32.xlu0 %v2398_v39, %s2416_s15  ;;  %1067 = vrot.lane.b32.xlu1 %v2396_v52, %s2409_s21 }
 0x1e0   :  { %1033 = vrot.lane.b32.xlu2 %v2398_v39, %s2411_s1 }
 0x1e7   :  { %1011 = vrot.lane.b32.xlu1 %v2396_v52, %s2410_s22  ;;  %1007 = vrot.lane.b32.xlu0 %v2400_v56, %s2410_s22 }
 0x1e8   :  { %861 = vrot.lane.b32.xlu2 %v2398_v39, %s2415_s14 }
 0x1ef   :  { %1039 = vrot.lane.b32.xlu1 %v2396_v52, %s2411_s1  ;;  %863 = vrot.lane.b32.xlu0 %v2400_v56, %s2415_s14 }
 0x1f0   :  { %1063 = vrot.lane.b32.xlu2 %v2400_v56, %s2409_s21 }
 0x1f7   :  { %891 = vrot.lane.b32.xlu0 %v2400_v56, %s2416_s15  ;;  %981 = vrot.lane.b32.xlu1 %v2394_v35, %s2412_s26 }
 0x1f8   :  { %919 = vrot.lane.b32.xlu2 %v2400_v56, %s2413_s27 }
 0x1ff   :  { %923 = vrot.lane.b32.xlu1 %v2396_v52, %s2413_s27  ;;  %1065 = vrot.lane.b32.xlu0 %v2394_v35, %s2409_s21 }
 0x200   :  { %947 = vrot.lane.b32.xlu2 %v2400_v56, %s2414_s28 }
 0x207   :  { %951 = vrot.lane.b32.xlu1 %v2396_v52, %s2414_s28  ;;  %1009 = vrot.lane.b32.xlu0 %v2394_v35, %s2410_s22 }
 0x208   :  { %979 = vrot.lane.b32.xlu2 %v2400_v56, %s2412_s26 }
 0x20f   :  { %865 = vrot.lane.b32.xlu1 %v2394_v35, %s2415_s14  ;;  %1037 = vrot.lane.b32.xlu0 %v2394_v35, %s2411_s1 }
 0x210   :  { %983 = vrot.lane.b32.xlu2 %v2396_v52, %s2412_s26 }
 0x217   :  { %893 = vrot.lane.b32.xlu1 %v2394_v35, %s2416_s15  ;;  %921 = vrot.lane.b32.xlu0 %v2394_v35, %s2413_s27 }
 0x218   :  { %867 = vrot.lane.b32.xlu2 %v2396_v52, %s2415_s14 }
 0x21f   :  { %949 = vrot.lane.b32.xlu0 %v2394_v35, %s2414_s28  ;;  %1901 = vrot.lane.b32.xlu1 %v3157_v31, %s2409_s21 }
 0x220   :  { %895 = vrot.lane.b32.xlu2 %v2396_v52, %s2416_s15 }
 0x227   :  { %1839 = vrot.lane.b32.xlu1 %v3106_v58, %s2410_s22 }
 0x22a   :  { %v1062_v46 = vpop.permute.xlu2 %1061 }
 0x22f   :  { %1867 = vrot.lane.b32.xlu1 %v3106_v58, %s2411_s1 }
 0x232   :  { %v1006_v47 = vpop.permute.xlu2 %1005 }
 0x237   :  { %1897 = vrot.lane.b32.xlu1 %v3143_v43, %s2409_s21 }
 0x23a   :  { %v3173_v51 = vpop.permute.xlu2 %1033 }
 0x23f   :  { %1811 = vrot.lane.b32.xlu1 %v3106_v58, %s2412_s26 }
 0x241   :  { %v3177_v29 = vpop.permute.xlu1 %945  ;;  %v3179_v54 = vpop.permute.xlu0 %977 }
 0x242   :  { %v3181_v55 = vpop.permute.xlu2 %861 }
 0x247   :  { %1841 = vrot.lane.b32.xlu1 %v3143_v43, %s2410_s22 }
 0x249   :  { %v3191_v12 = vpop.permute.xlu0 %917  ;;  %v3193_v34 = vpop.permute.xlu1 %1035 }
 0x24a   :  { %v1043_v20 = vsel %vm343_vm6, %v3173_v51, %v3193_v34  ;;  %v3199_v41 = vpop.permute.xlu2 %1063 }
 0x24b   :  { %v1053_v42 = vsel %vm1049_vm7, %v1043_v20, 0.0  ;;  %v1071_v45 = vsel %vm372_vm1, %v1062_v46, %v3199_v41  ;;  %vm962_vm7 = vcmp.eq.f32.partialorder %v958_v1, 1.0 }
 0x24c   :  { %1057 = vst [vmem:[#allocation2 + $0x1f0] sm:$0xf] %v1053_v42  ;;  %v1081_v60 = vsel %vm1077_vm8, %v1071_v45, 0.0  ;;  %vm1052_vm8 = vcmp.eq.f32.partialorder %v1048_v36, 1.0 }
 0x24d   :  { %1085 = vst [vmem:[#allocation2 + $0x2f0] sm:$0xf] %v1081_v60  ;;  %v990_v60 = vld [vmem:[%s4568_s3 + $0x1e8] sm:$0xf] }
 0x251   :  { %v3210_v22 = vpop.permute.xlu0 %889  ;;  %v3212_v25 = vpop.permute.xlu1 %1067 }
 0x252   :  { %v1072_v4 = vsel %vm372_vm1, %v3212_v25, %v1062_v46  ;;  %v3217_v7 = vpop.permute.xlu2 %919 }
 0x253   :  { %v1084_v13 = vsel %vm1080_vm12, %v1072_v4, 0.0  ;;  %v927_v16 = vsel %vm223_vm11, %v3191_v12, %v3217_v7  ;;  %vm878_vm12 = vcmp.eq.f32.partialorder %v874_v53, 1.0  ;;  %v1117_v42 = vld [vmem:[#allocation2 + $0x1f0] sm:$0xff]  ;;  %v873_v53 = vld [vmem:[%s4568_s3] sm:$0xf] }
 0x254   :  { %1088 = vst [vmem:[#allocation2 + $0x330] sm:$0xf] %v1084_v13  ;;  %v938_v17 = vsel %vm934_vm15, %v927_v16, 0.0  ;;  %v1121_v18 = vld [vmem:[#allocation2 + $0x2f0] sm:$0xff]  ;;  %vm993_vm15 = vcmp.eq.f32.partialorder %v989_v37, 1.0 }
 0x255   :  { %942 = vst [vmem:[#allocation2 + $0xa8] sm:$0xf] %v938_v17  ;;  %v1141_v23 = vpack.c.bf16 %v1121_v18, %v1121_v18 }
 0x257   :  { %v1156_v50 = vsel %vm792_vm9, %v1141_v23, 0 }
 0x258   :  { %1170 = vmatpush.bf16.msrb.mxu0 %v1156_v50 }
 0x259   :  { %v3233_v26 = vpop.permute.xlu1 %1011  ;;  %v3235_v21 = vpop.permute.xlu0 %1007 }
 0x25a   :  { %v1016_v27 = vsel %vm314_vm3, %v3233_v26, %v1006_v47  ;;  %v1015_v28 = vsel %vm314_vm3, %v1006_v47, %v3235_v21  ;;  %v3243_v57 = vpop.permute.xlu2 %947 }
 0x25b   :  { %v1028_v30 = vsel %vm1024_vm2, %v1016_v27, 0.0  ;;  %v1025_v19 = vsel %vm1021_vm4, %v1015_v28, 0.0  ;;  %v955_v33 = vsel %vm252_vm14, %v3177_v29, %v3243_v57  ;;  %v1124_v35 = vld [vmem:[#allocation2 + $0x330] sm:$0xff]  ;;  %vm994_vm4 = vcmp.eq.f32.partialorder %v990_v60, 1.0  ;;  %v929_v28 = vld [vmem:[%s4568_s3 + $0xc0] sm:$0xf] }
 0x25c   :  { %1032 = vst [vmem:[#allocation2 + $0x230] sm:$0xf] %v1028_v30  ;;  %v966_v32 = vsel %vm962_vm7, %v955_v33, 0.0  ;;  %v1144_v52 = vpack.c.bf16 %v1124_v35, %v1124_v35  ;;  %vm995_vm7 = vcmp.eq.f32.partialorder %v991_v61, 1.0  ;;  %v1074_v35 = vld [vmem:[%s4568_s3 + $0x308] sm:$0xf] }
 0x25d   :  { %1029 = vst [vmem:[#allocation2 + $0x168] sm:$0xf] %v1025_v19  ;;  %v2418_v61 = vmov 0.0  }
 0x25e   :  { %970 = vst [vmem:[#allocation2 + $0x2b0] sm:$0xf] %v966_v32  ;;  %v1165_v48 = vsel %vm792_vm9, %v1144_v52, 0  ;;  %v1105_v32 = vld [vmem:[#allocation2 + $0x80] sm:$0xff] }
 0x25f   :  { %1209 = vmatpush.bf16.msrb.mxu3 %v1165_v48  ;;  %109 = vst [vmem:[#allocation2 + $0x128] sm:$0xff] %v2418_v61 }
 0x260   :  { %38 = vst [vmem:[#allocation2 + $0x130] sm:$0xff] %v2418_v61 }
 0x261   :  { %v3259_v38 = vpop.permute.xlu1 %1039  ;;  %v3261_v39 = vpop.permute.xlu0 %863  ;;  %39 = vst [vmem:[#allocation2 + $0x150] sm:$0xff] %v2418_v61 }
 0x262   :  { %v1044_v15 = vsel %vm343_vm6, %v3259_v38, %v3173_v51  ;;  %v871_v56 = vsel %vm165_vm5, %v3181_v55, %v3261_v39  ;;  %v980_v40 = vpop.permute.xlu2 %979  ;;  %v902_v51 = vld [vmem:[%s4568_s3 + $0x68] sm:$0xf]  ;;  %40 = vst [vmem:[#allocation2 + $0x30] sm:$0xff] %v2418_v61 }
 0x263   :  { %v1056_v46 = vsel %vm1052_vm8, %v1044_v15, 0.0  ;;  %v882_v47 = vsel %vm878_vm12, %v871_v56, 0.0  ;;  %v987_v62 = vsel %vm285_vm10, %v3179_v54, %v980_v40  ;;  %vm906_vm2 = vcmp.eq.f32.partialorder %v902_v51, 1.0  ;;  %v1116_v50 = vld [vmem:[#allocation2 + $0x230] sm:$0xff]  ;;  %41 = vst [vmem:[#allocation2 + $0x88] sm:$0xff] %v2418_v61 }
 0x264   :  { %1060 = vst [vmem:[#allocation2 + $0x228] sm:$0xf] %v1056_v46  ;;  %v997_v59 = vsel %vm993_vm15, %v987_v62, 0.0  ;;  %v1113_v20 = vld [vmem:[#allocation2 + $0x168] sm:$0xff]  ;;  %vm996_vm8 = vcmp.eq.f32.partialorder %v992_v63, 1.0  ;;  %vm933_vm12 = vcmp.eq.f32.partialorder %v929_v28, 1.0 }
 0x265   :  { %886 = vst [vmem:[#allocation2 + $0x1c8] sm:$0xf] %v882_v47  ;;  %v1137_v45 = vpack.c.bf16 %v1117_v42, %v1113_v20  ;;  %vm1078_vm15 = vcmp.eq.f32.partialorder %v1074_v35, 1.0  ;;  %v1019_v42 = vld [vmem:[%s4568_s3 + $0x250] sm:$0xf] }
 0x266   :  { %1001 = vst [vmem:[#allocation2 + $0x340] sm:$0xf] %v997_v59 }
 0x267   :  { %1171 = vmatpush.bf16.msrb.mxu0 %v1137_v45  ;;  %v1108_v45 = vld [vmem:[#allocation2 + $0x148] sm:$0xff]  ;;  %42 = vst [vmem:[#allocation2 + $0x2a0] sm:$0xff] %v2418_v61 }
 0x268   :  { %43 = vst [vmem:[#allocation2 + $0x58] sm:$0xff] %v2418_v61 }
 0x269   :  { %v3286_v4 = vpop.permute.xlu0 %891  ;;  %v982_v13 = vpop.permute.xlu1 %981  ;;  %44 = vst [vmem:[#allocation2 + $0x178] sm:$0xff] %v2418_v61 }
 0x26a   :  { %v899_v16 = vsel %vm194_vm13, %v3210_v22, %v3286_v4  ;;  %v986_v17 = vsel %vm285_vm10, %v980_v40, %v982_v13  ;;  %v984_v18 = vpop.permute.xlu2 %983  ;;  %45 = vst [vmem:[#allocation2 + $0x1a0] sm:$0xff] %v2418_v61 }
 0x26b   :  { %v910_v23 = vsel %vm906_vm2, %v899_v16, 0.0  ;;  %v998_v24 = vsel %vm994_vm4, %v986_v17, 0.0  ;;  %v985_v0 = vsel %vm285_vm10, %v982_v13, %v984_v18  ;;  %v988_v1 = vsel %vm285_vm10, %v984_v18, %v3179_v54  ;;  %v1120_v27 = vld [vmem:[#allocation2 + $0x228] sm:$0xff]  ;;  %46 = vst [vmem:[#allocation2 + $0xe0] sm:$0xff] %v2418_v61 }
 0x26c   :  { %914 = vst [vmem:[#allocation2 + $0x1e0] sm:$0xf] %v910_v23  ;;  %v999_v30 = vsel %vm995_vm7, %v985_v0, 0.0  ;;  %v1000_v19 = vsel %vm996_vm8, %v988_v1, 0.0  ;;  %v1140_v33 = vpack.c.bf16 %v1120_v27, %v1116_v50  ;;  %v1075_v54 = vld [vmem:[%s4568_s3 + $0x310] sm:$0xf] }
 0x26d   :  { %1002 = vst [vmem:[#allocation2 + $0x48] sm:$0xf] %v998_v24  ;;  %v1109_v52 = vld [vmem:[#allocation2 + $0x340] sm:$0xff]  ;;  %vm1079_vm2 = vcmp.eq.f32.partialorder %v1075_v54, 1.0  ;;  %vm877_vm4 = vcmp.eq.f32.partialorder %v873_v53, 1.0 }
 0x26e   :  { %1003 = vst [vmem:[#allocation2 + $0x120] sm:$0xf] %v999_v30  ;;  %v1133_v36 = vpack.c.bf16 %v1109_v52, %v1105_v32  ;;  %1210 = vmatpush.bf16.msrb.mxu3 %v1140_v33  ;;  %v876_v27 = vld [vmem:[%s4568_s3 + $0x18] sm:$0xf]  ;;  %v1047_v33 = vld [vmem:[%s4568_s3 + $0x2b0] sm:$0xf] }
 0x26f   :  { %1004 = vst [vmem:[#allocation2 + $0x78] sm:$0xf] %v1000_v19 }
 0x270   :  { %1172 = vmatpush.bf16.msrb.mxu0 %v1133_v36  ;;  %47 = vst [vmem:[#allocation2 + $0x248] sm:$0xff] %v2418_v61 }
 0x271   :  { %v3311_v48 = vpop.permute.xlu1 %923  ;;  %v1066_v37 = vpop.permute.xlu0 %1065  ;;  %48 = vst [vmem:[#allocation2 + $0x1d8] sm:$0xff] %v2418_v61 }
 0x272   :  { %v928_v15 = vsel %vm223_vm11, %v3311_v48, %v3191_v12  ;;  %v1069_v56 = vsel %vm372_vm1, %v1066_v37, %v3212_v25  ;;  %v1070_v40 = vsel %vm372_vm1, %v3199_v41, %v1066_v37  ;;  %v3323_v46 = vpop.permute.xlu2 %867  ;;  %v957_v12 = vld [vmem:[%s4568_s3 + $0x120] sm:$0xf]  ;;  %v1018_v41 = vld [vmem:[%s4568_s3 + $0x248] sm:$0xf]  ;;  %49 = vst [vmem:[#allocation2 + $0x170] sm:$0xff] %v2418_v61 }
 0x273   :  { %v937_v47 = vsel %vm933_vm12, %v928_v15, 0.0  ;;  %v1082_v62 = vsel %vm1078_vm15, %v1070_v40, 0.0  ;;  %v1083_v59 = vsel %vm1079_vm2, %v1069_v56, 0.0  ;;  %v872_v20 = vsel %vm165_vm5, %v3323_v46, %v3181_v55  ;;  %v901_v55 = vld [vmem:[%s4568_s3 + $0x60] sm:$0xf]  ;;  %50 = vst [vmem:[#allocation2 + $0x38] sm:$0xff] %v2418_v61 }
 0x274   :  { %941 = vst [vmem:[#allocation2 + $0xb0] sm:$0xf] %v937_v47  ;;  %v881_v25 = vsel %vm877_vm4, %v872_v20, 0.0  ;;  %vm961_vm7 = vcmp.eq.f32.partialorder %v957_v12, 1.0  ;;  %vm1022_vm8 = vcmp.eq.f32.partialorder %v1018_v41, 1.0  ;;  %vm1023_vm12 = vcmp.eq.f32.partialorder %v1019_v42, 1.0 }
 0x275   :  { %1086 = vst [vmem:[#allocation2 + $0x358] sm:$0xf] %v1082_v62  ;;  %vm905_vm15 = vcmp.eq.f32.partialorder %v901_v55, 1.0  ;;  %vm880_vm4 = vcmp.eq.f32.partialorder %v876_v27, 1.0  ;;  %v931_v20 = vld [vmem:[%s4568_s3 + $0xd0] sm:$0xf] }
 0x276   :  { %1087 = vst [vmem:[#allocation2 + $0x1d0] sm:$0xf] %v1083_v59  ;;  %v1112_v51 = vld [vmem:[#allocation2 + $0x78] sm:$0xff]  ;;  %v932_v12 = vld [vmem:[%s4568_s3 + $0xd8] sm:$0xf] }
 0x277   :  { %885 = vst [vmem:[#allocation2 + $0x1a8] sm:$0xf] %v881_v25  ;;  %v1136_v60 = vpack.c.bf16 %v1112_v51, %v1108_v45 }
 0x278   :  { %51 = vst [vmem:[#allocation2 + $0x188] sm:$0xff] %v2418_v61 }
 0x279   :  { %1211 = vmatpush.bf16.msrb.mxu3 %v1136_v60  ;;  %v3342_v63 = vpop.permute.xlu1 %951  ;;  %v1010_v13 = vpop.permute.xlu0 %1009  ;;  %52 = vst [vmem:[#allocation2 + $0x258] sm:$0xff] %v2418_v61 }
 0x27a   :  { %v956_v16 = vsel %vm252_vm14, %v3342_v63, %v3177_v29  ;;  %v1013_v17 = vsel %vm314_vm3, %v1010_v13, %v3233_v26  ;;  %v1014_v18 = vsel %vm314_vm3, %v3235_v21, %v1010_v13  ;;  %v3355_v23 = vpop.permute.xlu2 %895  ;;  %v875_v26 = vld [vmem:[%s4568_s3 + $0x10] sm:$0xf]  ;;  %53 = vst [vmem:[#allocation2 + $0x40] sm:$0xff] %v2418_v61 }
 0x27b   :  { %v965_v24 = vsel %vm961_vm7, %v956_v16, 0.0  ;;  %v1026_v0 = vsel %vm1022_vm8, %v1014_v18, 0.0  ;;  %v1027_v1 = vsel %vm1023_vm12, %v1013_v17, 0.0  ;;  %v900_v29 = vsel %vm194_vm13, %v3355_v23, %v3210_v22  ;;  %v1046_v22 = vld [vmem:[%s4568_s3 + $0x2a8] sm:$0xf]  ;;  %v1097_v62 = vld [vmem:[#allocation2 + $0xb0] sm:$0xff] }
 0x27c   :  { %969 = vst [vmem:[#allocation2 + $0x240] sm:$0xf] %v965_v24  ;;  %v909_v21 = vsel %vm905_vm15, %v900_v29, 0.0  ;;  %v1122_v50 = vld [vmem:[#allocation2 + $0x358] sm:$0xff]  ;;  %vm879_vm2 = vcmp.eq.f32.partialorder %v875_v26, 1.0  ;;  %vm1050_vm7 = vcmp.eq.f32.partialorder %v1046_v22, 1.0 }
 0x27d   :  { %1030 = vst [vmem:[#allocation2] sm:$0xf] %v1026_v0  ;;  %v1142_v28 = vpack.c.bf16 %v1122_v50, %v1122_v50  ;;  %v1123_v30 = vld [vmem:[#allocation2 + $0x1d0] sm:$0xff]  ;;  %vm1051_vm8 = vcmp.eq.f32.partialorder %v1047_v33, 1.0  ;;  %v3422_v17 = vld [vmem:[%s4574_s6] sm:$0x3] }
 0x27e   :  { %1031 = vst [vmem:[#allocation2 + $0x290] sm:$0xf] %v1027_v1  ;;  %v1143_v19 = vpack.c.bf16 %v1123_v30, %v1123_v30  ;;  %v1089_v41 = vld [vmem:[#allocation2 + $0x1a8] sm:$0xff]  ;;  %v1910_v29 = vld [vmem:[%s4568_s3 + $0x358] sm:$0xf]  ;;  %v1111_v30 = vld [vmem:[#allocation2 + $0x120] sm:$0xff] }
 0x27f   :  { %913 = vst [vmem:[#allocation2 + $0x158] sm:$0xf] %v909_v21  ;;  %v1159_v35 = vsel %vm792_vm9, %v1142_v28, 0  ;;  %v1110_v28 = vld [vmem:[#allocation2 + $0x48] sm:$0xff]  ;;  %v1106_v33 = vld [vmem:[#allocation2 + $0x298] sm:$0xff] }
 0x280   :  { %1183 = vmatpush.bf16.msrb.mxu1 %v1159_v35  ;;  %v1162_v32 = vsel %vm792_vm9, %v1143_v19, 0  ;;  %54 = vst [vmem:[#allocation2 + $0x180] sm:$0xff] %v2418_v61 }
 0x281   :  { %1196 = vmatpush.bf16.msrb.mxu2 %v1162_v32  ;;  %v866_v52 = vpop.permute.xlu1 %865  ;;  %v1038_v54 = vpop.permute.xlu0 %1037  ;;  %55 = vst [vmem:[#allocation2 + $0x268] sm:$0xff] %v2418_v61 }
 0x282   :  { %v869_v36 = vsel %vm165_vm5, %v866_v52, %v3323_v46  ;;  %v870_v53 = vsel %vm165_vm5, %v3261_v39, %v866_v52  ;;  %v1041_v37 = vsel %vm343_vm6, %v1038_v54, %v3259_v38  ;;  %v1042_v15 = vsel %vm343_vm6, %v3193_v34, %v1038_v54  ;;  %v903_v38 = vld [vmem:[%s4568_s3 + $0x70] sm:$0xf]  ;;  %v904_v34 = vld [vmem:[%s4568_s3 + $0x78] sm:$0xf]  ;;  %56 = vst [vmem:[#allocation2 + $0x278] sm:$0xff] %v2418_v61 }
 0x283   :  { %v883_v56 = vsel %vm879_vm2, %v870_v53, 0.0  ;;  %v884_v40 = vsel %vm880_vm4, %v869_v36, 0.0  ;;  %v1054_v47 = vsel %vm1050_vm7, %v1042_v15, 0.0  ;;  %v1101_v59 = vld [vmem:[#allocation2 + $0x240] sm:$0xff]  ;;  %v1055_v46 = vsel %vm1051_vm8, %v1041_v37, 0.0  ;;  %57 = vst [vmem:[#allocation2 + $0x208] sm:$0xff] %v2418_v61 }
 0x284   :  { %887 = vst [vmem:[#allocation2 + $0x1b8] sm:$0xf] %v883_v56  ;;  %v1129_v39 = vpack.c.bf16 %v1101_v59, %v1097_v62  ;;  %vm907_vm12 = vcmp.eq.f32.partialorder %v903_v38, 1.0  ;;  %vm908_vm15 = vcmp.eq.f32.partialorder %v904_v34, 1.0  ;;  %vm935_vm2 = vcmp.eq.f32.partialorder %v931_v20, 1.0  ;;  %v1114_v0 = vld [vmem:[#allocation2] sm:$0xff] }
 0x285   :  { %888 = vst [vmem:[#allocation2 + $0xf8] sm:$0xf] %v884_v40  ;;  %vm936_vm4 = vcmp.eq.f32.partialorder %v932_v12, 1.0  ;;  %v1115_v21 = vld [vmem:[#allocation2 + $0x290] sm:$0xff]  ;;  %v1134_v54 = vpack.c.bf16 %v1110_v28, %v1106_v33  ;;  %v1107_v36 = vld [vmem:[#allocation2 + $0x280] sm:$0xff]  ;;  %v1090_v62 = vld [vmem:[#allocation2 + $0x1c8] sm:$0xff]  ;;  %v1224_v33 = vmul.f32 %v2513_v9, %v2487_v3 }
 0x286   :  { %1058 = vst [vmem:[#allocation2 + $0xe8] sm:$0xf] %v1054_v47  ;;  %1173 = vmatpush.bf16.msrb.mxu0 %v1129_v39  ;;  %v1093_v25 = vld [vmem:[#allocation2 + $0x158] sm:$0xff]  ;;  %v1102_v56 = vld [vmem:[#allocation2 + $0x2b0] sm:$0xff]  ;;  %v1094_v47 = vld [vmem:[#allocation2 + $0x1e0] sm:$0xff] }
 0x287   :  { %1059 = vst [vmem:[#allocation2 + $0xc8] sm:$0xf] %v1055_v46  ;;  %v1125_v42 = vpack.c.bf16 %v1093_v25, %v1089_v41  ;;  %v1126_v59 = vpack.c.bf16 %v1094_v47, %v1090_v62  ;;  %v1909_v28 = vld [vmem:[%s4568_s3 + $0x350] sm:$0xf] }
 0x288   :  { %58 = vst [vmem:[#allocation2 + $0x190] sm:$0xff] %v2418_v61 }
 0x289   :  { %v894_v45 = vpop.permute.xlu1 %893  ;;  %v922_v51 = vpop.permute.xlu0 %921  ;;  %59 = vst [vmem:[#allocation2 + $0x68] sm:$0xff] %v2418_v61 }
 0x28a   :  { %v897_v55 = vsel %vm194_vm13, %v894_v45, %v3355_v23  ;;  %v898_v60 = vsel %vm194_vm13, %v3286_v4, %v894_v45  ;;  %v925_v13 = vsel %vm223_vm11, %v922_v51, %v3311_v48  ;;  %v926_v16 = vsel %vm223_vm11, %v3217_v7, %v922_v51  ;;  %1174 = vmatpush.bf16.msrb.mxu0 %v1125_v42  ;;  %v959_v4 = vld [vmem:[%s4568_s3 + $0x130] sm:$0xf]  ;;  %v960_v7 = vld [vmem:[%s4568_s3 + $0x138] sm:$0xf] }
 0x28b   :  { %v911_v18 = vsel %vm907_vm12, %v898_v60, 0.0  ;;  %v912_v23 = vsel %vm908_vm15, %v897_v55, 0.0  ;;  %v939_v24 = vsel %vm935_vm2, %v926_v16, 0.0  ;;  %v940_v48 = vsel %vm936_vm4, %v925_v13, 0.0  ;;  %60 = vst [vmem:[#allocation2 + $0x300] sm:$0xff] %v2418_v61  ;;  %v1091_v42 = vld [vmem:[#allocation2 + $0x1b8] sm:$0xff] }
 0x28c   :  { %915 = vst [vmem:[#allocation2 + $0x2e8] sm:$0xf] %v911_v18  ;;  %vm963_vm7 = vcmp.eq.f32.partialorder %v959_v4, 1.0  ;;  %vm964_vm8 = vcmp.eq.f32.partialorder %v960_v7, 1.0  ;;  %vm1914_vm12 = vcmp.eq.f32.partialorder %v1910_v29, 1.0  ;;  %v1092_v45 = vld [vmem:[#allocation2 + $0xf8] sm:$0xff]  ;;  %v1223_v7 = vmul.f32 %v2511_v8, %v2485_v2 }
 0x28d   :  { %916 = vst [vmem:[#allocation2 + $0x310] sm:$0xf] %v912_v23  ;;  %2354 = vmatmul.msk.bf16.vlgmr.msrb.gmra.mxu0 %vm788_vm0, %v3422_v17  ;;  %v1118_v1 = vld [vmem:[#allocation2 + $0xe8] sm:$0xff]  ;;  %v3490_v60 = vld.sshfl [vmem:[#allocation1] sm:$0xff pattern:$0x75316420] }
 0x28e   :  { %943 = vst [vmem:[#allocation2 + $0x90] sm:$0xf] %v939_v24  ;;  %v1138_v26 = vpack.c.bf16 %v1118_v1, %v1114_v0  ;;  %v1119_v50 = vld [vmem:[#allocation2 + $0xc8] sm:$0xff]  ;;  %1899 = vrot.lane.b32.xlu0 %v3490_v60, %s2409_s21  ;;  %1843 = vrot.lane.b32.xlu2 %v3490_v60, %s2410_s22  ;;  %v1227_v4 = vsub.f32 1.0, %v2511_v8  ;;  %vm1913_vm4 = vcmp.eq.f32.partialorder %v1909_v28, 1.0 }
 0x28f   :  { %944 = vst [vmem:[#allocation2 + $0x50] sm:$0xf] %v940_v48  ;;  %v1139_v27 = vpack.c.bf16 %v1119_v50, %v1115_v21  ;;  %1755 = vrot.lane.b32.xlu1 %v3490_v60, %s2413_s27 }
 0x290   :  { %1184 = vmatpush.bf16.msrb.mxu1 %v1138_v26  ;;  %61 = vst [vmem:[#allocation2 + $0x1b0] sm:$0xff] %v2418_v61 }
 0x291   :  { %1197 = vmatpush.bf16.msrb.mxu2 %v1139_v27  ;;  %v950_v22 = vpop.permute.xlu0 %949  ;;  %v3437_v19 = vpop.permute.xlu1 %1901  ;;  %62 = vst [vmem:[#allocation2 + $0x270] sm:$0xff] %v2418_v61  ;;  %v1908_v27 = vld [vmem:[%s4568_s3 + $0x348] sm:$0xf] }
 0x292   :  { %v953_v35 = vsel %vm252_vm14, %v950_v22, %v3342_v63  ;;  %v954_v32 = vsel %vm252_vm14, %v3243_v57, %v950_v22  ;;  %v1906_v52 = vsel %vm372_vm1, %v3437_v19, %v3163_v44  ;;  %v1135_v63 = vpack.c.bf16 %v1111_v30, %v1107_v36  ;;  %v1098_v57 = vld [vmem:[#allocation2 + $0xa8] sm:$0xff]  ;;  %63 = vst [vmem:[#allocation2 + $0x10] sm:$0xff] %v2418_v61 }
 0x293   :  { %v967_v53 = vsel %vm963_vm7, %v954_v32, 0.0  ;;  %v968_v37 = vsel %vm964_vm8, %v953_v35, 0.0  ;;  %v1918_v15 = vsel %vm1914_vm12, %v1906_v52, 0.0  ;;  %v1130_v40 = vpack.c.bf16 %v1102_v56, %v1098_v57  ;;  %v1095_v25 = vld [vmem:[#allocation2 + $0x2e8] sm:$0xff]  ;;  %64 = vst [vmem:[#allocation2 + $0x28] sm:$0xff] %v2418_v61 }
 0x294   :  { %971 = vst [vmem:[#allocation2 + $0x210] sm:$0xf] %v967_v53  ;;  %1185 = vmatpush.bf16.msrb.mxu1 %v1134_v54  ;;  %v1096_v41 = vld [vmem:[#allocation2 + $0x310] sm:$0xff]  ;;  %v1127_v51 = vpack.c.bf16 %v1095_v25, %v1091_v42  ;;  %v1228_v30 = vsub.f32 1.0, %v2513_v9  ;;  %vm1912_vm2 = vcmp.eq.f32.partialorder %v1908_v27, 1.0  ;;  %v1229_v27 = vsub.f32 1.0, %v2525_v11 }
 0x295   :  { %972 = vst [vmem:[#allocation2 + $0x308] sm:$0xf] %v968_v37  ;;  %1198 = vmatpush.bf16.msrb.mxu2 %v1135_v63  ;;  %v1099_v46 = vld [vmem:[#allocation2 + $0x90] sm:$0xff]  ;;  %v1128_v55 = vpack.c.bf16 %v1096_v41, %v1092_v45  ;;  %v1879_v41 = vld [vmem:[%s4568_s3 + $0x2e0] sm:$0xf] }
 0x296   :  { %1922 = vst [vmem:[#allocation2 + $0x128] sm:$0xf] %v1918_v15  ;;  %v1100_v38 = vld [vmem:[#allocation2 + $0x50] sm:$0xff]  ;;  %1845 = vrot.lane.b32.xlu0 %v3157_v31, %s2410_s22  ;;  %1871 = vrot.lane.b32.xlu2 %v3490_v60, %s2411_s1 }
 0x297   :  { %65 = vst [vmem:[#allocation2 + $0x1c0] sm:$0xff] %v2418_v61  ;;  %1783 = vrot.lane.b32.xlu1 %v3490_v60, %s2414_s28 }
 0x298   :  { %1186 = vmatpush.bf16.msrb.mxu1 %v1130_v40  ;;  %66 = vst [vmem:[#allocation2 + $0x2d8] sm:$0xff] %v2418_v61  ;;  %v1854_v40 = vld [vmem:[%s4568_s3 + $0x298] sm:$0xf] }
 0x299   :  { %67 = vst [vmem:[#allocation2 + $0x8] sm:$0xff] %v2418_v61  ;;  %v3501_v13 = vpop.permute.xlu1 %1839  ;;  %vm1858_vm8 = vcmp.eq.f32.partialorder %v1854_v40, 1.0 }
 0x29a   :  { %68 = vst [vmem:[#allocation2 + $0xc0] sm:$0xff] %v2418_v61 }
 0x29b   :  { %v1103_v39 = vld [vmem:[#allocation2 + $0x210] sm:$0xff]  ;;  %69 = vst [vmem:[#allocation2 + $0x60] sm:$0xff] %v2418_v61 }
 0x29c   :  { %1187 = vmatpush.bf16.msrb.mxu1 %v1126_v59  ;;  %v1104_v34 = vld [vmem:[#allocation2 + $0x308] sm:$0xff]  ;;  %v1131_v20 = vpack.c.bf16 %v1103_v39, %v1099_v46  ;;  %70 = vst [vmem:[#allocation2 + $0x218] sm:$0xff] %v2418_v61  ;;  %v1851_v59 = vld [vmem:[%s4568_s3 + $0x280] sm:$0xf] }
 0x29d   :  { %v1132_v12 = vpack.c.bf16 %v1104_v34, %v1100_v38  ;;  %71 = vst [vmem:[#allocation2 + $0x260] sm:$0xff] %v2418_v61  ;;  %vm1855_vm12 = vcmp.eq.f32.partialorder %v1851_v59, 1.0 }
 0x29e   :  { %1199 = vmatpush.bf16.msrb.mxu2 %v1131_v20  ;;  %72 = vst [vmem:[#allocation2 + $0x140] sm:$0xff] %v2418_v61  ;;  %1873 = vrot.lane.b32.xlu0 %v3157_v31, %s2411_s1 }
 0x29f   :  { %2355 = vmatmul.msk.bf16.vlgmr.msrb.gmra.mxu1 %vm788_vm0, %v3422_v17  ;;  %1212 = vmatpush.bf16.msrb.mxu3 %v1132_v12  ;;  %73 = vst [vmem:[#allocation2 + $0xa0] sm:$0xff] %v2418_v61 }
 0x2a0   :  { %74 = vst [vmem:[#allocation2 + $0x2d0] sm:$0xff] %v2418_v61  ;;  %1815 = vrot.lane.b32.xlu2 %v3490_v60, %s2412_s26  ;;  %1697 = vrot.lane.b32.xlu1 %v3143_v43, %s2415_s14 }
 0x2a1   :  { %75 = vst [vmem:[#allocation2 + $0x2e0] sm:$0xff] %v2418_v61  ;;  %v3519_v16 = vpop.permute.xlu1 %1867 }
 0x2a2   :  { %1200 = vmatpush.bf16.msrb.mxu2 %v1127_v51  ;;  %76 = vst [vmem:[#allocation2 + $0x198] sm:$0xff] %v2418_v61 }
 0x2a3   :  { %1213 = vmatpush.bf16.msrb.mxu3 %v1128_v55  ;;  %77 = vst [vmem:[#allocation2 + $0x110] sm:$0xff] %v2418_v61  ;;  %v1881_v55 = vld [vmem:[%s4568_s3 + $0x2f0] sm:$0xf] }
 0x2a4   :  { %78 = vst [vmem:[#allocation2 + $0x288] sm:$0xff] %v2418_v61 }
 0x2a5   :  { %2356 = vmatmul.msk.bf16.vlgmr.msrb.gmra.mxu2 %vm788_vm0, %v3422_v17  ;;  %79 = vst [vmem:[#allocation2 + $0x350] sm:$0xff] %v2418_v61 }
 0x2a6   :  { %2357 = vmatmul.msk.bf16.vlgmr.msrb.gmra.mxu3 %vm788_vm0, %v3422_v17  ;;  %80 = vst [vmem:[#allocation2 + $0x2a8] sm:$0xff] %v2418_v61  ;;  %v1907_v17 = vld [vmem:[%s4568_s3 + $0x340] sm:$0xf]  ;;  %1817 = vrot.lane.b32.xlu0 %v3157_v31, %s2412_s26 }
 0x2a7   :  { %81 = vst [vmem:[#allocation2 + $0xd0] sm:$0xff] %v2418_v61  ;;  %vm1911_vm15 = vcmp.eq.f32.partialorder %v1907_v17, 1.0  ;;  %v1882_v17 = vld [vmem:[%s4568_s3 + $0x2f8] sm:$0xf] }
 0x2a8   :  { %82 = vst [vmem:[#allocation2 + $0x2c8] sm:$0xff] %v2418_v61  ;;  %1869 = vrot.lane.b32.xlu2 %v3143_v43, %s2411_s1 }
 0x2a9   :  { %83 = vst [vmem:[#allocation2 + $0x2c0] sm:$0xff] %v2418_v61  ;;  %v3540_v18 = vpop.permute.xlu1 %1897 }
 0x2aa   :  { %84 = vst [vmem:[#allocation2 + $0xd8] sm:$0xff] %v2418_v61  ;;  %v1905_v23 = vsel %vm372_vm1, %v3163_v44, %v3540_v18 }
 0x2ab   :  { %85 = vst [vmem:[#allocation2 + $0x250] sm:$0xff] %v2418_v61  ;;  %v1915_v24 = vsel %vm1911_vm15, %v1905_v23, 0.0 }
 0x2ac   :  { %86 = vst [vmem:[#allocation2 + $0x138] sm:$0xff] %v2418_v61 }
 0x2ad   :  { %87 = vst [vmem:[#allocation2 + $0x348] sm:$0xff] %v2418_v61 }
 0x2ae   :  { %88 = vst [vmem:[#allocation2 + $0x238] sm:$0xff] %v2418_v61  ;;  %1753 = vrot.lane.b32.xlu0 %v3143_v43, %s2413_s27 }
 0x2af   :  { %89 = vst [vmem:[#allocation2 + $0x320] sm:$0xff] %v2418_v61 }
 0x2b0   :  { %90 = vst [vmem:[#allocation2 + $0x1e8] sm:$0xff] %v2418_v61  ;;  %1757 = vrot.lane.b32.xlu2 %v3157_v31, %s2413_s27 }
 0x2b1   :  { %91 = vst [vmem:[#allocation2 + $0x328] sm:$0xff] %v2418_v61  ;;  %v3616_v32 = vpop.permute.xlu1 %1811 }
 0x2b2   :  { %92 = vst [vmem:[#allocation2 + $0x1f8] sm:$0xff] %v2418_v61 }
 0x2b3   :  { %93 = vst [vmem:[#allocation2 + $0x108] sm:$0xff] %v2418_v61 }
 0x2b4   :  { %94 = vst [vmem:[#allocation2 + $0x70] sm:$0xff] %v2418_v61 }
 0x2b5   :  { %95 = vst [vmem:[#allocation2 + $0x100] sm:$0xff] %v2418_v61 }
 0x2b6   :  { %96 = vst [vmem:[#allocation2 + $0x160] sm:$0xff] %v2418_v61  ;;  %1781 = vrot.lane.b32.xlu0 %v3143_v43, %s2414_s28 }
 0x2b7   :  { %97 = vst [vmem:[#allocation2 + $0x20] sm:$0xff] %v2418_v61 }
 0x2b8   :  { %98 = vst [vmem:[#allocation2 + $0x118] sm:$0xff] %v2418_v61  ;;  %1785 = vrot.lane.b32.xlu2 %v3157_v31, %s2414_s28 }
 0x2b9   :  { %99 = vst [vmem:[#allocation2 + $0x220] sm:$0xff] %v2418_v61  ;;  %v1842_v46 = vpop.permute.xlu1 %1841 }
 0x2ba   :  { %100 = vst [vmem:[#allocation2 + $0x200] sm:$0xff] %v2418_v61  ;;  %v1849_v12 = vsel %vm314_vm3, %v3501_v13, %v1842_v46 }
 0x2bb   :  { %101 = vst [vmem:[#allocation2 + $0x18] sm:$0xff] %v2418_v61  ;;  %v1859_v51 = vsel %vm1855_vm12, %v1849_v12, 0.0 }
 0x2bc   :  { %102 = vst [vmem:[#allocation2 + $0xf0] sm:$0xff] %v2418_v61 }
 0x2bd   :  { %103 = vst [vmem:[#allocation2 + $0xb8] sm:$0xff] %v2418_v61 }
 0x2be   :  { %104 = vst [vmem:[#allocation2 + $0x338] sm:$0xff] %v2418_v61  ;;  %1813 = vrot.lane.b32.xlu0 %v3143_v43, %s2412_s26 }
 0x2bf   :  { %105 = vst [vmem:[#allocation2 + $0x2b8] sm:$0xff] %v2418_v61 }
 0x2c0   :  { %106 = vst [vmem:[#allocation2 + $0x318] sm:$0xff] %v2418_v61 }
 0x2c1   :  { %107 = vst [vmem:[#allocation2 + $0x98] sm:$0xff] %v2418_v61 }
 0x2c2   :  { %108 = vst [vmem:[#allocation2 + $0x2f8] sm:$0xff] %v2418_v61 }
 0x2c3   :  { %1807 = vst [vmem:[#allocation2 + $0x2d0] sm:$0xf] %v3106_v58 }
 0x2c4   :  { %1808 = vst [vmem:[#allocation2 + $0x2e0] sm:$0xf] %v3143_v43 }
 0x2c5   :  { %1810 = vst [vmem:[#allocation2 + $0x110] sm:$0xf] %v3157_v31 }
 0x2c6   :  { %1919 = vst [vmem:[#allocation2 + $0x318] sm:$0xf] %v1915_v24  ;;  %v1880_v24 = vld [vmem:[%s4568_s3 + $0x2e8] sm:$0xf] }
 0x2c7   :  { %1809 = vst [vmem:[#allocation2 + $0x198] sm:$0xf] %v3490_v60 }
 0x2c8   :  { %1863 = vst [vmem:[#allocation2 + $0x1e8] sm:$0xf] %v1859_v51 }
 0x2e8   :  { %v1844_v8 = vpop.permute.xlu2 %1843 }
 0x2e9   :  { %v1848_v38 = vsel %vm314_vm3, %v1842_v46, %v1844_v8 }
 0x2f0   :  { %v3597_v50 = vpop.permute.xlu2 %1871 }
 0x2fa   :  { %v3627_v53 = vpop.permute.xlu2 %1815 }
 0x300   :  { %v1900_v54 = vpop.permute.xlu0 %1899 }
 0x301   :  { %v1903_v3 = vsel %vm372_vm1, %v1900_v54, %v3437_v19  ;;  %v1904_v9 = vsel %vm372_vm1, %v3540_v18, %v1900_v54  ;;  %v1853_v19 = vld [vmem:[%s4568_s3 + $0x290] sm:$0xf] }
 0x302   :  { %v1916_v37 = vsel %vm1912_vm2, %v1904_v9, 0.0  ;;  %v1917_v15 = vsel %vm1913_vm4, %v1903_v3, 0.0  ;;  %vm1857_vm7 = vcmp.eq.f32.partialorder %v1853_v19, 1.0  ;;  %v1870_v18 = vpop.permute.xlu2 %1869  ;;  %vm1883_vm2 = vcmp.eq.f32.partialorder %v1879_v41, 1.0  ;;  %v1756_v19 = vpop.permute.xlu1 %1755 }
 0x303   :  { %1920 = vst [vmem:[#allocation2 + $0x98] sm:$0xf] %v1916_v37  ;;  %vm1885_vm4 = vcmp.eq.f32.partialorder %v1881_v55, 1.0 }
 0x304   :  { %1921 = vst [vmem:[#allocation2 + $0x2f8] sm:$0xf] %v1917_v15 }
 0x308   :  { %v1846_v39 = vpop.permute.xlu0 %1845 }
 0x309   :  { %v1847_v34 = vsel %vm314_vm3, %v1844_v8, %v1846_v39  ;;  %v1850_v20 = vsel %vm314_vm3, %v1846_v39, %v3501_v13  ;;  %v1793_v39 = vld [vmem:[%s4568_s3 + $0x170] sm:$0xf] }
 0x30a   :  { %v1176_v44 = vpop.f32.mrf.mxu0  ;;  %v1861_v42 = vsel %vm1857_vm7, %v1847_v34, 0.0  ;;  %v1862_v45 = vsel %vm1858_vm8, %v1850_v20, 0.0  ;;  %vm1886_vm7 = vcmp.eq.f32.partialorder %v1882_v17, 1.0  ;;  %vm1884_vm8 = vcmp.eq.f32.partialorder %v1880_v24, 1.0  ;;  %v3742_v15 = vpop.permute.xlu2 %1757 }
 0x30b   :  { %v1177_v61 = vadd.f32 %v1176_v44, %v3171_v49  ;;  %1865 = vst [vmem:[#allocation2 + $0x1f8] sm:$0xf] %v1861_v42  ;;  %v1877_v44 = vsel %vm343_vm6, %v3519_v16, %v1870_v18  ;;  %v1784_v34 = vpop.permute.xlu1 %1783  ;;  %v1823_v42 = vld [vmem:[%s4568_s3 + $0x220] sm:$0xf] }
 0x30c   :  { %1866 = vst [vmem:[#allocation2 + $0x108] sm:$0xf] %v1862_v45  ;;  %v1824_v45 = vld [vmem:[%s4568_s3 + $0x228] sm:$0xf] }
 0x30d   :  { %2401 = vtanh.f32 %v1177_v61 }
 0x312   :  { %v1178_v48 = vpop.f32.mrf.mxu0  ;;  %v3770_v46 = vpop.permute.xlu2 %1785 }
 0x313   :  { %v3573_v0 = vpop.eup %2401 }
 0x314   :  { %v2309_v1 = vrot.slane %v3573_v0, 4  ;;  %1351 = vst [vmem:[#allocation2 + $0x80] sm:$0xf] %v3573_v0  ;;  %1295 = vrot.lane.b32.xlu1 %v3573_v0, %s2413_s27  ;;  %1239 = vrot.lane.b32.xlu2 %v3573_v0, %s2415_s14  ;;  %v1231_v29 = vmul.f32 %v3573_v0, %v1227_v4 }
 0x315   :  { %1267 = vrot.lane.b32.xlu0 %v3573_v0, %s2416_s15 }
 0x316   :  { %2313 = vst [vmem:[%s4573_s10] sm:$0xf0] %v2309_v1  ;;  %v3587_v2 = vadd.f32 %v1231_v29, %v1223_v7  ;;  %v1876_v1 = vsel %vm343_vm6, %v1870_v18, %v3597_v50  ;;  %v1887_v29 = vsel %vm1883_vm2, %v1877_v44, 0.0 }
 0x317   :  { %1891 = vst [vmem:[#allocation2 + $0x118] sm:$0xf] %v1887_v29 }
 0x318   :  { %1579 = vst [vmem:[#allocation2 + $0x218] sm:$0xf] %v3587_v2 }
 0x31c   :  { %v1189_v26 = vpop.f32.mrf.mxu1  ;;  %1667 = vrot.lane.b32.xlu1 %v3587_v2, %s2409_s21  ;;  %1323 = vrot.lane.b32.xlu2 %v3573_v0, %s2414_s28 }
 0x31d   :  { %v1190_v21 = vadd.f32 %v1189_v26, %v3171_v49  ;;  %1355 = vrot.lane.b32.xlu0 %v3573_v0, %s2412_s26 }
 0x31f   :  { %2403 = vtanh.f32 %v1190_v21  ;;  %v1230_v21 = vsub.f32 1.0, %v2519_v10 }
 0x324   :  { %1611 = vrot.lane.b32.xlu1 %v3587_v2, %s2410_s22  ;;  %1439 = vrot.lane.b32.xlu2 %v3573_v0, %s2409_s21  ;;  %v1191_v22 = vpop.f32.mrf.mxu1 }
 0x325   :  { %v3612_v35 = vpop.eup %2403  ;;  %1551 = vrot.lane.b32.xlu0 %v3587_v2, %s2414_s28  ;;  %v1888_v22 = vsel %vm1884_vm8, %v1876_v1, 0.0 }
 0x326   :  { %v2310_v52 = vrot.slane %v3612_v35, 4  ;;  %1352 = vst [vmem:[#allocation2 + $0x298] sm:$0xf] %v3612_v35  ;;  %v1232_v36 = vmul.f32 %v3612_v35, %v1228_v30 }
 0x327   :  { %1892 = vst [vmem:[#allocation2 + $0x220] sm:$0xf] %v1888_v22 }
 0x328   :  { %2314 = vst [vmem:[%s4573_s10 + $0x8] sm:$0xf0] %v2310_v52  ;;  %v3632_v63 = vadd.f32 %v1232_v36, %v1224_v33  ;;  %v1202_v56 = vpop.f32.mrf.mxu2  ;;  %v1226_v33 = vmul.f32 %v2519_v10, %v2500_v6  ;;  %v1826_v36 = vld [vmem:[%s4568_s3 + $0x238] sm:$0xf] }
 0x329   :  { %v1215_v57 = vpop.f32.mrf.mxu3  ;;  %v1203_v47 = vadd.f32 %v1202_v56, %v3171_v49  ;;  %v1765_v56 = vld [vmem:[%s4568_s3 + $0x110] sm:$0xf] }
 0x32a   :  { %v1216_v62 = vadd.f32 %v1215_v57, %v3171_v49  ;;  %1580 = vst [vmem:[#allocation2 + $0x260] sm:$0xf] %v3632_v63  ;;  %v1852_v49 = vld [vmem:[%s4568_s3 + $0x288] sm:$0xf]  ;;  %v1766_v57 = vld [vmem:[%s4568_s3 + $0x118] sm:$0xf] }
 0x32b   :  { %2405 = vtanh.f32 %v1203_v47  ;;  %vm1856_vm15 = vcmp.eq.f32.partialorder %v1852_v49, 1.0  ;;  %vm1769_vm2 = vcmp.eq.f32.partialorder %v1765_v56, 1.0  ;;  %v1759_v47 = vsel %vm223_vm11, %v1756_v19, %v3742_v15 }
 0x32c   :  { %1639 = vrot.lane.b32.xlu1 %v3587_v2, %s2411_s1  ;;  %1383 = vrot.lane.b32.xlu2 %v3573_v0, %s2410_s22  ;;  %2407 = vtanh.f32 %v1216_v62  ;;  %v1860_v25 = vsel %vm1856_vm15, %v1848_v38, 0.0  ;;  %vm1830_vm15 = vcmp.eq.f32.partialorder %v1826_v36, 1.0  ;;  %v1794_v38 = vld [vmem:[%s4568_s3 + $0x178] sm:$0xf]  ;;  %v1308_v36 = vld [vmem:[%s4568_s3 + $0xc8] sm:$0xf] }
 0x32d   :  { %1495 = vrot.lane.b32.xlu0 %v3587_v2, %s2416_s15  ;;  %1864 = vst [vmem:[#allocation2 + $0x328] sm:$0xf] %v1860_v25  ;;  %vm1798_vm8 = vcmp.eq.f32.partialorder %v1794_v38, 1.0 }
 0x330   :  { %v1204_v23 = vpop.f32.mrf.mxu2 }
 0x331   :  { %v1217_v13 = vpop.f32.mrf.mxu3  ;;  %v3680_v61 = vpop.eup %2405 }
 0x332   :  { %v3682_v4 = vpop.eup %2407  ;;  %v2326_v48 = vrot.slane %v3680_v61, 4  ;;  %1353 = vst [vmem:[#allocation2 + $0x280] sm:$0xf] %v3680_v61  ;;  %v1233_v54 = vmul.f32 %v3680_v61, %v1229_v27  ;;  %v1252_v27 = vld [vmem:[%s4568_s3 + $0x8] sm:$0xf] }
 0x333   :  { %v2327_v7 = vrot.slane %v3682_v4, 4  ;;  %1354 = vst [vmem:[#allocation2 + $0x148] sm:$0xf] %v3682_v4  ;;  %v1234_v52 = vmul.f32 %v3682_v4, %v1230_v21  ;;  %v1280_v21 = vld [vmem:[%s4568_s3 + $0x68] sm:$0xf] }
 0x334   :  { %1269 = vrot.lane.b32.xlu1 %v3612_v35, %s2416_s15  ;;  %1411 = vrot.lane.b32.xlu2 %v3573_v0, %s2411_s1  ;;  %2372 = vst [vmem:[%s4573_s10 + $0x10] sm:$0xf0] %v2326_v48  ;;  %v1874_v0 = vpop.permute.xlu0 %1873 }
 0x335   :  { %1241 = vrot.lane.b32.xlu0 %v3612_v35, %s2415_s14  ;;  %2373 = vst [vmem:[%s4573_s10 + $0x18] sm:$0xf0] %v2327_v7  ;;  %v1875_v8 = vsel %vm343_vm6, %v3597_v50, %v1874_v0  ;;  %v1878_v26 = vsel %vm343_vm6, %v1874_v0, %v3519_v16  ;;  %v1225_v50 = vmul.f32 %v2525_v11, %v2498_v5  ;;  %v1825_v16 = vld [vmem:[%s4568_s3 + $0x230] sm:$0xf] }
 0x336   :  { %v1889_v28 = vsel %vm1885_vm4, %v1875_v8, 0.0  ;;  %v1890_v30 = vsel %vm1886_vm7, %v1878_v26, 0.0  ;;  %v3724_v3 = vadd.f32 %v1234_v52, %v1226_v33  ;;  %vm1829_vm12 = vcmp.eq.f32.partialorder %v1825_v16, 1.0  ;;  %v1367_v16 = vld [vmem:[%s4568_s3 + $0x1e0] sm:$0xf] }
 0x337   :  { %1893 = vst [vmem:[#allocation2 + $0x200] sm:$0xf] %v1889_v28  ;;  %v3726_v6 = vadd.f32 %v1233_v54, %v1225_v50  ;;  %vm1770_vm4 = vcmp.eq.f32.partialorder %v1766_v57, 1.0  ;;  %vm1797_vm7 = vcmp.eq.f32.partialorder %v1793_v39, 1.0 }
 0x338   :  { %1894 = vst [vmem:[#allocation2 + $0x18] sm:$0xf] %v1890_v30  ;;  %v1774_v59 = vsel %vm1770_vm4, %v1759_v47, 0.0  ;;  %vm1256_vm4 = vcmp.eq.f32.partialorder %v1252_v27, 1.0 }
 0x339   :  { %1582 = vst [vmem:[#allocation2 + $0xa0] sm:$0xf] %v3724_v3 }
 0x33a   :  { %1581 = vst [vmem:[#allocation2 + $0x140] sm:$0xf] %v3726_v6 }
 0x33b   :  { %1778 = vst [vmem:[#allocation2 + $0x1b0] sm:$0xf] %v1774_v59  ;;  %v1451_v59 = vld [vmem:[%s4568_s3 + $0x300] sm:$0xf] }
 0x33c   :  { %1357 = vrot.lane.b32.xlu1 %v3612_v35, %s2412_s26  ;;  %1583 = vrot.lane.b32.xlu2 %v3587_v2, %s2412_s26  ;;  %v1818_v5 = vpop.permute.xlu0 %1817 }
 0x33d   :  { %1325 = vrot.lane.b32.xlu0 %v3612_v35, %s2414_s28  ;;  %v1819_v10 = vsel %vm285_vm10, %v3627_v53, %v1818_v5  ;;  %v1822_v11 = vsel %vm285_vm10, %v1818_v5, %v3616_v32  ;;  %v1336_v5 = vld [vmem:[%s4568_s3 + $0x128] sm:$0xf] }
 0x33e   :  { %v1833_v9 = vsel %vm1829_vm12, %v1819_v10, 0.0  ;;  %v1834_v37 = vsel %vm1830_vm15, %v1822_v11, 0.0  ;;  %vm1827_vm12 = vcmp.eq.f32.partialorder %v1823_v42, 1.0  ;;  %vm1828_vm15 = vcmp.eq.f32.partialorder %v1824_v45, 1.0  ;;  %v1536_v45 = vld [vmem:[%s4568_s3 + $0xe8] sm:$0xf] }
 0x33f   :  { %1837 = vst [vmem:[#allocation2 + $0xd8] sm:$0xf] %v1833_v9 }
 0x340   :  { %1838 = vst [vmem:[#allocation2 + $0x250] sm:$0xf] %v1834_v37 }
 0x344   :  { %1669 = vrot.lane.b32.xlu1 %v3632_v63, %s2409_s21  ;;  %1523 = vrot.lane.b32.xlu2 %v3587_v2, %s2413_s27  ;;  %v3756_v40 = vpop.permute.xlu0 %1753 }
 0x345   :  { %1413 = vrot.lane.b32.xlu0 %v3612_v35, %s2411_s1  ;;  %v1760_v62 = vsel %vm223_vm11, %v3756_v40, %v1756_v19 }
 0x346   :  { %v1773_v49 = vsel %vm1769_vm2, %v1760_v62, 0.0  ;;  %vm1284_vm2 = vcmp.eq.f32.partialorder %v1280_v21, 1.0  ;;  %v1679_v62 = vld [vmem:[%s4568_s3 + $0x320] sm:$0xf] }
 0x347   :  { %1777 = vst [vmem:[#allocation2 + $0x300] sm:$0xf] %v1773_v49  ;;  %v1423_v49 = vld [vmem:[%s4568_s3 + $0x2a0] sm:$0xf] }
 0x34c   :  { %1525 = vrot.lane.b32.xlu1 %v3632_v63, %s2413_s27  ;;  %1467 = vrot.lane.b32.xlu2 %v3587_v2, %s2415_s14  ;;  %v3778_v20 = vpop.permute.xlu0 %1781  ;;  %v1787_v2 = vsel %vm252_vm14, %v1784_v34, %v3770_v46 }
 0x34d   :  { %1641 = vrot.lane.b32.xlu0 %v3632_v63, %s2411_s1  ;;  %v1788_v12 = vsel %vm252_vm14, %v3778_v20, %v1784_v34  ;;  %v1802_v25 = vsel %vm1798_vm8, %v1787_v2, 0.0  ;;  %vm1312_vm8 = vcmp.eq.f32.partialorder %v1308_v36, 1.0  ;;  %v1564_v36 = vld [vmem:[%s4568_s3 + $0x148] sm:$0xf] }
 0x34e   :  { %v1801_v41 = vsel %vm1797_vm7, %v1788_v12, 0.0  ;;  %1806 = vst [vmem:[#allocation2 + $0x60] sm:$0xf] %v1802_v25  ;;  %vm1371_vm7 = vcmp.eq.f32.partialorder %v1367_v16, 1.0 }
 0x34f   :  { %1805 = vst [vmem:[#allocation2 + $0xc0] sm:$0xf] %v1801_v41 }
 0x354   :  { %1553 = vrot.lane.b32.xlu1 %v3632_v63, %s2414_s28  ;;  %1297 = vrot.lane.b32.xlu2 %v3612_v35, %s2413_s27  ;;  %v1814_v51 = vpop.permute.xlu0 %1813 }
 0x355   :  { %1273 = vrot.lane.b32.xlu0 %v3682_v4, %s2416_s15  ;;  %v1820_v55 = vsel %vm285_vm10, %v1814_v51, %v3627_v53  ;;  %v1821_v17 = vsel %vm285_vm10, %v3616_v32, %v1814_v51  ;;  %v3836_v53 = vpop.permute.xlu1 %1697  ;;  %v1395_v51 = vld [vmem:[%s4568_s3 + $0x240] sm:$0xf] }
 0x356   :  { %v1831_v18 = vsel %vm1827_vm12, %v1821_v17, 0.0  ;;  %v1832_v13 = vsel %vm1828_vm15, %v1820_v55, 0.0  ;;  %vm1340_vm12 = vcmp.eq.f32.partialorder %v1336_v5, 1.0  ;;  %vm1683_vm15 = vcmp.eq.f32.partialorder %v1679_v62, 1.0  ;;  %v1651_v55 = vld [vmem:[%s4568_s3 + $0x2c0] sm:$0xf] }
 0x357   :  { %1835 = vst [vmem:[#allocation2 + $0x2c8] sm:$0xf] %v1831_v18  ;;  %v1623_v5 = vld [vmem:[%s4568_s3 + $0x260] sm:$0xf] }
 0x358   :  { %1836 = vst [vmem:[#allocation2 + $0x2c0] sm:$0xf] %v1832_v13 }
 0x35c   :  { %1585 = vrot.lane.b32.xlu1 %v3632_v63, %s2412_s26  ;;  %1441 = vrot.lane.b32.xlu2 %v3612_v35, %s2409_s21 }
 0x35d   :  { %1299 = vrot.lane.b32.xlu0 %v3680_v61, %s2413_s27 }
 0x364   :  { %1243 = vrot.lane.b32.xlu1 %v3680_v61, %s2415_s14  ;;  %1385 = vrot.lane.b32.xlu2 %v3612_v35, %s2410_s22 }
 0x365   :  { %1443 = vrot.lane.b32.xlu0 %v3680_v61, %s2409_s21 }
 0x36c   :  { %1301 = vrot.lane.b32.xlu1 %v3682_v4, %s2413_s27  ;;  %1613 = vrot.lane.b32.xlu2 %v3632_v63, %s2410_s22 }
 0x36d   :  { %1387 = vrot.lane.b32.xlu0 %v3680_v61, %s2410_s22 }
 0x36e   :  { %v3822_v32 = vpop.permute.xlu2 %1239 }
 0x374   :  { %1327 = vrot.lane.b32.xlu1 %v3680_v61, %s2414_s28  ;;  %1469 = vrot.lane.b32.xlu2 %v3632_v63, %s2415_s14 }
 0x375   :  { %1415 = vrot.lane.b32.xlu0 %v3680_v61, %s2411_s1 }
 0x376   :  { %v3830_v35 = vpop.permute.xlu2 %1323 }
 0x37c   :  { %1445 = vrot.lane.b32.xlu1 %v3682_v4, %s2409_s21  ;;  %1497 = vrot.lane.b32.xlu2 %v3632_v63, %s2416_s15 }
 0x37d   :  { %1359 = vrot.lane.b32.xlu0 %v3680_v61, %s2412_s26 }
 0x37e   :  { %v3840_v23 = vpop.permute.xlu2 %1439 }
 0x384   :  { %1389 = vrot.lane.b32.xlu1 %v3682_v4, %s2410_s22  ;;  %1245 = vrot.lane.b32.xlu2 %v3682_v4, %s2415_s14 }
 0x385   :  { %1673 = vrot.lane.b32.xlu0 %v3724_v3, %s2409_s21 }
 0x386   :  { %v3848_v24 = vpop.permute.xlu1 %1295  ;;  %v3850_v44 = vpop.permute.xlu2 %1383 }
 0x387   :  { %v3852_v63 = vpop.permute.xlu0 %1267 }
 0x38c   :  { %1417 = vrot.lane.b32.xlu1 %v3682_v4, %s2411_s1  ;;  %1271 = vrot.lane.b32.xlu2 %v3680_v61, %s2416_s15 }
 0x38d   :  { %1617 = vrot.lane.b32.xlu0 %v3724_v3, %s2410_s22 }
 0x38e   :  { %v3860_v48 = vpop.permute.xlu1 %1667  ;;  %v3862_v7 = vpop.permute.xlu2 %1411 }
 0x38f   :  { %v3864_v1 = vpop.permute.xlu0 %1355 }
 0x394   :  { %1361 = vrot.lane.b32.xlu1 %v3682_v4, %s2412_s26  ;;  %1329 = vrot.lane.b32.xlu2 %v3682_v4, %s2414_s28 }
 0x395   :  { %1645 = vrot.lane.b32.xlu0 %v3724_v3, %s2411_s1 }
 0x396   :  { %v3872_v29 = vpop.permute.xlu1 %1611  ;;  %v3874_v61 = vpop.permute.xlu2 %1583 }
 0x397   :  { %v3876_v0 = vpop.permute.xlu0 %1551 }
 0x39c   :  { %1589 = vrot.lane.b32.xlu1 %v3724_v3, %s2412_s26  ;;  %1671 = vrot.lane.b32.xlu2 %v3726_v6, %s2409_s21 }
 0x39d   :  { %1587 = vrot.lane.b32.xlu0 %v3726_v6, %s2412_s26 }
 0x39e   :  { %v3884_v8 = vpop.permute.xlu1 %1639  ;;  %v3886_v4 = vpop.permute.xlu2 %1523 }
 0x39f   :  { %v3888_v26 = vpop.permute.xlu0 %1495 }
 0x3a4   :  { %1473 = vrot.lane.b32.xlu1 %v3724_v3, %s2415_s14  ;;  %1615 = vrot.lane.b32.xlu2 %v3726_v6, %s2410_s22 }
 0x3a5   :  { %1529 = vrot.lane.b32.xlu0 %v3724_v3, %s2413_s27 }
 0x3a6   :  { %v3902_v28 = vpop.permute.xlu1 %1269  ;;  %v3904_v30 = vpop.permute.xlu2 %1467 }
 0x3a7   :  { %v1277_v22 = vsel %vm194_vm13, %v3852_v63, %v3902_v28  ;;  %v3910_v33 = vpop.permute.xlu0 %1241 }
 0x3a8   :  { %v1288_v52 = vsel %vm1284_vm2, %v1277_v22, 0.0  ;;  %v1249_v50 = vsel %vm165_vm5, %v3822_v32, %v3910_v33  ;;  %vm1455_vm2 = vcmp.eq.f32.partialorder %v1451_v59, 1.0 }
 0x3a9   :  { %1292 = vst [vmem:[#allocation2 + $0x1e0] sm:$0xf] %v1288_v52  ;;  %v1260_v54 = vsel %vm1256_vm4, %v1249_v50, 0.0  ;;  %vm1427_vm4 = vcmp.eq.f32.partialorder %v1423_v49, 1.0 }
 0x3aa   :  { %1264 = vst [vmem:[#allocation2 + $0x1c8] sm:$0xf] %v1260_v54 }
 0x3ac   :  { %1501 = vrot.lane.b32.xlu1 %v3724_v3, %s2416_s15  ;;  %1643 = vrot.lane.b32.xlu2 %v3726_v6, %s2411_s1 }
 0x3ad   :  { %1557 = vrot.lane.b32.xlu0 %v3724_v3, %s2414_s28 }
 0x3ae   :  { %v3931_v10 = vpop.permute.xlu1 %1357  ;;  %v3933_v11 = vpop.permute.xlu2 %1297 }
 0x3af   :  { %v1365_v9 = vsel %vm285_vm10, %v3864_v1, %v3931_v10  ;;  %v1305_v37 = vsel %vm223_vm11, %v3848_v24, %v3933_v11  ;;  %v3943_v56 = vpop.permute.xlu0 %1325 }
 0x3b0   :  { %v1375_v3 = vsel %vm1371_vm7, %v1365_v9, 0.0  ;;  %v1316_v57 = vsel %vm1312_vm8, %v1305_v37, 0.0  ;;  %v1333_v19 = vsel %vm252_vm14, %v3830_v35, %v3943_v56  ;;  %vm1540_vm7 = vcmp.eq.f32.partialorder %v1536_v45, 1.0  ;;  %v1279_v9 = vld [vmem:[%s4568_s3 + $0x60] sm:$0xf] }
 0x3b1   :  { %1379 = vst [vmem:[#allocation2 + $0x340] sm:$0xf] %v1375_v3  ;;  %v1344_v47 = vsel %vm1340_vm12, %v1333_v19, 0.0  ;;  %vm1399_vm8 = vcmp.eq.f32.partialorder %v1395_v51, 1.0  ;;  %vm1655_vm12 = vcmp.eq.f32.partialorder %v1651_v55, 1.0  ;;  %v1971_v55 = vld [vmem:[#allocation2 + $0x80] sm:$0xff] }
 0x3b2   :  { %1320 = vst [vmem:[#allocation2 + $0xa8] sm:$0xf] %v1316_v57  ;;  %v1480_v45 = vld [vmem:[%s4568_s3 + $0x28] sm:$0xf]  ;;  %v1309_v51 = vld [vmem:[%s4568_s3 + $0xd0] sm:$0xf] }
 0x3b3   :  { %1348 = vst [vmem:[#allocation2 + $0x2b0] sm:$0xf] %v1344_v47 }
 0x3b4   :  { %1725 = vrot.lane.b32.xlu1 %v3143_v43, %s2416_s15  ;;  %1527 = vrot.lane.b32.xlu2 %v3726_v6, %s2413_s27 }
 0x3b5   :  { %1471 = vrot.lane.b32.xlu0 %v3726_v6, %s2415_s14 }
 0x3b6   :  { %v3964_v39 = vpop.permute.xlu1 %1669  ;;  %v3966_v38 = vpop.permute.xlu2 %1441 }
 0x3b7   :  { %v1677_v34 = vsel %vm372_vm1, %v3860_v48, %v3964_v39  ;;  %v1449_v43 = vsel %vm372_vm1, %v3840_v23, %v3966_v38  ;;  %v3976_v2 = vpop.permute.xlu0 %1413 }
 0x3b8   :  { %v1687_v12 = vsel %vm1683_vm15, %v1677_v34, 0.0  ;;  %v1459_v25 = vsel %vm1455_vm2, %v1449_v43, 0.0  ;;  %v1421_v41 = vsel %vm343_vm6, %v3862_v7, %v3976_v2  ;;  %vm1568_vm15 = vcmp.eq.f32.partialorder %v1564_v36, 1.0  ;;  %v1253_v36 = vld [vmem:[%s4568_s3 + $0x10] sm:$0xf] }
 0x3b9   :  { %1691 = vst [vmem:[#allocation2 + $0xf0] sm:$0xf] %v1687_v12  ;;  %v1431_v42 = vsel %vm1427_vm4, %v1421_v41, 0.0  ;;  %vm1627_vm2 = vcmp.eq.f32.partialorder %v1623_v5, 1.0  ;;  %vm1283_vm4 = vcmp.eq.f32.partialorder %v1279_v9, 1.0 }
 0x3ba   :  { %1463 = vst [vmem:[#allocation2 + $0x2f0] sm:$0xf] %v1459_v25  ;;  %v1508_v5 = vld [vmem:[%s4568_s3 + $0x88] sm:$0xf] }
 0x3bb   :  { %1435 = vst [vmem:[#allocation2 + $0x1f0] sm:$0xf] %v1431_v42  ;;  %v1595_v42 = vld [vmem:[%s4568_s3 + $0x200] sm:$0xf]  ;;  %v1452_v9 = vld [vmem:[%s4568_s3 + $0x308] sm:$0xf] }
 0x3bc   :  { %1751 = vrot.lane.b32.xlu1 %v3106_v58, %s2413_s27  ;;  %1555 = vrot.lane.b32.xlu2 %v3726_v6, %s2414_s28 }
 0x3bd   :  { %1499 = vrot.lane.b32.xlu0 %v3726_v6, %s2416_s15 }
 0x3be   :  { %v3997_v17 = vpop.permute.xlu1 %1525  ;;  %v3999_v18 = vpop.permute.xlu2 %1385 }
 0x3bf   :  { %v1533_v13 = vsel %vm223_vm11, %v3886_v4, %v3997_v17  ;;  %v1393_v21 = vsel %vm314_vm3, %v3850_v44, %v3999_v18  ;;  %v4009_v27 = vpop.permute.xlu0 %1641 }
 0x3c0   :  { %v1544_v6 = vsel %vm1540_vm7, %v1533_v13, 0.0  ;;  %v1403_v22 = vsel %vm1399_vm8, %v1393_v21, 0.0  ;;  %v1649_v52 = vsel %vm343_vm6, %v3884_v8, %v4009_v27  ;;  %vm1599_vm7 = vcmp.eq.f32.partialorder %v1595_v42, 1.0 }
 0x3c1   :  { %1548 = vst [vmem:[#allocation2 + $0x268] sm:$0xf] %v1544_v6  ;;  %v1659_v50 = vsel %vm1655_vm12, %v1649_v52, 0.0  ;;  %v2019_v54 = vld [vmem:[#allocation2 + $0x2f0] sm:$0xff]  ;;  %vm1484_vm8 = vcmp.eq.f32.partialorder %v1480_v45, 1.0  ;;  %vm1313_vm12 = vcmp.eq.f32.partialorder %v1309_v51, 1.0 }
 0x3c2   :  { %1407 = vst [vmem:[#allocation2 + $0x168] sm:$0xf] %v1403_v22  ;;  %v2079_v16 = vpack.c.bf16 %v2019_v54, %v2019_v54  ;;  %v2007_v25 = vld [vmem:[#allocation2 + $0x1f0] sm:$0xff] }
 0x3c3   :  { %1663 = vst [vmem:[#allocation2 + $0x70] sm:$0xf] %v1659_v50 }
 0x3c4   :  { %1723 = vrot.lane.b32.xlu1 %v3106_v58, %s2416_s15  ;;  %1699 = vrot.lane.b32.xlu2 %v3490_v60, %s2415_s14  ;;  %v2102_v37 = vsel %vm792_vm9, %v2079_v16, 0 }
 0x3c5   :  { %2140 = vmatpush.bf16.msra.mxu0 %v2102_v37  ;;  %1701 = vrot.lane.b32.xlu0 %v3157_v31, %s2415_s14 }
 0x3c6   :  { %v4031_v3 = vpop.permute.xlu1 %1553  ;;  %v4033_v57 = vpop.permute.xlu2 %1613 }
 0x3c7   :  { %v1561_v19 = vsel %vm252_vm14, %v3876_v0, %v4031_v3  ;;  %v1621_v47 = vsel %vm314_vm3, %v3872_v29, %v4033_v57  ;;  %v4043_v62 = vpop.permute.xlu0 %1273 }
 0x3c8   :  { %v1572_v59 = vsel %vm1568_vm15, %v1561_v19, 0.0  ;;  %v1631_v49 = vsel %vm1627_vm2, %v1621_v47, 0.0  ;;  %v1278_v34 = vsel %vm194_vm13, %v4043_v62, %v3852_v63  ;;  %v1983_v63 = vld [vmem:[#allocation2 + $0x340] sm:$0xff]  ;;  %vm1257_vm15 = vcmp.eq.f32.partialorder %v1253_v36, 1.0 }
 0x3c9   :  { %1576 = vst [vmem:[#allocation2 + $0x10] sm:$0xf] %v1572_v59  ;;  %v1287_v43 = vsel %vm1283_vm4, %v1278_v34, 0.0  ;;  %v1995_v12 = vld [vmem:[#allocation2 + $0x168] sm:$0xff]  ;;  %v2055_v6 = vpack.c.bf16 %v1983_v63, %v1971_v55  ;;  %vm1512_vm2 = vcmp.eq.f32.partialorder %v1508_v5, 1.0  ;;  %vm1456_vm4 = vcmp.eq.f32.partialorder %v1452_v9, 1.0 }
 0x3ca   :  { %1635 = vst [vmem:[#allocation2 + $0x138] sm:$0xf] %v1631_v49  ;;  %v2067_v41 = vpack.c.bf16 %v2007_v25, %v1995_v12  ;;  %v1310_v12 = vld [vmem:[%s4568_s3 + $0xd8] sm:$0xf]  ;;  %v1251_v25 = vld [vmem:[%s4568_s3] sm:$0xf] }
 0x3cb   :  { %1291 = vst [vmem:[#allocation2 + $0x158] sm:$0xf] %v1287_v43  ;;  %v1282_v5 = vld [vmem:[%s4568_s3 + $0x78] sm:$0xf] }
 0x3cc   :  { %2141 = vmatpush.bf16.msra.mxu0 %v2067_v41  ;;  %1727 = vrot.lane.b32.xlu2 %v3490_v60, %s2416_s15  ;;  %v1396_v41 = vld [vmem:[%s4568_s3 + $0x248] sm:$0xf] }
 0x3cd   :  { %1729 = vrot.lane.b32.xlu0 %v3157_v31, %s2416_s15 }
 0x3ce   :  { %v4062_v13 = vpop.permute.xlu1 %1585  ;;  %v4064_v21 = vpop.permute.xlu2 %1469 }
 0x3cf   :  { %v1593_v22 = vsel %vm285_vm10, %v3874_v61, %v4062_v13  ;;  %v1477_v60 = vsel %vm165_vm5, %v3904_v30, %v4064_v21  ;;  %v1300_v31 = vpop.permute.xlu0 %1299 }
 0x3d0   :  { %v1603_v52 = vsel %vm1599_vm7, %v1593_v22, 0.0  ;;  %v1488_v50 = vsel %vm1484_vm8, %v1477_v60, 0.0  ;;  %v1304_v54 = vsel %vm223_vm11, %v3933_v11, %v1300_v31  ;;  %2142 = vmatpush.bf16.msra.mxu0 %v2055_v6  ;;  %vm1314_vm8 = vcmp.eq.f32.partialorder %v1310_v12, 1.0 }
 0x3d1   :  { %1607 = vst [vmem:[#allocation2 + $0x288] sm:$0xf] %v1603_v52  ;;  %v1317_v16 = vsel %vm1313_vm12, %v1304_v54, 0.0  ;;  %vm1255_vm12 = vcmp.eq.f32.partialorder %v1251_v25, 1.0 }
 0x3d2   :  { %1492 = vst [vmem:[#allocation2 + $0x150] sm:$0xf] %v1488_v50 }
 0x3d3   :  { %1321 = vst [vmem:[#allocation2 + $0x90] sm:$0xf] %v1317_v16 }
 0x3d4   :  { %1779 = vrot.lane.b32.xlu2 %v3106_v58, %s2414_s28 }
 0x3d5   :  { %1695 = vrot.lane.b32.xlu0 %v3106_v58, %s2415_s14 }
 0x3d6   :  { %v1244_v11 = vpop.permute.xlu1 %1243  ;;  %v4090_v37 = vpop.permute.xlu2 %1497 }
 0x3d7   :  { %v1248_v19 = vsel %vm165_vm5, %v3910_v33, %v1244_v11  ;;  %v1505_v47 = vsel %vm194_vm13, %v3888_v26, %v4090_v37  ;;  %v4099_v59 = vpop.permute.xlu0 %1443  ;;  %v1307_v33 = vld [vmem:[%s4568_s3 + $0xc0] sm:$0xf] }
 0x3d8   :  { %v1261_v49 = vsel %vm1257_vm15, %v1248_v19, 0.0  ;;  %v1516_v34 = vsel %vm1512_vm2, %v1505_v47, 0.0  ;;  %v1448_v58 = vsel %vm372_vm1, %v3966_v38, %v4099_v59  ;;  %v1254_v38 = vld [vmem:[%s4568_s3 + $0x18] sm:$0xf]  ;;  %vm1311_vm7 = vcmp.eq.f32.partialorder %v1307_v33, 1.0 }
 0x3d9   :  { %1265 = vst [vmem:[#allocation2 + $0x1b8] sm:$0xf] %v1261_v49  ;;  %v1460_v43 = vsel %vm1456_vm4, %v1448_v58, 0.0  ;;  %vm1258_vm15 = vcmp.eq.f32.partialorder %v1254_v38, 1.0  ;;  %vm1400_vm2 = vcmp.eq.f32.partialorder %v1396_v41, 1.0 }
 0x3da   :  { %1520 = vst [vmem:[#allocation2 + $0x248] sm:$0xf] %v1516_v34  ;;  %v1335_v41 = vld [vmem:[%s4568_s3 + $0x120] sm:$0xf] }
 0x3db   :  { %1464 = vst [vmem:[#allocation2 + $0x358] sm:$0xf] %v1460_v43 }
 0x3de   :  { %v1302_v42 = vpop.permute.xlu1 %1301  ;;  %v1246_v45 = vpop.permute.xlu2 %1245 }
 0x3df   :  { %v1303_v51 = vsel %vm223_vm11, %v1300_v31, %v1302_v42  ;;  %v1306_v63 = vsel %vm223_vm11, %v1302_v42, %v3848_v24  ;;  %v1247_v55 = vsel %vm165_vm5, %v1244_v11, %v1246_v45  ;;  %v1250_v6 = vsel %vm165_vm5, %v1246_v45, %v3822_v32  ;;  %v4130_v22 = vpop.permute.xlu0 %1387  ;;  %v1337_v31 = vld [vmem:[%s4568_s3 + $0x130] sm:$0xf]  ;;  %v1424_v11 = vld [vmem:[%s4568_s3 + $0x2a8] sm:$0xf] }
 0x3e0   :  { %v1315_v60 = vsel %vm1311_vm7, %v1306_v63, 0.0  ;;  %v1318_v52 = vsel %vm1314_vm8, %v1303_v51, 0.0  ;;  %v1259_v50 = vsel %vm1255_vm12, %v1250_v6, 0.0  ;;  %v1262_v54 = vsel %vm1258_vm15, %v1247_v55, 0.0  ;;  %v1281_v32 = vld [vmem:[%s4568_s3 + $0x70] sm:$0xf] }
 0x3e1   :  { %1319 = vst [vmem:[#allocation2 + $0xb0] sm:$0xf] %v1315_v60  ;;  %v1392_v24 = vsel %vm314_vm3, %v3999_v18, %v4130_v22  ;;  %vm1341_vm4 = vcmp.eq.f32.partialorder %v1337_v31, 1.0  ;;  %vm1285_vm7 = vcmp.eq.f32.partialorder %v1281_v32, 1.0  ;;  %vm1286_vm8 = vcmp.eq.f32.partialorder %v1282_v5, 1.0 }
 0x3e2   :  { %1322 = vst [vmem:[#allocation2 + $0x50] sm:$0xf] %v1318_v52  ;;  %v1404_v16 = vsel %vm1400_vm2, %v1392_v24, 0.0  ;;  %v2020_v36 = vld [vmem:[#allocation2 + $0x358] sm:$0xff]  ;;  %vm1428_vm12 = vcmp.eq.f32.partialorder %v1424_v11, 1.0 }
 0x3e3   :  { %1263 = vst [vmem:[#allocation2 + $0x1a8] sm:$0xf] %v1259_v50  ;;  %v2080_v9 = vpack.c.bf16 %v2020_v36, %v2020_v36  ;;  %v1368_v42 = vld [vmem:[%s4568_s3 + $0x1e8] sm:$0xf] }
 0x3e4   :  { %1266 = vst [vmem:[#allocation2 + $0xf8] sm:$0xf] %v1262_v54 }
 0x3e5   :  { %1408 = vst [vmem:[#allocation2] sm:$0xf] %v1404_v16  ;;  %v2105_v18 = vsel %vm792_vm9, %v2080_v9, 0  ;;  %v1680_v16 = vld [vmem:[%s4568_s3 + $0x328] sm:$0xf] }
 0x3e6   :  { %2153 = vmatpush.bf16.msra.mxu1 %v2105_v18  ;;  %v1328_v19 = vpop.permute.xlu1 %1327  ;;  %v1272_v47 = vpop.permute.xlu2 %1271  ;;  %v1681_v9 = vld [vmem:[%s4568_s3 + $0x330] sm:$0xf] }
 0x3e7   :  { %v1332_v49 = vsel %vm252_vm14, %v3943_v56, %v1328_v19  ;;  %v1275_v34 = vsel %vm194_vm13, %v1272_v47, %v4043_v62  ;;  %v1276_v58 = vsel %vm194_vm13, %v3902_v28, %v1272_v47  ;;  %v4158_v43 = vpop.permute.xlu0 %1415  ;;  %v1453_v62 = vld [vmem:[%s4568_s3 + $0x310] sm:$0xf]  ;;  %v1454_v28 = vld [vmem:[%s4568_s3 + $0x318] sm:$0xf] }
 0x3e8   :  { %v1345_v33 = vsel %vm1341_vm4, %v1332_v49, 0.0  ;;  %v1289_v12 = vsel %vm1285_vm7, %v1276_v58, 0.0  ;;  %v1290_v25 = vsel %vm1286_vm8, %v1275_v34, 0.0  ;;  %v1420_v38 = vsel %vm343_vm6, %v3976_v2, %v4158_v43  ;;  %v1338_v2 = vld [vmem:[%s4568_s3 + $0x138] sm:$0xf] }
 0x3e9   :  { %1349 = vst [vmem:[#allocation2 + $0x210] sm:$0xf] %v1345_v33  ;;  %v1432_v56 = vsel %vm1428_vm12, %v1420_v38, 0.0  ;;  %vm1457_vm15 = vcmp.eq.f32.partialorder %v1453_v62, 1.0  ;;  %vm1458_vm2 = vcmp.eq.f32.partialorder %v1454_v28, 1.0  ;;  %vm1339_vm4 = vcmp.eq.f32.partialorder %v1335_v41, 1.0 }
 0x3ea   :  { %1293 = vst [vmem:[#allocation2 + $0x2e8] sm:$0xf] %v1289_v12  ;;  %vm1342_vm7 = vcmp.eq.f32.partialorder %v1338_v2, 1.0  ;;  %vm1372_vm8 = vcmp.eq.f32.partialorder %v1368_v42, 1.0  ;;  %v2023_v33 = vld [vmem:[#allocation2 + $0xf0] sm:$0xff] }
 0x3eb   :  { %1294 = vst [vmem:[#allocation2 + $0x310] sm:$0xf] %v1290_v25 }
 0x3ec   :  { %1436 = vst [vmem:[#allocation2 + $0xe8] sm:$0xf] %v1432_v56  ;;  %v1996_v36 = vld [vmem:[#allocation2] sm:$0xff] }
 0x3ee   :  { %v1446_v45 = vpop.permute.xlu1 %1445  ;;  %v1330_v51 = vpop.permute.xlu2 %1329 }
 0x3ef   :  { %v1447_v63 = vsel %vm372_vm1, %v4099_v59, %v1446_v45  ;;  %v1450_v55 = vsel %vm372_vm1, %v1446_v45, %v3840_v23  ;;  %v1331_v6 = vsel %vm252_vm14, %v1328_v19, %v1330_v51  ;;  %v1334_v60 = vsel %vm252_vm14, %v1330_v51, %v3830_v35  ;;  %v4190_v52 = vpop.permute.xlu0 %1359  ;;  %v1397_v59 = vld [vmem:[%s4568_s3 + $0x250] sm:$0xf]  ;;  %v1398_v35 = vld [vmem:[%s4568_s3 + $0x258] sm:$0xf] }
 0x3f0   :  { %v1461_v50 = vsel %vm1457_vm15, %v1447_v63, 0.0  ;;  %v1462_v31 = vsel %vm1458_vm2, %v1450_v55, 0.0  ;;  %v1343_v54 = vsel %vm1339_vm4, %v1334_v60, 0.0  ;;  %v1346_v24 = vsel %vm1342_vm7, %v1331_v6, 0.0  ;;  %v1625_v45 = vld [vmem:[%s4568_s3 + $0x270] sm:$0xf] }
 0x3f1   :  { %1465 = vst [vmem:[#allocation2 + $0x1d0] sm:$0xf] %v1461_v50  ;;  %v1364_v23 = vsel %vm285_vm10, %v3931_v10, %v4190_v52  ;;  %v1682_v10 = vld [vmem:[%s4568_s3 + $0x338] sm:$0xf]  ;;  %vm1401_vm12 = vcmp.eq.f32.partialorder %v1397_v59, 1.0  ;;  %vm1402_vm15 = vcmp.eq.f32.partialorder %v1398_v35, 1.0  ;;  %v2083_v60 = vpack.c.bf16 %v2023_v33, %v2023_v33 }
 0x3f2   :  { %1466 = vst [vmem:[#allocation2 + $0x330] sm:$0xf] %v1462_v31  ;;  %v1376_v32 = vsel %vm1372_vm8, %v1364_v23, 0.0  ;;  %vm1684_vm2 = vcmp.eq.f32.partialorder %v1680_v16, 1.0  ;;  %vm1685_vm4 = vcmp.eq.f32.partialorder %v1681_v9, 1.0  ;;  %vm1686_vm7 = vcmp.eq.f32.partialorder %v1682_v10, 1.0 }
 0x3f3   :  { %1347 = vst [vmem:[#allocation2 + $0x240] sm:$0xf] %v1343_v54  ;;  %v2008_v5 = vld [vmem:[#allocation2 + $0xe8] sm:$0xff]  ;;  %v1947_v63 = vld [vmem:[#allocation2 + $0xb0] sm:$0xff]  ;;  %v1972_v54 = vld [vmem:[#allocation2 + $0x298] sm:$0xff] }
 0x3f4   :  { %1350 = vst [vmem:[#allocation2 + $0x308] sm:$0xf] %v1346_v24  ;;  %v2068_v11 = vpack.c.bf16 %v2008_v5, %v1996_v36  ;;  %v1923_v23 = vld [vmem:[#allocation2 + $0x1a8] sm:$0xff]  ;;  %v1935_v36 = vld [vmem:[#allocation2 + $0x158] sm:$0xff]  ;;  %v1960_v9 = vld [vmem:[#allocation2 + $0x2b0] sm:$0xff] }
 0x3f5   :  { %1380 = vst [vmem:[#allocation2 + $0x48] sm:$0xf] %v1376_v32  ;;  %v1948_v5 = vld [vmem:[#allocation2 + $0xa8] sm:$0xff] }
 0x3f6   :  { %2154 = vmatpush.bf16.msra.mxu1 %v2068_v11  ;;  %v1390_v18 = vpop.permute.xlu1 %1389  ;;  %v1672_v19 = vpop.permute.xlu2 %1671  ;;  %v2114_v11 = vsel %vm792_vm9, %v2083_v60, 0 }
 0x3f7   :  { %v1391_v47 = vsel %vm314_vm3, %v4130_v22, %v1390_v18  ;;  %v1394_v49 = vsel %vm314_vm3, %v1390_v18, %v3850_v44  ;;  %v1676_v34 = vsel %vm372_vm1, %v3964_v39, %v1672_v19  ;;  %v1674_v58 = vpop.permute.xlu0 %1673  ;;  %v1425_v22 = vld [vmem:[%s4568_s3 + $0x2b0] sm:$0xf]  ;;  %v1426_v44 = vld [vmem:[%s4568_s3 + $0x2b8] sm:$0xf]  ;;  %v1624_v39 = vld [vmem:[%s4568_s3 + $0x268] sm:$0xf] }
 0x3f8   :  { %v1405_v12 = vsel %vm1401_vm12, %v1391_v47, 0.0  ;;  %v1406_v25 = vsel %vm1402_vm15, %v1394_v49, 0.0  ;;  %v1688_v38 = vsel %vm1684_vm2, %v1676_v34, 0.0  ;;  %v1675_v56 = vsel %vm372_vm1, %v1672_v19, %v1674_v58  ;;  %v2021_v62 = vld [vmem:[#allocation2 + $0x1d0] sm:$0xff]  ;;  %v1924_v34 = vld [vmem:[#allocation2 + $0x1c8] sm:$0xff] }
 0x3f9   :  { %1409 = vst [vmem:[#allocation2 + $0x290] sm:$0xf] %v1405_v12  ;;  %v1678_v28 = vsel %vm372_vm1, %v1674_v58, %v3860_v48  ;;  %v1689_v41 = vsel %vm1685_vm4, %v1675_v56, 0.0  ;;  %v2081_v2 = vpack.c.bf16 %v2021_v62, %v2021_v62  ;;  %v2022_v42 = vld [vmem:[#allocation2 + $0x330] sm:$0xff]  ;;  %vm1429_vm1 = vcmp.eq.f32.partialorder %v1425_v22, 1.0  ;;  %v1999_v62 = vld [vmem:[#allocation2 + $0x138] sm:$0xff] }
 0x3fa   :  { %1410 = vst [vmem:[#allocation2 + $0x230] sm:$0xf] %v1406_v25  ;;  %v1690_v51 = vsel %vm1686_vm7, %v1678_v28, 0.0  ;;  %v1959_v55 = vld [vmem:[#allocation2 + $0x240] sm:$0xff]  ;;  %v2082_v6 = vpack.c.bf16 %v2022_v42, %v2022_v42  ;;  %v1626_v48 = vld [vmem:[%s4568_s3 + $0x278] sm:$0xf]  ;;  %v2031_v49 = vpack.c.bf16 %v1935_v36, %v1923_v23  ;;  %v2044_v56 = vpack.c.bf16 %v1960_v9, %v1948_v5 }
 0x3fb   :  { %1692 = vst [vmem:[#allocation2 + $0xb8] sm:$0xf] %v1688_v38  ;;  %v2043_v50 = vpack.c.bf16 %v1959_v55, %v1947_v63  ;;  %v2108_v31 = vsel %vm792_vm9, %v2081_v2, 0  ;;  %vm1430_vm8 = vcmp.eq.f32.partialorder %v1426_v44, 1.0  ;;  %vm1628_vm12 = vcmp.eq.f32.partialorder %v1624_v39, 1.0  ;;  %v1936_v25 = vld [vmem:[#allocation2 + $0x1e0] sm:$0xff] }
 0x3fc   :  { %1693 = vst [vmem:[#allocation2 + $0x338] sm:$0xf] %v1689_v41  ;;  %v1984_v59 = vld [vmem:[#allocation2 + $0x48] sm:$0xff]  ;;  %2166 = vmatpush.bf16.msra.mxu2 %v2108_v31  ;;  %v2111_v24 = vsel %vm792_vm9, %v2082_v6, 0  ;;  %vm1629_vm15 = vcmp.eq.f32.partialorder %v1625_v45, 1.0  ;;  %vm1630_vm2 = vcmp.eq.f32.partialorder %v1626_v48, 1.0  ;;  %v2032_v45 = vpack.c.bf16 %v1936_v25, %v1924_v34 }
 0x3fd   :  { %1694 = vst [vmem:[#allocation2 + $0x2b8] sm:$0xf] %v1690_v51  ;;  %2143 = vmatpush.bf16.msra.mxu0 %v2043_v50  ;;  %v2056_v35 = vpack.c.bf16 %v1984_v59, %v1972_v54  ;;  %2179 = vmatpush.bf16.msra.mxu3 %v2111_v24  ;;  %v1370_v22 = vld [vmem:[%s4568_s3 + $0x1f8] sm:$0xf]  ;;  %v1652_v28 = vld [vmem:[%s4568_s3 + $0x2c8] sm:$0xf] }
 0x3fe   :  { %v1418_v32 = vpop.permute.xlu1 %1417  ;;  %v1616_v16 = vpop.permute.xlu2 %1615  ;;  %v1653_v2 = vld [vmem:[%s4568_s3 + $0x2d0] sm:$0xf]  ;;  %v1654_v63 = vld [vmem:[%s4568_s3 + $0x2d8] sm:$0xf]  ;;  %v1975_v55 = vld [vmem:[#allocation2 + $0x218] sm:$0xff]  ;;  %vm1374_vm4 = vcmp.eq.f32.partialorder %v1370_v22, 1.0 }
 0x3ff   :  { %2155 = vmatpush.bf16.msra.mxu1 %v2056_v35  ;;  %v1419_v10 = vsel %vm343_vm6, %v4158_v43, %v1418_v32  ;;  %v1422_v18 = vsel %vm343_vm6, %v1418_v32, %v3862_v7  ;;  %v1620_v19 = vsel %vm314_vm3, %v4033_v57, %v1616_v16  ;;  %v1618_v47 = vpop.permute.xlu0 %1617  ;;  %v1369_v7 = vld [vmem:[%s4568_s3 + $0x1f0] sm:$0xf]  ;;  %vm1656_vm7 = vcmp.eq.f32.partialorder %v1652_v28, 1.0  ;;  %v4283_v48 = vld [vmem:[%s4575_s8] sm:$0xf] }
 0x400   :  { %v1433_v58 = vsel %vm1429_vm1, %v1419_v10, 0.0  ;;  %v1434_v33 = vsel %vm1430_vm8, %v1422_v18, 0.0  ;;  %v1632_v12 = vsel %vm1628_vm12, %v1620_v19, 0.0  ;;  %v1619_v43 = vsel %vm314_vm3, %v1616_v16, %v1618_v47  ;;  %v1987_v42 = vld [vmem:[#allocation2 + $0x288] sm:$0xff] }
 0x401   :  { %1437 = vst [vmem:[#allocation2 + $0xc8] sm:$0xf] %v1433_v58  ;;  %v1622_v57 = vsel %vm314_vm3, %v1618_v47, %v3872_v29  ;;  %v1633_v38 = vsel %vm1629_vm15, %v1619_v43, 0.0  ;;  %2144 = vmatpush.bf16.msra.mxu0 %v2031_v49  ;;  %v2011_v29 = vld [vmem:[#allocation2 + $0x70] sm:$0xff]  ;;  %vm1373_vm3 = vcmp.eq.f32.partialorder %v1369_v7, 1.0  ;;  %vm1657_vm1 = vcmp.eq.f32.partialorder %v1653_v2, 1.0 }
 0x402   :  { %1438 = vst [vmem:[#allocation2 + $0x228] sm:$0xf] %v1434_v33  ;;  %v1634_v44 = vsel %vm1630_vm2, %v1622_v57, 0.0  ;;  %v2024_v39 = vld [vmem:[#allocation2 + $0xb8] sm:$0xff]  ;;  %v2071_v51 = vpack.c.bf16 %v2011_v29, %v1999_v62  ;;  %v2059_v31 = vpack.c.bf16 %v1987_v42, %v1975_v55  ;;  %vm1658_vm8 = vcmp.eq.f32.partialorder %v1654_v63, 1.0  ;;  %v1998_v10 = vld [vmem:[#allocation2 + $0x230] sm:$0xff] }
 0x403   :  { %1636 = vst [vmem:[#allocation2 + $0x348] sm:$0xf] %v1632_v12  ;;  %2156 = vmatpush.bf16.msra.mxu1 %v2044_v56  ;;  %v2084_v41 = vpack.c.bf16 %v2024_v39, %v2024_v39  ;;  %v1537_v49 = vld [vmem:[%s4568_s3 + $0xf0] sm:$0xf]  ;;  %v1973_v7 = vld [vmem:[#allocation2 + $0x280] sm:$0xff]  ;;  %v1961_v2 = vld [vmem:[#allocation2 + $0x210] sm:$0xff] }
 0x404   :  { %1637 = vst [vmem:[#allocation2 + $0x238] sm:$0xf] %v1633_v38  ;;  %2358 = vmatmul.msk.bf16.vlgmr.msra.gmra.mxu0 %vm788_vm0, %v4283_v48  ;;  %v1597_v34 = vld [vmem:[%s4568_s3 + $0x210] sm:$0xf]  ;;  %vm1541_vm12 = vcmp.eq.f32.partialorder %v1537_v49, 1.0 }
 0x405   :  { %2192 = vmatpush.bf16.msrb.mxu0 %v2114_v11  ;;  %1638 = vst [vmem:[#allocation2 + $0x320] sm:$0xf] %v1634_v44  ;;  %v2117_v6 = vsel %vm792_vm9, %v2084_v41, 0  ;;  %vm1601_vm2 = vcmp.eq.f32.partialorder %v1597_v34, 1.0  ;;  %v1974_v44 = vld [vmem:[#allocation2 + $0x148] sm:$0xff] }
 0x406   :  { %v1362_v60 = vpop.permute.xlu1 %1361  ;;  %v1644_v50 = vpop.permute.xlu2 %1643  ;;  %v1538_v55 = vld [vmem:[%s4568_s3 + $0xf8] sm:$0xf]  ;;  %v1709_v34 = vld [vmem:[%s4568_s3 + $0x50] sm:$0xf] }
 0x407   :  { %2157 = vmatpush.bf16.msra.mxu1 %v2032_v45  ;;  %v1363_v54 = vsel %vm285_vm10, %v4190_v52, %v1362_v60  ;;  %v1366_v59 = vsel %vm285_vm10, %v1362_v60, %v3864_v1  ;;  %v1648_v24 = vsel %vm343_vm6, %v4009_v27, %v1644_v50  ;;  %v1646_v23 = vpop.permute.xlu0 %1645  ;;  %v1997_v1 = vld [vmem:[#allocation2 + $0x290] sm:$0xff] }
 0x408   :  { %v1377_v35 = vsel %vm1373_vm3, %v1363_v54, 0.0  ;;  %v1378_v32 = vsel %vm1374_vm4, %v1366_v59, 0.0  ;;  %v1660_v52 = vsel %vm1656_vm7, %v1648_v24, 0.0  ;;  %v1647_v16 = vsel %vm343_vm6, %v1644_v50, %v1646_v23  ;;  %v2009_v36 = vld [vmem:[#allocation2 + $0xc8] sm:$0xff]  ;;  %v1598_v27 = vld [vmem:[%s4568_s3 + $0x218] sm:$0xf] }
 0x409   :  { %2193 = vmatpush.bf16.msrb.mxu0 %v2071_v51  ;;  %1381 = vst [vmem:[#allocation2 + $0x120] sm:$0xf] %v1377_v35  ;;  %v1650_v5 = vsel %vm343_vm6, %v1646_v23, %v3884_v8  ;;  %v1661_v9 = vsel %vm1657_vm1, %v1647_v16, 0.0  ;;  %v2069_v11 = vpack.c.bf16 %v2009_v36, %v1997_v1  ;;  %v2010_v18 = vld [vmem:[#allocation2 + $0x228] sm:$0xff]  ;;  %v1596_v8 = vld [vmem:[%s4568_s3 + $0x208] sm:$0xf] }
 0x40a   :  { %1382 = vst [vmem:[#allocation2 + $0x78] sm:$0xf] %v1378_v32  ;;  %v1662_v19 = vsel %vm1658_vm8, %v1650_v5, 0.0  ;;  %v2070_v47 = vpack.c.bf16 %v2010_v18, %v1998_v10  ;;  %2359 = vmatmul.msk.bf16.vlgmr.msra.gmra.mxu1 %vm788_vm0, %v4283_v48  ;;  %vm1602_vm6 = vcmp.eq.f32.partialorder %v1598_v27, 1.0  ;;  %vm1600_vm15 = vcmp.eq.f32.partialorder %v1596_v8, 1.0  ;;  %v2000_v45 = vld [vmem:[#allocation2 + $0x348] sm:$0xff] }
 0x40b   :  { %2205 = vmatpush.bf16.msrb.mxu1 %v2117_v6  ;;  %1664 = vst [vmem:[#allocation2 + $0x100] sm:$0xf] %v1660_v52  ;;  %2167 = vmatpush.bf16.msra.mxu2 %v2069_v11  ;;  %v1535_v51 = vld [vmem:[%s4568_s3 + $0xe0] sm:$0xf]  ;;  %v1962_v6 = vld [vmem:[#allocation2 + $0x308] sm:$0xff]  ;;  %v1949_v60 = vld [vmem:[#allocation2 + $0x90] sm:$0xff] }
 0x40c   :  { %1665 = vst [vmem:[#allocation2 + $0x160] sm:$0xf] %v1661_v9  ;;  %2180 = vmatpush.bf16.msra.mxu3 %v2070_v47  ;;  %v2025_v50 = vld [vmem:[#allocation2 + $0x338] sm:$0xff]  ;;  %v2045_v54 = vpack.c.bf16 %v1961_v2, %v1949_v60  ;;  %v1950_v59 = vld [vmem:[#allocation2 + $0x50] sm:$0xff]  ;;  %vm1539_vm4 = vcmp.eq.f32.partialorder %v1535_v51, 1.0  ;;  %vm1542_vm7 = vcmp.eq.f32.partialorder %v1538_v55, 1.0 }
 0x40d   :  { %2194 = vmatpush.bf16.msrb.mxu0 %v2059_v31  ;;  %1666 = vst [vmem:[#allocation2 + $0x20] sm:$0xf] %v1662_v19  ;;  %v2026_v31 = vld [vmem:[#allocation2 + $0x2b8] sm:$0xff]  ;;  %v2046_v35 = vpack.c.bf16 %v1962_v6, %v1950_v59  ;;  %v1937_v32 = vld [vmem:[#allocation2 + $0x2e8] sm:$0xff]  ;;  %v1938_v36 = vld [vmem:[#allocation2 + $0x310] sm:$0xff]  ;;  %v2085_v27 = vpack.c.bf16 %v2025_v50, %v2025_v50  ;;  %vm1713_vm8 = vcmp.eq.f32.partialorder %v1709_v34, 1.0 }
 0x40e   :  { %v1590_v58 = vpop.permute.xlu1 %1589  ;;  %v1528_v33 = vpop.permute.xlu2 %1527  ;;  %v2086_v5 = vpack.c.bf16 %v2026_v31, %v2026_v31  ;;  %v1925_v18 = vld [vmem:[#allocation2 + $0x1b8] sm:$0xff]  ;;  %v1940_v60 = vld [vmem:[#allocation2 + $0x248] sm:$0xff]  ;;  %v1978_v50 = vld [vmem:[#allocation2 + $0xa0] sm:$0xff] }
 0x40f   :  { %v1594_v12 = vsel %vm285_vm10, %v1590_v58, %v3874_v61  ;;  %v1532_v43 = vsel %vm223_vm11, %v3997_v17, %v1528_v33  ;;  %v1588_v25 = vpop.permute.xlu0 %1587  ;;  %v1479_v61 = vld [vmem:[%s4568_s3 + $0x20] sm:$0xf]  ;;  %v1565_v17 = vld [vmem:[%s4568_s3 + $0x150] sm:$0xf]  ;;  %v2033_v8 = vpack.c.bf16 %v1937_v32, %v1925_v18  ;;  %v1977_v32 = vld [vmem:[#allocation2 + $0x140] sm:$0xff] }
 0x410   :  { %v1606_v57 = vsel %vm1602_vm6, %v1594_v12, 0.0  ;;  %v1545_v38 = vsel %vm1541_vm12, %v1532_v43, 0.0  ;;  %v1591_v56 = vsel %vm285_vm10, %v1588_v25, %v1590_v58  ;;  %v1592_v62 = vsel %vm285_vm10, %v4062_v13, %v1588_v25  ;;  %v1985_v22 = vld [vmem:[#allocation2 + $0x120] sm:$0xff]  ;;  %v1926_v19 = vld [vmem:[#allocation2 + $0xf8] sm:$0xff] }
 0x411   :  { %1610 = vst [vmem:[#allocation2 + $0xd0] sm:$0xf] %v1606_v57  ;;  %v1604_v39 = vsel %vm1600_vm15, %v1592_v62, 0.0  ;;  %v1605_v28 = vsel %vm1601_vm2, %v1591_v56, 0.0  ;;  %v2057_v29 = vpack.c.bf16 %v1985_v22, %v1973_v7  ;;  %v1986_v41 = vld [vmem:[#allocation2 + $0x78] sm:$0xff]  ;;  %vm1483_vm10 = vcmp.eq.f32.partialorder %v1479_v61, 1.0 }
 0x412   :  { %1549 = vst [vmem:[#allocation2 + $0x278] sm:$0xf] %v1545_v38  ;;  %v2058_v42 = vpack.c.bf16 %v1986_v41, %v1974_v44  ;;  %v2012_v13 = vld [vmem:[#allocation2 + $0x100] sm:$0xff]  ;;  %vm1569_vm3 = vcmp.eq.f32.partialorder %v1565_v17, 1.0  ;;  %v2034_v58 = vpack.c.bf16 %v1938_v36, %v1926_v19  ;;  %v1563_v12 = vld [vmem:[%s4568_s3 + $0x140] sm:$0xf] }
 0x413   :  { %1608 = vst [vmem:[#allocation2 + $0x350] sm:$0xf] %v1604_v39  ;;  %2168 = vmatpush.bf16.msra.mxu2 %v2057_v29  ;;  %v2072_v63 = vpack.c.bf16 %v2012_v13, %v2000_v45  ;;  %v2120_v25 = vsel %vm792_vm9, %v2085_v27, 0  ;;  %v1566_v7 = vld [vmem:[%s4568_s3 + $0x158] sm:$0xf]  ;;  %v2013_v57 = vld [vmem:[#allocation2 + $0x160] sm:$0xff] }
 0x414   :  { %1609 = vst [vmem:[#allocation2 + $0x2a8] sm:$0xf] %v1605_v28  ;;  %2181 = vmatpush.bf16.msra.mxu3 %v2058_v42  ;;  %v2123_v38 = vsel %vm792_vm9, %v2086_v5, 0  ;;  %v1964_v56 = vld [vmem:[#allocation2 + $0x10] sm:$0xff]  ;;  %v2014_v62 = vld [vmem:[#allocation2 + $0x20] sm:$0xff]  ;;  %v2001_v22 = vld [vmem:[#allocation2 + $0x238] sm:$0xff] }
 0x415   :  { %2206 = vmatpush.bf16.msrb.mxu1 %v2072_v63  ;;  %vm1567_vm6 = vcmp.eq.f32.partialorder %v1563_v12, 1.0  ;;  %vm1570_vm12 = vcmp.eq.f32.partialorder %v1566_v7, 1.0  ;;  %v1952_v17 = vld [vmem:[#allocation2 + $0x268] sm:$0xff]  ;;  %v2073_v39 = vpack.c.bf16 %v2013_v57, %v2001_v22  ;;  %v2002_v28 = vld [vmem:[#allocation2 + $0x320] sm:$0xff]  ;;  %v2028_v29 = vld [vmem:[#allocation2 + $0x98] sm:$0xff] }
 0x416   :  { %v4343_v24 = vpop.permute.xlu1 %1473  ;;  %v4345_v23 = vpop.permute.xlu2 %1555  ;;  %v2048_v45 = vpack.c.bf16 %v1964_v56, %v1952_v17  ;;  %v2074_v13 = vpack.c.bf16 %v2014_v62, %v2002_v28  ;;  %v1482_v27 = vld [vmem:[%s4568_s3 + $0x38] sm:$0xf]  ;;  %v1992_v12 = vld [vmem:[#allocation2 + $0x2c0] sm:$0xff]  ;;  %v1791_v7 = vld [vmem:[%s4568_s3 + $0x160] sm:$0xf] }
 0x417   :  { %v1478_v52 = vsel %vm165_vm5, %v4343_v24, %v3904_v30  ;;  %v1560_v16 = vsel %vm252_vm14, %v4031_v3, %v4345_v23  ;;  %v1530_v1 = vpop.permute.xlu0 %1529  ;;  %2169 = vmatpush.bf16.msra.mxu2 %v2045_v54  ;;  %v1507_v3 = vld [vmem:[%s4568_s3 + $0x80] sm:$0xf]  ;;  %v1509_v22 = vld [vmem:[%s4568_s3 + $0x90] sm:$0xf] }
 0x418   :  { %v1487_v9 = vsel %vm1483_vm10, %v1478_v52, 0.0  ;;  %v1573_v11 = vsel %vm1569_vm3, %v1560_v16, 0.0  ;;  %v1531_v10 = vsel %vm223_vm11, %v1528_v33, %v1530_v1  ;;  %v1534_v30 = vsel %vm223_vm11, %v1530_v1, %v3886_v4  ;;  %2182 = vmatpush.bf16.msra.mxu3 %v2046_v35  ;;  %v1976_v4 = vld [vmem:[#allocation2 + $0x260] sm:$0xff]  ;;  %v1990_v31 = vld [vmem:[#allocation2 + $0xd0] sm:$0xff]  ;;  %v1481_v16 = vld [vmem:[%s4568_s3 + $0x30] sm:$0xf] }
 0x419   :  { %1491 = vst [vmem:[#allocation2 + $0x130] sm:$0xf] %v1487_v9  ;;  %v1543_v47 = vsel %vm1539_vm4, %v1534_v30, 0.0  ;;  %v1546_v49 = vsel %vm1542_vm7, %v1531_v10, 0.0  ;;  %vm1511_vm1 = vcmp.eq.f32.partialorder %v1507_v3, 1.0  ;;  %v1928_v35 = vld [vmem:[#allocation2 + $0x150] sm:$0xff]  ;;  %v2088_v52 = vpack.c.bf16 %v2028_v29, %v2028_v29 }
 0x41a   :  { %1577 = vst [vmem:[#allocation2 + $0x28] sm:$0xf] %v1573_v11  ;;  %v1988_v33 = vld [vmem:[#allocation2 + $0x350] sm:$0xff]  ;;  %v2036_v1 = vpack.c.bf16 %v1940_v60, %v1928_v35  ;;  %v2062_v36 = vpack.c.bf16 %v1990_v31, %v1978_v50  ;;  %v1953_v11 = vld [vmem:[#allocation2 + $0x278] sm:$0xff]  ;;  %v2004_v10 = vld [vmem:[#allocation2 + $0x328] sm:$0xff]  ;;  %vm1485_vm2 = vcmp.eq.f32.partialorder %v1481_v16, 1.0 }
 0x41b   :  { %1547 = vst [vmem:[#allocation2 + $0x180] sm:$0xf] %v1543_v47  ;;  %2170 = vmatpush.bf16.msra.mxu2 %v2033_v8  ;;  %v2060_v43 = vpack.c.bf16 %v1988_v33, %v1976_v4  ;;  %v1989_v51 = vld [vmem:[#allocation2 + $0x2a8] sm:$0xff]  ;;  %v2129_v9 = vsel %vm792_vm9, %v2088_v52, 0  ;;  %v2016_v30 = vld [vmem:[#allocation2 + $0x220] sm:$0xff]  ;;  %vm1486_vm10 = vcmp.eq.f32.partialorder %v1482_v27, 1.0 }
 0x41c   :  { %1550 = vst [vmem:[#allocation2 + $0x208] sm:$0xf] %v1546_v49  ;;  %2183 = vmatpush.bf16.msra.mxu3 %v2034_v58  ;;  %v1980_v8 = vld [vmem:[#allocation2 + $0x2e0] sm:$0xff]  ;;  %v2076_v33 = vpack.c.bf16 %v2016_v30, %v2004_v10  ;;  %vm1795_vm7 = vcmp.eq.f32.partialorder %v1791_v7, 1.0  ;;  %v2015_v52 = vld [vmem:[#allocation2 + $0x118] sm:$0xff] }
 0x41d   :  { %2207 = vmatpush.bf16.msrb.mxu1 %v2060_v43  ;;  %v1763_v43 = vld [vmem:[%s4568_s3 + $0x100] sm:$0xf] }
 0x41e   :  { %v4378_v44 = vpop.permute.xlu1 %1501  ;;  %v4380_v61 = vpop.permute.xlu2 %1699  ;;  %2360 = vmatmul.msk.bf16.vlgmr.msra.gmra.mxu2 %vm788_vm0, %v4283_v48  ;;  %vm1767_vm3 = vcmp.eq.f32.partialorder %v1763_v43, 1.0  ;;  %v1738_v43 = vld [vmem:[%s4568_s3 + $0xb8] sm:$0xf] }
 0x41f   :  { %2218 = vmatpush.bf16.msrb.mxu2 %v2120_v25  ;;  %v1506_v41 = vsel %vm194_vm13, %v4378_v44, %v3888_v26  ;;  %v1704_v2 = vsel %vm165_vm5, %v3836_v53, %v4380_v61  ;;  %v1558_v42 = vpop.permute.xlu0 %1557  ;;  %2361 = vmatmul.msk.bf16.vlgmr.msra.gmra.mxu3 %vm788_vm0, %v4283_v48  ;;  %v1764_v25 = vld [vmem:[%s4568_s3 + $0x108] sm:$0xf] }
 0x420   :  { %2231 = vmatpush.bf16.msrb.mxu3 %v2123_v38  ;;  %v1515_v63 = vsel %vm1511_vm1, %v1506_v41, 0.0  ;;  %v1717_v55 = vsel %vm1713_vm8, %v1704_v2, 0.0  ;;  %v1559_v26 = vsel %vm252_vm14, %v4345_v23, %v1558_v42  ;;  %v1562_v6 = vsel %vm252_vm14, %v1558_v42, %v3876_v0  ;;  %v1737_v0 = vld [vmem:[%s4568_s3 + $0xb0] sm:$0xf]  ;;  %v1792_v38 = vld [vmem:[%s4568_s3 + $0x168] sm:$0xf] }
 0x421   :  { %1519 = vst [vmem:[#allocation2 + $0xe0] sm:$0xf] %v1515_v63  ;;  %v1571_v54 = vsel %vm1567_vm6, %v1562_v6, 0.0  ;;  %v1574_v59 = vsel %vm1570_vm12, %v1559_v26, 0.0  ;;  %2208 = vmatpush.bf16.msrb.mxu1 %v2048_v45  ;;  %v2061_v23 = vpack.c.bf16 %v1989_v51, %v1977_v32  ;;  %v1965_v5 = vld [vmem:[#allocation2 + $0x28] sm:$0xff]  ;;  %vm1741_vm15 = vcmp.eq.f32.partialorder %v1737_v0, 1.0 }
 0x422   :  { %1721 = vst [vmem:[#allocation2 + $0x178] sm:$0xf] %v1717_v55  ;;  %v2049_v3 = vpack.c.bf16 %v1965_v5, %v1953_v11  ;;  %v1951_v56 = vld [vmem:[#allocation2 + $0x180] sm:$0xff]  ;;  %v2064_v2 = vpack.c.bf16 %v1992_v12, %v1980_v8  ;;  %vm1768_vm4 = vcmp.eq.f32.partialorder %v1764_v25, 1.0  ;;  %v1510_v42 = vld [vmem:[%s4568_s3 + $0x98] sm:$0xf] }
 0x423   :  { %2219 = vmatpush.bf16.msrb.mxu2 %v2073_v39  ;;  %1575 = vst [vmem:[#allocation2 + $0x270] sm:$0xf] %v1571_v54  ;;  %v1954_v39 = vld [vmem:[#allocation2 + $0x208] sm:$0xff]  ;;  %v1927_v45 = vld [vmem:[#allocation2 + $0x130] sm:$0xff]  ;;  %vm1796_vm1 = vcmp.eq.f32.partialorder %v1792_v38, 1.0  ;;  %vm1513_vm8 = vcmp.eq.f32.partialorder %v1509_v22, 1.0 }
 0x424   :  { %2232 = vmatpush.bf16.msrb.mxu3 %v2074_v13  ;;  %1578 = vst [vmem:[#allocation2 + $0x1c0] sm:$0xf] %v1574_v59  ;;  %vm1514_vm6 = vcmp.eq.f32.partialorder %v1510_v42, 1.0  ;;  %v2003_v32 = vld [vmem:[#allocation2 + $0x1e8] sm:$0xff]  ;;  %v1736_v0 = vld [vmem:[%s4568_s3 + $0xa8] sm:$0xf] }
 0x425   :  { %2209 = vmatpush.bf16.msrb.mxu1 %v2036_v1  ;;  %v1979_v1 = vld [vmem:[#allocation2 + $0x2d0] sm:$0xff]  ;;  %v2006_v42 = vld [vmem:[#allocation2 + $0x108] sm:$0xff] }
 0x426   :  { %v4414_v18 = vpop.permute.xlu1 %1725  ;;  %v4416_v19 = vpop.permute.xlu2 %1727 }
 0x427   :  { %2220 = vmatpush.bf16.msrb.mxu2 %v2061_v23  ;;  %v1732_v47 = vsel %vm194_vm13, %v4414_v18, %v4416_v19  ;;  %v1472_v49 = vpop.permute.xlu0 %1471 }
 0x428   :  { %2233 = vmatpush.bf16.msrb.mxu3 %v2062_v36  ;;  %v1745_v34 = vsel %vm1741_vm15, %v1732_v47, 0.0  ;;  %v1475_v58 = vsel %vm165_vm5, %v1472_v49, %v4343_v24  ;;  %v1476_v4 = vsel %vm165_vm5, %v4064_v21, %v1472_v49  ;;  %v2027_v24 = vld [vmem:[#allocation2 + $0x318] sm:$0xff]  ;;  %2363 = vmatmul.msk.bf16.vlgmr.msrb.gmra.mxu1 %vm788_vm0, %v4283_v48  ;;  %v1939_v29 = vld [vmem:[#allocation2 + $0xe0] sm:$0xff]  ;;  %v1991_v36 = vld [vmem:[#allocation2 + $0x2c8] sm:$0xff]  ;;  %vm1742_vm15 = vcmp.eq.f32.partialorder %v1738_v43, 1.0 }
 0x429   :  { %2257 = vmatpush.bf16.msra.mxu1 %v2129_v9  ;;  %1749 = vst [vmem:[#allocation2 + $0x258] sm:$0xf] %v1745_v34  ;;  %v1489_v21 = vsel %vm1485_vm2, %v1476_v4, 0.0  ;;  %v1490_v57 = vsel %vm1486_vm10, %v1475_v58, 0.0  ;;  %v2087_v13 = vpack.c.bf16 %v2027_v24, %v2027_v24  ;;  %v2035_v55 = vpack.c.bf16 %v1939_v29, %v1927_v45  ;;  %v2029_v47 = vld [vmem:[#allocation2 + $0x2f8] sm:$0xff]  ;;  %v2030_v58 = vld [vmem:[#allocation2 + $0x128] sm:$0xff] }
 0x42a   :  { %1493 = vst [vmem:[#allocation2 + $0x30] sm:$0xf] %v1489_v21  ;;  %v1963_v62 = vld [vmem:[#allocation2 + $0x270] sm:$0xff]  ;;  %v2063_v30 = vpack.c.bf16 %v1991_v36, %v1979_v1  ;;  %v2092_v49 = vld [vmem:[%s4576_s9] sm:$0xff]  ;;  %v2089_v12 = vpack.c.bf16 %v2029_v47, %v2029_v47  ;;  %v2090_v21 = vpack.c.bf16 %v2030_v58, %v2030_v58 }
 0x42b   :  { %2221 = vmatpush.bf16.msrb.mxu2 %v2049_v3  ;;  %1494 = vst [vmem:[#allocation2 + $0x88] sm:$0xf] %v1490_v57  ;;  %v2047_v17 = vpack.c.bf16 %v1963_v62, %v1951_v56  ;;  %v1966_v28 = vld [vmem:[#allocation2 + $0x1c0] sm:$0xff]  ;;  %2095 = vperm.xlu2 %2391, %v2092_v49   ;;  %v2018_v45 = vld [vmem:[#allocation2 + $0x18] sm:$0xff] }
 0x42c   :  { %v2050_v41 = vpack.c.bf16 %v1966_v28, %v1954_v39  ;;  %v2132_v22 = vsel %vm792_vm9, %v2089_v12, 0  ;;  %v2005_v39 = vld [vmem:[#allocation2 + $0x1f8] sm:$0xff]  ;;  %v2017_v28 = vld [vmem:[#allocation2 + $0x200] sm:$0xff]  ;;  %v2135_v29 = vsel %vm792_vm9, %v2090_v21, 0 }
 0x42d   :  { %2258 = vmatpush.bf16.msra.mxu1 %v2076_v33  ;;  %2195 = vmatpush.bf16.msrb.mxu0 %v2047_v17 }
 0x42e   :  { %2234 = vmatpush.bf16.msrb.mxu3 %v2050_v41  ;;  %v1752_v51 = vpop.permute.xlu1 %1751  ;;  %v1780_v63 = vpop.permute.xlu2 %1779 }
 0x42f   :  { %v1761_v26 = vsel %vm223_vm11, %v1752_v51, %v3756_v40  ;;  %v1762_v6 = vsel %vm223_vm11, %v3742_v15, %v1752_v51  ;;  %v1789_v60 = vsel %vm252_vm14, %v1780_v63, %v3778_v20  ;;  %v1790_v50 = vsel %vm252_vm14, %v3770_v46, %v1780_v63  ;;  %v1500_v31 = vpop.permute.xlu0 %1499 }
 0x430   :  { %v1771_v54 = vsel %vm1767_vm3, %v1762_v6, 0.0  ;;  %v1772_v59 = vsel %vm1768_vm4, %v1761_v26, 0.0  ;;  %v1799_v35 = vsel %vm1795_vm7, %v1790_v50, 0.0  ;;  %v1800_v40 = vsel %vm1796_vm1, %v1789_v60, 0.0  ;;  %v1993_v26 = vld [vmem:[#allocation2 + $0xd8] sm:$0xff]  ;;  %v1982_v50 = vld [vmem:[#allocation2 + $0x110] sm:$0xff] }
 0x431   :  { %2259 = vmatpush.bf16.msra.mxu1 %v2064_v2  ;;  %1775 = vst [vmem:[#allocation2 + $0x190] sm:$0xf] %v1771_v54  ;;  %v1503_v15 = vsel %vm194_vm13, %v1500_v31, %v4378_v44  ;;  %v1504_v20 = vsel %vm194_vm13, %v4090_v37, %v1500_v31  ;;  %2196 = vmatpush.bf16.msrb.mxu0 %v2035_v55  ;;  %v2126_v46 = vsel %vm792_vm9, %v2087_v13, 0  ;;  %v1710_v44 = vld [vmem:[%s4568_s3 + $0x58] sm:$0xf]  ;;  %vm1740_vm11 = vcmp.eq.f32.partialorder %v1736_v0, 1.0 }
 0x432   :  { %1776 = vst [vmem:[#allocation2 + $0x68] sm:$0xf] %v1772_v59  ;;  %v1517_v23 = vsel %vm1513_vm8, %v1504_v20, 0.0  ;;  %v1518_v16 = vsel %vm1514_vm6, %v1503_v15, 0.0  ;;  %v2075_v37 = vpack.c.bf16 %v2015_v52, %v2003_v32  ;;  %vm1714_vm14 = vcmp.eq.f32.partialorder %v1710_v44, 1.0  ;;  %v1929_v25 = vld [vmem:[#allocation2 + $0x30] sm:$0xff] }
 0x433   :  { %1803 = vst [vmem:[#allocation2 + $0x2d8] sm:$0xf] %v1799_v35  ;;  %v1930_v38 = vld [vmem:[#allocation2 + $0x88] sm:$0xff]  ;;  %v2077_v63 = vpack.c.bf16 %v2017_v28, %v2005_v39  ;;  %v1981_v55 = vld [vmem:[#allocation2 + $0x198] sm:$0xff]  ;;  %v1708_v60 = vld [vmem:[%s4568_s3 + $0x48] sm:$0xf] }
 0x434   :  { %1804 = vst [vmem:[#allocation2 + $0x8] sm:$0xf] %v1800_v40  ;;  %2362 = vmatmul.msk.bf16.vlgmr.msrb.gmra.mxu0 %vm788_vm0, %v4283_v48  ;;  %v1707_v6 = vld [vmem:[%s4568_s3 + $0x40] sm:$0xf]  ;;  %v1994_v31 = vld [vmem:[#allocation2 + $0x250] sm:$0xff]  ;;  %v2065_v54 = vpack.c.bf16 %v1993_v26, %v1981_v55  ;;  %v1957_v40 = vld [vmem:[#allocation2 + $0x300] sm:$0xff] }
 0x435   :  { %2244 = vmatpush.bf16.msra.mxu0 %v2126_v46  ;;  %1521 = vst [vmem:[#allocation2 + $0x1d8] sm:$0xf] %v1517_v23  ;;  %vm1711_vm9 = vcmp.eq.f32.partialorder %v1707_v6, 1.0  ;;  %v2066_v59 = vpack.c.bf16 %v1994_v31, %v1982_v50  ;;  %v1969_v15 = vld [vmem:[#allocation2 + $0xc0] sm:$0xff]  ;;  %v1958_v32 = vld [vmem:[#allocation2 + $0x1b0] sm:$0xff]  ;;  %v1945_v1 = vld [vmem:[#allocation2 + $0x258] sm:$0xff] }
 0x436   :  { %1522 = vst [vmem:[#allocation2 + $0x170] sm:$0xf] %v1518_v16  ;;  %v1724_v27 = vpop.permute.xlu1 %1723  ;;  %v1970_v52 = vld [vmem:[#allocation2 + $0x60] sm:$0xff]  ;;  %v2053_v16 = vpack.c.bf16 %v1969_v15, %v1957_v40 }
 0x437   :  { %v1733_v5 = vsel %vm194_vm13, %v1724_v27, %v4414_v18  ;;  %v4484_v9 = vpop.permute.xlu0 %1701 }
 0x438   :  { %v1744_v11 = vsel %vm1740_vm11, %v1733_v5, 0.0  ;;  %v1703_v10 = vsel %vm165_vm5, %v4380_v61, %v4484_v9  ;;  %v1955_v3 = vld [vmem:[#allocation2 + $0x190] sm:$0xff]  ;;  %v1735_v61 = vld [vmem:[%s4568_s3 + $0xa0] sm:$0xf] }
 0x439   :  { %2245 = vmatpush.bf16.msra.mxu0 %v2075_v37  ;;  %1748 = vst [vmem:[#allocation2 + $0x188] sm:$0xf] %v1744_v11  ;;  %v1718_v8 = vsel %vm1714_vm14, %v1703_v10, 0.0  ;;  %v1956_v34 = vld [vmem:[#allocation2 + $0x68] sm:$0xff]  ;;  %vm1739_vm12 = vcmp.eq.f32.partialorder %v1735_v61, 1.0  ;;  %v2054_v37 = vpack.c.bf16 %v1970_v52, %v1958_v32 }
 0x43a   :  { %1722 = vst [vmem:[#allocation2 + $0x1a0] sm:$0xf] %v1718_v8  ;;  %v1967_v18 = vld [vmem:[#allocation2 + $0x2d8] sm:$0xff] }
 0x43b   :  { %v1968_v4 = vld [vmem:[#allocation2 + $0x8] sm:$0xff]  ;;  %v2051_v33 = vpack.c.bf16 %v1967_v18, %v1955_v3 }
 0x43c   :  { %v1941_v7 = vld [vmem:[#allocation2 + $0x1d8] sm:$0xff]  ;;  %v2052_v24 = vpack.c.bf16 %v1968_v4, %v1956_v34 }
 0x43d   :  { %2246 = vmatpush.bf16.msra.mxu0 %v2063_v30  ;;  %v2037_v57 = vpack.c.bf16 %v1941_v7, %v1929_v25  ;;  %v1942_v56 = vld [vmem:[#allocation2 + $0x170] sm:$0xff] }
 0x43e   :  { %v2038_v62 = vpack.c.bf16 %v1942_v56, %v1930_v38  ;;  %2260 = vmatpush.bf16.msra.mxu1 %v2052_v24 }
 0x43f   :  { %2222 = vmatpush.bf16.msrb.mxu2 %v2037_v57  ;;  %v1730_v17 = vpop.permute.xlu0 %1729 }
 0x440   :  { %2235 = vmatpush.bf16.msrb.mxu3 %v2038_v62  ;;  %v1731_v41 = vsel %vm194_vm13, %v4416_v19, %v1730_v17  ;;  %v1734_v2 = vsel %vm194_vm13, %v1730_v17, %v1724_v27  ;;  %v2078_v19 = vpack.c.bf16 %v2018_v45, %v2006_v42  ;;  %vm1712_vm13 = vcmp.eq.f32.partialorder %v1708_v60, 1.0  ;;  %v1933_v27 = vld [vmem:[#allocation2 + $0x178] sm:$0xff]  ;;  %v1944_v30 = vld [vmem:[#allocation2 + $0x188] sm:$0xff] }
 0x441   :  { %2247 = vmatpush.bf16.msra.mxu0 %v2051_v33  ;;  %v1743_v13 = vsel %vm1739_vm12, %v1734_v2, 0.0  ;;  %v1746_v51 = vsel %vm1742_vm15, %v1731_v41, 0.0  ;;  %v1934_v36 = vld [vmem:[#allocation2 + $0x1a0] sm:$0xff]  ;;  %v2041_v5 = vpack.c.bf16 %v1945_v1, %v1933_v27 }
 0x442   :  { %2364 = vmatmul.msk.bf16.vlgmr.msrb.gmra.mxu2 %vm788_vm0, %v4283_v48  ;;  %1747 = vst [vmem:[#allocation2 + $0x38] sm:$0xf] %v1743_v13 }
 0x443   :  { %2270 = vmatpush.bf16.msra.mxu2 %v2132_v22  ;;  %2365 = vmatmul.msk.bf16.vlgmr.msrb.gmra.mxu3 %vm788_vm0, %v4283_v48  ;;  %1750 = vst [vmem:[#allocation2 + $0x40] sm:$0xf] %v1746_v51 }
 0x444   :  { %2283 = vmatpush.bf16.msra.mxu3 %v2135_v29 }
 0x447   :  { %2271 = vmatpush.bf16.msra.mxu2 %v2077_v63  ;;  %v1696_v35 = vpop.permute.xlu0 %1695 }
 0x448   :  { %2284 = vmatpush.bf16.msra.mxu3 %v2078_v19  ;;  %v1705_v20 = vsel %vm165_vm5, %v1696_v35, %v3836_v53  ;;  %v1706_v46 = vsel %vm165_vm5, %v4484_v9, %v1696_v35 }
 0x449   :  { %v1715_v23 = vsel %vm1711_vm9, %v1706_v46, 0.0  ;;  %v1716_v0 = vsel %vm1712_vm13, %v1705_v20, 0.0  ;;  %v1943_v9 = vld [vmem:[#allocation2 + $0x38] sm:$0xff] }
 0x44a   :  { %1719 = vst [vmem:[#allocation2 + $0x2a0] sm:$0xf] %v1715_v23  ;;  %v1946_v44 = vld [vmem:[#allocation2 + $0x40] sm:$0xff] }
 0x44b   :  { %2272 = vmatpush.bf16.msra.mxu2 %v2065_v54  ;;  %1720 = vst [vmem:[#allocation2 + $0x58] sm:$0xf] %v1716_v0  ;;  %v2042_v53 = vpack.c.bf16 %v1946_v44, %v1934_v36 }
 0x44c   :  { %2285 = vmatpush.bf16.msra.mxu3 %v2066_v59 }
 0x44f   :  { %2273 = vmatpush.bf16.msra.mxu2 %v2053_v16 }
 0x450   :  { %2286 = vmatpush.bf16.msra.mxu3 %v2054_v37 }
 0x451   :  { %v1931_v14 = vld [vmem:[#allocation2 + $0x2a0] sm:$0xff] }
 0x452   :  { %v2039_v11 = vpack.c.bf16 %v1943_v9, %v1931_v14  ;;  %v1932_v10 = vld [vmem:[#allocation2 + $0x58] sm:$0xff] }
 0x453   :  { %2274 = vmatpush.bf16.msra.mxu2 %v2041_v5  ;;  %v2040_v3 = vpack.c.bf16 %v1944_v30, %v1932_v10 }
 0x454   :  { %2287 = vmatpush.bf16.msra.mxu3 %v2042_v53  ;;  %2248 = vmatpush.bf16.msra.mxu0 %v2039_v11 }
 0x455   :  { %2261 = vmatpush.bf16.msra.mxu1 %v2040_v3 }
 0x456   :  { %2368 = vmatmul.msk.bf16.vlgmr.msra.gmra.mxu2 %vm788_vm0, %v4283_v48 }
 0x457   :  { %2369 = vmatmul.msk.bf16.vlgmr.msra.gmra.mxu3 %vm788_vm0, %v4283_v48  ;;  %2366 = vmatmul.msk.bf16.vlgmr.msra.gmra.mxu0 %vm788_vm0, %v4283_v48 }
 0x458   :  { %2367 = vmatmul.msk.bf16.vlgmr.msra.gmra.mxu1 %vm788_vm0, %v4283_v48 }
 0x481   :  { %v2146_v47 = vpop.f32.mrf.mxu0 }
 0x485   :  { %v2096_v58 = vpop.permute.xlu2 %2095 }
 0x486   :  { %v2147_v18 = vadd.f32 %v2146_v47, %v2096_v58 }
 0x487   :  { %v2159_v49 = vpop.f32.mrf.mxu1 }
 0x488   :  { %v2160_v4 = vadd.f32 %v2159_v49, %v2096_v58  ;;  %v2293_v33 = vmax.f32 %v2147_v18, 0.0 }
 0x489   :  { %v2148_v8 = vpop.f32.mrf.mxu0 }
 0x48a   :  { %v2294_v12 = vmax.f32 %v2160_v4, 0.0  ;;  %2315 = vst [vmem:[%s4577_s11] sm:$0xff] %v2293_v33 }
 0x48c   :  { %2316 = vst [vmem:[%s4577_s11 + $0x8] sm:$0xff] %v2294_v12 }
 0x48f   :  { %v2161_v34 = vpop.f32.mrf.mxu1 }
 0x4a1   :  { %v2172_v61 = vpop.f32.mrf.mxu2 }
 0x4a2   :  { %v2185_v43 = vpop.f32.mrf.mxu3  ;;  %v2173_v48 = vadd.f32 %v2172_v61, %v2096_v58 }
 0x4a3   :  { %v2186_v25 = vadd.f32 %v2185_v43, %v2096_v58 }
 0x4a4   :  { %v2295_v7 = vmax.f32 %v2173_v48, 0.0 }
 0x4a5   :  { %v2296_v24 = vmax.f32 %v2186_v25, 0.0  ;;  %v2211_v21 = vpop.f32.mrf.mxu1 }
 0x4a6   :  { %2374 = vst [vmem:[%s4577_s11 + $0x30] sm:$0xff] %v2295_v7  ;;  %v2212_v57 = vadd.f32 %v2211_v21, %v2096_v58 }
 0x4a7   :  { %2375 = vst [vmem:[%s4577_s11 + $0x38] sm:$0xff] %v2296_v24 }
 0x4a8   :  { %v2298_v38 = vmax.f32 %v2212_v57, 0.0 }
 0x4a9   :  { %v2174_v56 = vpop.f32.mrf.mxu2 }
 0x4aa   :  { %v2187_v62 = vpop.f32.mrf.mxu3  ;;  %2318 = vst [vmem:[%s4577_s11 + $0x18] sm:$0xff] %v2298_v38 }
 0x4ad   :  { %v2213_v22 = vpop.f32.mrf.mxu1 }
 0x4b1   :  { %v2198_v17 = vpop.f32.mrf.mxu0 }
 0x4b2   :  { %v2199_v39 = vadd.f32 %v2198_v17, %v2096_v58 }
 0x4b4   :  { %v2297_v28 = vmax.f32 %v2199_v39, 0.0 }
 0x4b6   :  { %2317 = vst [vmem:[%s4577_s11 + $0x10] sm:$0xff] %v2297_v28 }
 0x4b9   :  { %v2200_v29 = vpop.f32.mrf.mxu0 }
 0x4c5   :  { %v2224_v41 = vpop.f32.mrf.mxu2 }
 0x4c6   :  { %v2225_v2 = vadd.f32 %v2224_v41, %v2096_v58  ;;  %v2237_v42 = vpop.f32.mrf.mxu3 }
 0x4c7   :  { %v2238_v45 = vadd.f32 %v2237_v42, %v2096_v58 }
 0x4c8   :  { %v2299_v13 = vmax.f32 %v2225_v2, 0.0 }
 0x4c9   :  { %v2300_v51 = vmax.f32 %v2238_v45, 0.0 }
 0x4ca   :  { %2376 = vst [vmem:[%s4577_s11 + $0x40] sm:$0xff] %v2299_v13 }
 0x4cb   :  { %2377 = vst [vmem:[%s4577_s11 + $0x48] sm:$0xff] %v2300_v51 }
 0x4cd   :  { %v2226_v63 = vpop.f32.mrf.mxu2 }
 0x4ce   :  { %v2239_v55 = vpop.f32.mrf.mxu3 }
 0x4d4   :  { %v2250_v26 = vpop.f32.mrf.mxu0 }
 0x4d5   :  { %v2251_v19 = vadd.f32 %v2250_v26, %v2096_v58  ;;  %v2263_v6 = vpop.f32.mrf.mxu1 }
 0x4d6   :  { %v2264_v50 = vadd.f32 %v2263_v6, %v2096_v58 }
 0x4d7   :  { %v2301_v59 = vmax.f32 %v2251_v19, 0.0 }
 0x4d8   :  { %v2302_v40 = vmax.f32 %v2264_v50, 0.0 }
 0x4d9   :  { %v2276_v60 = vpop.f32.mrf.mxu2  ;;  %2319 = vst [vmem:[%s4577_s11 + $0x20] sm:$0xff] %v2301_v59 }
 0x4da   :  { %v2277_v31 = vadd.f32 %v2276_v60, %v2096_v58  ;;  %v2289_v54 = vpop.f32.mrf.mxu3  ;;  %2320 = vst [vmem:[%s4577_s11 + $0x28] sm:$0xff] %v2302_v40 }
 0x4db   :  { %v2290_v35 = vadd.f32 %v2289_v54, %v2096_v58 }
 0x4dc   :  { %v2303_v15 = vmax.f32 %v2277_v31, 0.0  ;;  %v2252_v46 = vpop.f32.mrf.mxu0 }
 0x4dd   :  { %v2304_v20 = vmax.f32 %v2290_v35, 0.0  ;;  %v2265_v32 = vpop.f32.mrf.mxu1 }
 0x4de   :  { %2378 = vst [vmem:[%s4577_s11 + $0x50] sm:$0xff] %v2303_v15 }
 0x4df   :  { %2379 = vst [vmem:[%s4577_s11 + $0x58] sm:$0xff] %v2304_v20 }
 0x4e1   :  { %v2278_v52 = vpop.f32.mrf.mxu2 }
 0x4e2   :  { %v2291_v23 = vpop.f32.mrf.mxu3 }

</bundles_post_ra>
